<compile_context>
chip_gen: v7x
topology: tpu7x:2x2x1
jax: 0.10.0
libtpu: 0.0.40
codegen_flags: <defaults>
</compile_context>

<pallas_src>
import functools

import jax
import jax.numpy as jnp
from jax import lax
from jax.experimental import pallas as pl
from jax.experimental.pallas import tpu as pltpu


# ----------------------------------------------------------------------------
# In-kernel helper: circular group-sum along the lane axis.
# v: (1, total) f32.  Returns (1, total) where lane j holds the sum of all lanes
# j' with j' % group == j % group.  Pure XLU rolls (different VLIW slot than VALU).
# ----------------------------------------------------------------------------
def _lane_group_circular_sum(v, group, total):
    reps = total // group
    if reps <= 1:
        return v
    if reps & (reps - 1) == 0:                 # power-of-two: log2(reps) doubling rolls
        out = v
        shift = group
        while shift < total:
            out = out + pltpu.roll(out, shift, axis=1)
            shift *= 2
        return out
    out = v                                    # generic fallback: reps-1 single rolls
    for t in range(1, reps):
        out = out + pltpu.roll(v, t * group, axis=1)
    return out


# ----------------------------------------------------------------------------
# Single fused kernel: conv1 + bias + ReLU + BN1 + conv2 + bias + ReLU + BN2.
# Input x_ref is PyTorch NCHW; output o_ref is NCHW.
# ----------------------------------------------------------------------------
def _unet_block_kernel(pad, batch_norm, dims, dot_dtype,
                       x_ref, wb1_ref, wb2_ref,
                       b1m_ref, g1m_ref, be1m_ref,
                       b2m_ref, g2m_ref, be2m_ref,
                       o_ref, xp1_ref, xp2_ref):
    n, cin, h0, w0, cout, h1, w1, h2, w2 = dims
    hp1, wp1 = h0 + 2 * pad, w0 + 2 * pad
    hp2, wp2 = h1 + 2 * pad, w1 + 2 * pad
    f32 = jnp.float32

    # ---- Fused training-mode BatchNorm on a (rows, W*Cout)-merged slab ----------------------
    def bn(acc, gm, bm):
        rows, width = acc.shape
        cnt = rows * (width // cout)
        s = _lane_group_circular_sum(jnp.sum(acc, axis=0, keepdims=True), cout, width)
        mean = s * (1.0 / cnt)
        cent = acc - mean                                        # centered two-pass variance
        ss = _lane_group_circular_sum(jnp.sum(cent * cent, axis=0, keepdims=True), cout, width)
        inv = lax.rsqrt(ss * (1.0 / cnt) + 1e-5)
        return cent * (inv * gm) + bm

    # ---- Conv1 input: channel-major padded scratch (cin, n, hp1, wp1); zero only the halo ----
    if pad > 0:
        xp1_ref[:, :, 0:pad, :] = jnp.zeros((cin, n, pad, wp1), f32)
        xp1_ref[:, :, pad + h0:, :] = jnp.zeros((cin, n, pad, wp1), f32)
        xp1_ref[:, :, pad:pad + h0, 0:pad] = jnp.zeros((cin, n, h0, pad), f32)
        xp1_ref[:, :, pad:pad + h0, pad + w0:] = jnp.zeros((cin, n, h0, pad), f32)
    for c in range(cin):                                         # NCHW consumed directly
        xp1_ref[c, :, pad:pad + h0, pad:pad + w0] = x_ref[:, c, :, :].astype(f32)

    # ---- Conv1 + bias + ReLU: 3*cin banded matmuls into a lane-dense (n*h1, w1*cout) acc ----
    m1 = n * h1
    acc1 = jnp.zeros((m1, w1 * cout), f32)
    for kh in range(3):
        for c in range(cin):
            rows = xp1_ref[c, :, kh:kh + h1, :].reshape(m1, wp1).astype(dot_dtype)
            acc1 += jnp.dot(rows, wb1_ref[c, kh], preferred_element_type=f32)
    acc1 = jnp.maximum(acc1 + b1m_ref[...], 0.0)
    if batch_norm:
        acc1 = bn(acc1, g1m_ref[...], be1m_ref[...])

    # ---- Conv2 input: (n, hp2, wp2*cout) merged padded scratch; zero only the halo ----------
    if pad > 0:
        xp2_ref[:, 0:pad, :] = jnp.zeros((n, pad, wp2 * cout), f32)
        xp2_ref[:, pad + h1:, :] = jnp.zeros((n, pad, wp2 * cout), f32)
        xp2_ref[:, pad:pad + h1, 0:pad * cout] = jnp.zeros((n, h1, pad * cout), f32)
        xp2_ref[:, pad:pad + h1, (pad + w1) * cout:] = jnp.zeros((n, h1, pad * cout), f32)
    xp2_ref[:, pad:pad + h1, pad * cout:(pad + w1) * cout] = acc1.reshape(n, h1, w1 * cout)

    # ---- Conv2 + bias + ReLU: 3 banded matmuls into a lane-dense (n*h2, w2*cout) acc --------
    m2 = n * h2
    acc2 = jnp.zeros((m2, w2 * cout), f32)
    for kh in range(3):
        rows = xp2_ref[:, kh:kh + h2, :].reshape(m2, wp2 * cout).astype(dot_dtype)
        acc2 += jnp.dot(rows, wb2_ref[kh], preferred_element_type=f32)
    acc2 = jnp.maximum(acc2 + b2m_ref[...], 0.0)
    if batch_norm:
        acc2 = bn(acc2, g2m_ref[...], be2m_ref[...])

    # ---- De-interleave the W*Cout merged lanes back to channels and store NCHW --------------
    jj = lax.broadcasted_iota(jnp.int32, (w2 * cout, w2), 0)
    qq = lax.broadcasted_iota(jnp.int32, (w2 * cout, w2), 1)
    for co in range(cout):
        sel = (jj == qq * cout + co).astype(f32)                 # picks columns q*cout + co
        chan = jnp.dot(acc2, sel, preferred_element_type=f32)    # (n*h2, w2)
        o_ref[:, co, :, :] = chan.reshape(n, h2, w2).astype(o_ref.dtype)


# ----------------------------------------------------------------------------
# Weight folding (hoistable to parameter-load time): banded matrices over the
# W*C-merged minor dim, built once from the PyTorch OIHW weights.
# ----------------------------------------------------------------------------
def _banded_weights_per_channel(w_oihw, wp, wo):
    # B[c, kh, iw, ow*cout + co] = w[co, c, kh, iw - ow]  (zero outside the 3-wide band)
    cout, cin, khs, kws = w_oihw.shape
    wt = jnp.transpose(w_oihw, (1, 2, 3, 0)).astype(jnp.float32)      # (cin, kh, kw, cout)
    kw_rel = jnp.arange(wp)[:, None] - jnp.arange(wo)[None, :]        # (wp, wo)
    valid = (kw_rel >= 0) & (kw_rel < kws)
    band = wt[:, :, jnp.clip(kw_rel, 0, kws - 1), :]                  # (cin, kh, wp, wo, cout)
    band = band * valid[None, None, :, :, None]
    return band.reshape(cin, khs, wp, wo * cout)


def _banded_weights_merged(w_oihw, wp, wo):
    # WB[kh, iw*cin + ci, ow*cout + co] = w[co, ci, kh, iw - ow]
    cout, cin, khs, kws = w_oihw.shape
    band = _banded_weights_per_channel(w_oihw, wp, wo)                # (cin, kh, wp, wo*cout)
    band = jnp.transpose(band, (1, 2, 0, 3))                          # (kh, wp, cin, wo*cout)
    return band.reshape(khs, wp * cin, wo * cout)


# ----------------------------------------------------------------------------
# UNetConvBlock forward wrapper.  Input/output in PyTorch NCHW layout; no
# activation-tensor transposes on either side of the pallas_call.
# ----------------------------------------------------------------------------
@functools.partial(jax.jit, static_argnames=("padding", "batch_norm", "use_bf16_dot"))
def unet_conv_block(x, w1, b1, g1, be1, w2, b2, g2, be2,
                    padding=True, batch_norm=True, use_bf16_dot=False):
    pad = int(padding)
    n, cin, h, w = x.shape
    cout = w1.shape[0]
    h1, w1o = h + 2 * pad - 2, w + 2 * pad - 2        # after conv1
    h2, w2o = h1 + 2 * pad - 2, w1o + 2 * pad - 2     # after conv2
    hp1, wp1 = h + 2 * pad, w + 2 * pad
    hp2, wp2 = h1 + 2 * pad, w1o + 2 * pad
    dot_dtype = jnp.bfloat16 if use_bf16_dot else jnp.float32

    wb1 = _banded_weights_per_channel(w1, wp1, w1o).astype(dot_dtype)  # (cin, 3, wp1, w1o*cout)
    wb2 = _banded_weights_merged(w2, wp2, w2o).astype(dot_dtype)       # (3, wp2*cout, w2o*cout)
    tile1 = lambda p: jnp.tile(p.astype(jnp.float32), w1o).reshape(1, w1o * cout)
    tile2 = lambda p: jnp.tile(p.astype(jnp.float32), w2o).reshape(1, w2o * cout)

    dims = (n, cin, h, w, cout, h1, w1o, h2, w2o)
    kernel = functools.partial(_unet_block_kernel, pad, bool(batch_norm), dims, dot_dtype)
    return pl.pallas_call(
        kernel,
        out_shape=jax.ShapeDtypeStruct((n, cout, h2, w2o), x.dtype),
        scratch_shapes=[
            pltpu.VMEM((cin, n, hp1, wp1), jnp.float32),       # padded conv1 input (chan-major)
            pltpu.VMEM((n, hp2, wp2 * cout), jnp.float32),     # padded conv2 input (W*C merged)
        ],
        compiler_params=pltpu.CompilerParams(vmem_limit_bytes=32 * 1024 * 1024),
    )(x, wb1, wb2, tile1(b1), tile1(g1), tile1(be1), tile2(b2), tile2(g2), tile2(be2))


# ----------------------------------------------------------------------------
# Plain-JAX reference (mirrors the PyTorch forward) for correctness checking.
# ----------------------------------------------------------------------------
def reference(x, w1, b1, g1, be1, w2, b2, g2, be2, padding=True, batch_norm=True):
    pad = int(padding)

    def conv(x, w, b):
        y = lax.conv_general_dilated(
            x, w, window_strides=(1, 1), padding=((pad, pad), (pad, pad)),
            dimension_numbers=("NCHW", "OIHW", "NCHW"))
        return y + b[None, :, None, None]

    def bn(x, g, be):
        m = jnp.mean(x, axis=(0, 2, 3), keepdims=True)
        v = jnp.var(x, axis=(0, 2, 3), keepdims=True)
        return (x - m) / jnp.sqrt(v + 1e-5) * g[None, :, None, None] + be[None, :, None, None]

    y = jnp.maximum(conv(x, w1, b1), 0.0)
    if batch_norm:
        y = bn(y, g1, be1)
    y = jnp.maximum(conv(y, w2, b2), 0.0)
    if batch_norm:
        y = bn(y, g2, be2)
    return y


if __name__ == "__main__":
    N, Cin, Cout, H, W = 2, 4, 8, 16, 16
    key = jax.random.PRNGKey(0)
    k1, k2, k3, k4, k5 = jax.random.split(key, 5)

    x = jax.random.normal(k1, (N, Cin, H, W), jnp.float32)
    w1 = jax.random.normal(k2, (Cout, Cin, 3, 3), jnp.float32) * 0.1
    b1 = jax.random.normal(k3, (Cout,), jnp.float32) * 0.1
    w2 = jax.random.normal(k4, (Cout, Cout, 3, 3), jnp.float32) * 0.1
    b2 = jax.random.normal(k5, (Cout,), jnp.float32) * 0.1
    g1 = jnp.ones((Cout,), jnp.float32)
    be1 = jnp.zeros((Cout,), jnp.float32)
    g2 = jnp.ones((Cout,), jnp.float32)
    be2 = jnp.zeros((Cout,), jnp.float32)

    ref = reference(x, w1, b1, g1, be1, w2, b2, g2, be2, True, True)

    # f32 MXU operands: strict check.
    out = unet_conv_block(x, w1, b1, g1, be1, w2, b2, g2, be2,
                          padding=True, batch_norm=True, use_bf16_dot=False)
    out = jax.block_until_ready(out)
    assert out.shape == (N, Cout, H, W), out.shape
    assert jnp.allclose(out, ref, atol=1e-4, rtol=1e-4), float(jnp.max(jnp.abs(out - ref)))

    # bf16 MXU operands (v6e/v7x path), f32 accumulation/BN: looser tolerance.
    out_bf = unet_conv_block(x, w1, b1, g1, be1, w2, b2, g2, be2,
                             padding=True, batch_norm=True, use_bf16_dot=True)
    out_bf = jax.block_until_ready(out_bf)
    assert out_bf.shape == (N, Cout, H, W), out_bf.shape
    assert jnp.allclose(out_bf, ref, atol=1e-1, rtol=1e-1), float(jnp.max(jnp.abs(out_bf - ref)))

    print("KERNEL_OK")
</pallas_src>

<mosaic_0001>
module attributes {stable_mosaic.version = 11 : i64} {
  func.func @_unet_block_kernel(%arg0: memref<2x4x16x16xf32, #tpu.memory_space<vmem>>, %arg1: memref<4x3x18x128xf32, #tpu.memory_space<vmem>>, %arg2: memref<3x144x128xf32, #tpu.memory_space<vmem>>, %arg3: memref<1x128xf32, #tpu.memory_space<vmem>>, %arg4: memref<1x128xf32, #tpu.memory_space<vmem>>, %arg5: memref<1x128xf32, #tpu.memory_space<vmem>>, %arg6: memref<1x128xf32, #tpu.memory_space<vmem>>, %arg7: memref<1x128xf32, #tpu.memory_space<vmem>>, %arg8: memref<1x128xf32, #tpu.memory_space<vmem>>, %arg9: memref<2x8x16x16xf32, #tpu.memory_space<vmem>>, %arg10: memref<4x2x18x18xf32, #tpu.memory_space<vmem>>, %arg11: memref<2x18x144xf32, #tpu.memory_space<vmem>>) attributes {dimension_semantics = [], scalar_prefetch = 0 : i64, scratch_operands = 2 : i64, tpu.core_type = #tpu.core_type<tc>} {
    %cst = arith.constant 0.000000e+00 : f32
    %0 = vector.broadcast %cst : f32 to vector<4x2x1x18xf32>
    %c0 = arith.constant 0 : index
    %c0_0 = arith.constant 0 : index
    %c0_1 = arith.constant 0 : index
    %c0_2 = arith.constant 0 : index
    %1 = vector.load %arg10[%c0, %c0_0, %c0_1, %c0_2] : memref<4x2x18x18xf32, #tpu.memory_space<vmem>>, vector<4x2x1x18xf32>
    tpu.vector_store %arg10[%c0, %c0_0, %c0_1, %c0_2], %0 {strides = array<i32>} : memref<4x2x18x18xf32, #tpu.memory_space<vmem>>, vector<4x2x1x18xf32>,
    %cst_3 = arith.constant 0.000000e+00 : f32
    %2 = vector.broadcast %cst_3 : f32 to vector<4x2x1x18xf32>
    %c0_4 = arith.constant 0 : index
    %c0_5 = arith.constant 0 : index
    %c17 = arith.constant 17 : index
    %c0_6 = arith.constant 0 : index
    %3 = vector.load %arg10[%c0_4, %c0_5, %c17, %c0_6] : memref<4x2x18x18xf32, #tpu.memory_space<vmem>>, vector<4x2x1x18xf32>
    tpu.vector_store %arg10[%c0_4, %c0_5, %c17, %c0_6], %2 {strides = array<i32>} : memref<4x2x18x18xf32, #tpu.memory_space<vmem>>, vector<4x2x1x18xf32>,
    %cst_7 = arith.constant 0.000000e+00 : f32
    %4 = vector.broadcast %cst_7 : f32 to vector<4x2x16x1xf32>
    %c0_8 = arith.constant 0 : index
    %c0_9 = arith.constant 0 : index
    %c1 = arith.constant 1 : index
    %c0_10 = arith.constant 0 : index
    %5 = vector.load %arg10[%c0_8, %c0_9, %c1, %c0_10] : memref<4x2x18x18xf32, #tpu.memory_space<vmem>>, vector<4x2x16x1xf32>
    tpu.vector_store %arg10[%c0_8, %c0_9, %c1, %c0_10], %4 {strides = array<i32>} : memref<4x2x18x18xf32, #tpu.memory_space<vmem>>, vector<4x2x16x1xf32>,
    %cst_11 = arith.constant 0.000000e+00 : f32
    %6 = vector.broadcast %cst_11 : f32 to vector<4x2x16x1xf32>
    %c0_12 = arith.constant 0 : index
    %c0_13 = arith.constant 0 : index
    %c1_14 = arith.constant 1 : index
    %c17_15 = arith.constant 17 : index
    %7 = vector.load %arg10[%c0_12, %c0_13, %c1_14, %c17_15] : memref<4x2x18x18xf32, #tpu.memory_space<vmem>>, vector<4x2x16x1xf32>
    tpu.vector_store %arg10[%c0_12, %c0_13, %c1_14, %c17_15], %6 {strides = array<i32>} : memref<4x2x18x18xf32, #tpu.memory_space<vmem>>, vector<4x2x16x1xf32>,
    %c0_16 = arith.constant 0 : index
    %c0_17 = arith.constant 0 : index
    %c0_18 = arith.constant 0 : index
    %c0_19 = arith.constant 0 : index
    %8 = vector.load %arg0[%c0_16, %c0_17, %c0_18, %c0_19] : memref<2x4x16x16xf32, #tpu.memory_space<vmem>>, vector<2x1x16x16xf32>
    %9 = vector.shape_cast %8 : vector<2x1x16x16xf32> to vector<2x16x16xf32>
    %c0_20 = arith.constant 0 : index
    %c0_21 = arith.constant 0 : index
    %c1_22 = arith.constant 1 : index
    %c1_23 = arith.constant 1 : index
    %10 = vector.load %arg10[%c0_20, %c0_21, %c1_22, %c1_23] : memref<4x2x18x18xf32, #tpu.memory_space<vmem>>, vector<1x2x16x16xf32>
    %11 = vector.shape_cast %10 : vector<1x2x16x16xf32> to vector<2x16x16xf32>
    %12 = vector.shape_cast %9 : vector<2x16x16xf32> to vector<1x2x16x16xf32>
    tpu.vector_store %arg10[%c0_20, %c0_21, %c1_22, %c1_23], %12 {strides = array<i32>} : memref<4x2x18x18xf32, #tpu.memory_space<vmem>>, vector<1x2x16x16xf32>,
    %c0_24 = arith.constant 0 : index
    %c1_25 = arith.constant 1 : index
    %c0_26 = arith.constant 0 : index
    %c0_27 = arith.constant 0 : index
    %13 = vector.load %arg0[%c0_24, %c1_25, %c0_26, %c0_27] : memref<2x4x16x16xf32, #tpu.memory_space<vmem>>, vector<2x1x16x16xf32>
    %14 = vector.shape_cast %13 : vector<2x1x16x16xf32> to vector<2x16x16xf32>
    %c1_28 = arith.constant 1 : index
    %c0_29 = arith.constant 0 : index
    %c1_30 = arith.constant 1 : index
    %c1_31 = arith.constant 1 : index
    %15 = vector.load %arg10[%c1_28, %c0_29, %c1_30, %c1_31] : memref<4x2x18x18xf32, #tpu.memory_space<vmem>>, vector<1x2x16x16xf32>
    %16 = vector.shape_cast %15 : vector<1x2x16x16xf32> to vector<2x16x16xf32>
    %17 = vector.shape_cast %14 : vector<2x16x16xf32> to vector<1x2x16x16xf32>
    tpu.vector_store %arg10[%c1_28, %c0_29, %c1_30, %c1_31], %17 {strides = array<i32>} : memref<4x2x18x18xf32, #tpu.memory_space<vmem>>, vector<1x2x16x16xf32>,
    %c0_32 = arith.constant 0 : index
    %c2 = arith.constant 2 : index
    %c0_33 = arith.constant 0 : index
    %c0_34 = arith.constant 0 : index
    %18 = vector.load %arg0[%c0_32, %c2, %c0_33, %c0_34] : memref<2x4x16x16xf32, #tpu.memory_space<vmem>>, vector<2x1x16x16xf32>
    %19 = vector.shape_cast %18 : vector<2x1x16x16xf32> to vector<2x16x16xf32>
    %c2_35 = arith.constant 2 : index
    %c0_36 = arith.constant 0 : index
    %c1_37 = arith.constant 1 : index
    %c1_38 = arith.constant 1 : index
    %20 = vector.load %arg10[%c2_35, %c0_36, %c1_37, %c1_38] : memref<4x2x18x18xf32, #tpu.memory_space<vmem>>, vector<1x2x16x16xf32>
    %21 = vector.shape_cast %20 : vector<1x2x16x16xf32> to vector<2x16x16xf32>
    %22 = vector.shape_cast %19 : vector<2x16x16xf32> to vector<1x2x16x16xf32>
    tpu.vector_store %arg10[%c2_35, %c0_36, %c1_37, %c1_38], %22 {strides = array<i32>} : memref<4x2x18x18xf32, #tpu.memory_space<vmem>>, vector<1x2x16x16xf32>,
    %c0_39 = arith.constant 0 : index
    %c3 = arith.constant 3 : index
    %c0_40 = arith.constant 0 : index
    %c0_41 = arith.constant 0 : index
    %23 = vector.load %arg0[%c0_39, %c3, %c0_40, %c0_41] : memref<2x4x16x16xf32, #tpu.memory_space<vmem>>, vector<2x1x16x16xf32>
    %24 = vector.shape_cast %23 : vector<2x1x16x16xf32> to vector<2x16x16xf32>
    %c3_42 = arith.constant 3 : index
    %c0_43 = arith.constant 0 : index
    %c1_44 = arith.constant 1 : index
    %c1_45 = arith.constant 1 : index
    %25 = vector.load %arg10[%c3_42, %c0_43, %c1_44, %c1_45] : memref<4x2x18x18xf32, #tpu.memory_space<vmem>>, vector<1x2x16x16xf32>
    %26 = vector.shape_cast %25 : vector<1x2x16x16xf32> to vector<2x16x16xf32>
    %27 = vector.shape_cast %24 : vector<2x16x16xf32> to vector<1x2x16x16xf32>
    tpu.vector_store %arg10[%c3_42, %c0_43, %c1_44, %c1_45], %27 {strides = array<i32>} : memref<4x2x18x18xf32, #tpu.memory_space<vmem>>, vector<1x2x16x16xf32>,
    %cst_46 = arith.constant 0.000000e+00 : f32
    %28 = vector.broadcast %cst_46 : f32 to vector<32x128xf32>
    %c0_47 = arith.constant 0 : index
    %c0_48 = arith.constant 0 : index
    %c0_49 = arith.constant 0 : index
    %c0_50 = arith.constant 0 : index
    %29 = vector.load %arg10[%c0_47, %c0_48, %c0_49, %c0_50] : memref<4x2x18x18xf32, #tpu.memory_space<vmem>>, vector<1x2x16x18xf32>
    %30 = vector.shape_cast %29 : vector<1x2x16x18xf32> to vector<2x16x18xf32>
    %31 = vector.shape_cast %30 : vector<2x16x18xf32> to vector<32x18xf32>
    %c0_51 = arith.constant 0 : index
    %c0_52 = arith.constant 0 : index
    %c0_53 = arith.constant 0 : index
    %c0_54 = arith.constant 0 : index
    %32 = vector.load %arg1[%c0_51, %c0_52, %c0_53, %c0_54] : memref<4x3x18x128xf32, #tpu.memory_space<vmem>>, vector<1x1x18x128xf32>
    %33 = vector.shape_cast %32 : vector<1x1x18x128xf32> to vector<18x128xf32>
    %cst_55 = arith.constant dense<0.000000e+00> : vector<32x128xf32>
    %34 = tpu.matmul %31, %33, %cst_55 {dimension_numbers = #tpu.dot_dimension_numbers<[1], [0], [0], [1], [0, 0, 1, 1], [], []>} : vector<32x18xf32>, vector<18x128xf32>, vector<32x128xf32> -> vector<32x128xf32>
    %35 = arith.addf %28, %34 : vector<32x128xf32>
    %c1_56 = arith.constant 1 : index
    %c0_57 = arith.constant 0 : index
    %c0_58 = arith.constant 0 : index
    %c0_59 = arith.constant 0 : index
    %36 = vector.load %arg10[%c1_56, %c0_57, %c0_58, %c0_59] : memref<4x2x18x18xf32, #tpu.memory_space<vmem>>, vector<1x2x16x18xf32>
    %37 = vector.shape_cast %36 : vector<1x2x16x18xf32> to vector<2x16x18xf32>
    %38 = vector.shape_cast %37 : vector<2x16x18xf32> to vector<32x18xf32>
    %c1_60 = arith.constant 1 : index
    %c0_61 = arith.constant 0 : index
    %c0_62 = arith.constant 0 : index
    %c0_63 = arith.constant 0 : index
    %39 = vector.load %arg1[%c1_60, %c0_61, %c0_62, %c0_63] : memref<4x3x18x128xf32, #tpu.memory_space<vmem>>, vector<1x1x18x128xf32>
    %40 = vector.shape_cast %39 : vector<1x1x18x128xf32> to vector<18x128xf32>
    %cst_64 = arith.constant dense<0.000000e+00> : vector<32x128xf32>
    %41 = tpu.matmul %38, %40, %cst_64 {dimension_numbers = #tpu.dot_dimension_numbers<[1], [0], [0], [1], [0, 0, 1, 1], [], []>} : vector<32x18xf32>, vector<18x128xf32>, vector<32x128xf32> -> vector<32x128xf32>
    %42 = arith.addf %35, %41 : vector<32x128xf32>
    %c2_65 = arith.constant 2 : index
    %c0_66 = arith.constant 0 : index
    %c0_67 = arith.constant 0 : index
    %c0_68 = arith.constant 0 : index
    %43 = vector.load %arg10[%c2_65, %c0_66, %c0_67, %c0_68] : memref<4x2x18x18xf32, #tpu.memory_space<vmem>>, vector<1x2x16x18xf32>
    %44 = vector.shape_cast %43 : vector<1x2x16x18xf32> to vector<2x16x18xf32>
    %45 = vector.shape_cast %44 : vector<2x16x18xf32> to vector<32x18xf32>
    %c2_69 = arith.constant 2 : index
    %c0_70 = arith.constant 0 : index
    %c0_71 = arith.constant 0 : index
    %c0_72 = arith.constant 0 : index
    %46 = vector.load %arg1[%c2_69, %c0_70, %c0_71, %c0_72] : memref<4x3x18x128xf32, #tpu.memory_space<vmem>>, vector<1x1x18x128xf32>
    %47 = vector.shape_cast %46 : vector<1x1x18x128xf32> to vector<18x128xf32>
    %cst_73 = arith.constant dense<0.000000e+00> : vector<32x128xf32>
    %48 = tpu.matmul %45, %47, %cst_73 {dimension_numbers = #tpu.dot_dimension_numbers<[1], [0], [0], [1], [0, 0, 1, 1], [], []>} : vector<32x18xf32>, vector<18x128xf32>, vector<32x128xf32> -> vector<32x128xf32>
    %49 = arith.addf %42, %48 : vector<32x128xf32>
    %c3_74 = arith.constant 3 : index
    %c0_75 = arith.constant 0 : index
    %c0_76 = arith.constant 0 : index
    %c0_77 = arith.constant 0 : index
    %50 = vector.load %arg10[%c3_74, %c0_75, %c0_76, %c0_77] : memref<4x2x18x18xf32, #tpu.memory_space<vmem>>, vector<1x2x16x18xf32>
    %51 = vector.shape_cast %50 : vector<1x2x16x18xf32> to vector<2x16x18xf32>
    %52 = vector.shape_cast %51 : vector<2x16x18xf32> to vector<32x18xf32>
    %c3_78 = arith.constant 3 : index
    %c0_79 = arith.constant 0 : index
    %c0_80 = arith.constant 0 : index
    %c0_81 = arith.constant 0 : index
    %53 = vector.load %arg1[%c3_78, %c0_79, %c0_80, %c0_81] : memref<4x3x18x128xf32, #tpu.memory_space<vmem>>, vector<1x1x18x128xf32>
    %54 = vector.shape_cast %53 : vector<1x1x18x128xf32> to vector<18x128xf32>
    %cst_82 = arith.constant dense<0.000000e+00> : vector<32x128xf32>
    %55 = tpu.matmul %52, %54, %cst_82 {dimension_numbers = #tpu.dot_dimension_numbers<[1], [0], [0], [1], [0, 0, 1, 1], [], []>} : vector<32x18xf32>, vector<18x128xf32>, vector<32x128xf32> -> vector<32x128xf32>
    %56 = arith.addf %49, %55 : vector<32x128xf32>
    %c0_83 = arith.constant 0 : index
    %c0_84 = arith.constant 0 : index
    %c1_85 = arith.constant 1 : index
    %c0_86 = arith.constant 0 : index
    %57 = vector.load %arg10[%c0_83, %c0_84, %c1_85, %c0_86] : memref<4x2x18x18xf32, #tpu.memory_space<vmem>>, vector<1x2x16x18xf32>
    %58 = vector.shape_cast %57 : vector<1x2x16x18xf32> to vector<2x16x18xf32>
    %59 = vector.shape_cast %58 : vector<2x16x18xf32> to vector<32x18xf32>
    %c0_87 = arith.constant 0 : index
    %c1_88 = arith.constant 1 : index
    %c0_89 = arith.constant 0 : index
    %c0_90 = arith.constant 0 : index
    %60 = vector.load %arg1[%c0_87, %c1_88, %c0_89, %c0_90] : memref<4x3x18x128xf32, #tpu.memory_space<vmem>>, vector<1x1x18x128xf32>
    %61 = vector.shape_cast %60 : vector<1x1x18x128xf32> to vector<18x128xf32>
    %cst_91 = arith.constant dense<0.000000e+00> : vector<32x128xf32>
    %62 = tpu.matmul %59, %61, %cst_91 {dimension_numbers = #tpu.dot_dimension_numbers<[1], [0], [0], [1], [0, 0, 1, 1], [], []>} : vector<32x18xf32>, vector<18x128xf32>, vector<32x128xf32> -> vector<32x128xf32>
    %63 = arith.addf %56, %62 : vector<32x128xf32>
    %c1_92 = arith.constant 1 : index
    %c0_93 = arith.constant 0 : index
    %c1_94 = arith.constant 1 : index
    %c0_95 = arith.constant 0 : index
    %64 = vector.load %arg10[%c1_92, %c0_93, %c1_94, %c0_95] : memref<4x2x18x18xf32, #tpu.memory_space<vmem>>, vector<1x2x16x18xf32>
    %65 = vector.shape_cast %64 : vector<1x2x16x18xf32> to vector<2x16x18xf32>
    %66 = vector.shape_cast %65 : vector<2x16x18xf32> to vector<32x18xf32>
    %c1_96 = arith.constant 1 : index
    %c1_97 = arith.constant 1 : index
    %c0_98 = arith.constant 0 : index
    %c0_99 = arith.constant 0 : index
    %67 = vector.load %arg1[%c1_96, %c1_97, %c0_98, %c0_99] : memref<4x3x18x128xf32, #tpu.memory_space<vmem>>, vector<1x1x18x128xf32>
    %68 = vector.shape_cast %67 : vector<1x1x18x128xf32> to vector<18x128xf32>
    %cst_100 = arith.constant dense<0.000000e+00> : vector<32x128xf32>
    %69 = tpu.matmul %66, %68, %cst_100 {dimension_numbers = #tpu.dot_dimension_numbers<[1], [0], [0], [1], [0, 0, 1, 1], [], []>} : vector<32x18xf32>, vector<18x128xf32>, vector<32x128xf32> -> vector<32x128xf32>
    %70 = arith.addf %63, %69 : vector<32x128xf32>
    %c2_101 = arith.constant 2 : index
    %c0_102 = arith.constant 0 : index
    %c1_103 = arith.constant 1 : index
    %c0_104 = arith.constant 0 : index
    %71 = vector.load %arg10[%c2_101, %c0_102, %c1_103, %c0_104] : memref<4x2x18x18xf32, #tpu.memory_space<vmem>>, vector<1x2x16x18xf32>
    %72 = vector.shape_cast %71 : vector<1x2x16x18xf32> to vector<2x16x18xf32>
    %73 = vector.shape_cast %72 : vector<2x16x18xf32> to vector<32x18xf32>
    %c2_105 = arith.constant 2 : index
    %c1_106 = arith.constant 1 : index
    %c0_107 = arith.constant 0 : index
    %c0_108 = arith.constant 0 : index
    %74 = vector.load %arg1[%c2_105, %c1_106, %c0_107, %c0_108] : memref<4x3x18x128xf32, #tpu.memory_space<vmem>>, vector<1x1x18x128xf32>
    %75 = vector.shape_cast %74 : vector<1x1x18x128xf32> to vector<18x128xf32>
    %cst_109 = arith.constant dense<0.000000e+00> : vector<32x128xf32>
    %76 = tpu.matmul %73, %75, %cst_109 {dimension_numbers = #tpu.dot_dimension_numbers<[1], [0], [0], [1], [0, 0, 1, 1], [], []>} : vector<32x18xf32>, vector<18x128xf32>, vector<32x128xf32> -> vector<32x128xf32>
    %77 = arith.addf %70, %76 : vector<32x128xf32>
    %c3_110 = arith.constant 3 : index
    %c0_111 = arith.constant 0 : index
    %c1_112 = arith.constant 1 : index
    %c0_113 = arith.constant 0 : index
    %78 = vector.load %arg10[%c3_110, %c0_111, %c1_112, %c0_113] : memref<4x2x18x18xf32, #tpu.memory_space<vmem>>, vector<1x2x16x18xf32>
    %79 = vector.shape_cast %78 : vector<1x2x16x18xf32> to vector<2x16x18xf32>
    %80 = vector.shape_cast %79 : vector<2x16x18xf32> to vector<32x18xf32>
    %c3_114 = arith.constant 3 : index
    %c1_115 = arith.constant 1 : index
    %c0_116 = arith.constant 0 : index
    %c0_117 = arith.constant 0 : index
    %81 = vector.load %arg1[%c3_114, %c1_115, %c0_116, %c0_117] : memref<4x3x18x128xf32, #tpu.memory_space<vmem>>, vector<1x1x18x128xf32>
    %82 = vector.shape_cast %81 : vector<1x1x18x128xf32> to vector<18x128xf32>
    %cst_118 = arith.constant dense<0.000000e+00> : vector<32x128xf32>
    %83 = tpu.matmul %80, %82, %cst_118 {dimension_numbers = #tpu.dot_dimension_numbers<[1], [0], [0], [1], [0, 0, 1, 1], [], []>} : vector<32x18xf32>, vector<18x128xf32>, vector<32x128xf32> -> vector<32x128xf32>
    %84 = arith.addf %77, %83 : vector<32x128xf32>
    %c0_119 = arith.constant 0 : index
    %c0_120 = arith.constant 0 : index
    %c2_121 = arith.constant 2 : index
    %c0_122 = arith.constant 0 : index
    %85 = vector.load %arg10[%c0_119, %c0_120, %c2_121, %c0_122] : memref<4x2x18x18xf32, #tpu.memory_space<vmem>>, vector<1x2x16x18xf32>
    %86 = vector.shape_cast %85 : vector<1x2x16x18xf32> to vector<2x16x18xf32>
    %87 = vector.shape_cast %86 : vector<2x16x18xf32> to vector<32x18xf32>
    %c0_123 = arith.constant 0 : index
    %c2_124 = arith.constant 2 : index
    %c0_125 = arith.constant 0 : index
    %c0_126 = arith.constant 0 : index
    %88 = vector.load %arg1[%c0_123, %c2_124, %c0_125, %c0_126] : memref<4x3x18x128xf32, #tpu.memory_space<vmem>>, vector<1x1x18x128xf32>
    %89 = vector.shape_cast %88 : vector<1x1x18x128xf32> to vector<18x128xf32>
    %cst_127 = arith.constant dense<0.000000e+00> : vector<32x128xf32>
    %90 = tpu.matmul %87, %89, %cst_127 {dimension_numbers = #tpu.dot_dimension_numbers<[1], [0], [0], [1], [0, 0, 1, 1], [], []>} : vector<32x18xf32>, vector<18x128xf32>, vector<32x128xf32> -> vector<32x128xf32>
    %91 = arith.addf %84, %90 : vector<32x128xf32>
    %c1_128 = arith.constant 1 : index
    %c0_129 = arith.constant 0 : index
    %c2_130 = arith.constant 2 : index
    %c0_131 = arith.constant 0 : index
    %92 = vector.load %arg10[%c1_128, %c0_129, %c2_130, %c0_131] : memref<4x2x18x18xf32, #tpu.memory_space<vmem>>, vector<1x2x16x18xf32>
    %93 = vector.shape_cast %92 : vector<1x2x16x18xf32> to vector<2x16x18xf32>
    %94 = vector.shape_cast %93 : vector<2x16x18xf32> to vector<32x18xf32>
    %c1_132 = arith.constant 1 : index
    %c2_133 = arith.constant 2 : index
    %c0_134 = arith.constant 0 : index
    %c0_135 = arith.constant 0 : index
    %95 = vector.load %arg1[%c1_132, %c2_133, %c0_134, %c0_135] : memref<4x3x18x128xf32, #tpu.memory_space<vmem>>, vector<1x1x18x128xf32>
    %96 = vector.shape_cast %95 : vector<1x1x18x128xf32> to vector<18x128xf32>
    %cst_136 = arith.constant dense<0.000000e+00> : vector<32x128xf32>
    %97 = tpu.matmul %94, %96, %cst_136 {dimension_numbers = #tpu.dot_dimension_numbers<[1], [0], [0], [1], [0, 0, 1, 1], [], []>} : vector<32x18xf32>, vector<18x128xf32>, vector<32x128xf32> -> vector<32x128xf32>
    %98 = arith.addf %91, %97 : vector<32x128xf32>
    %c2_137 = arith.constant 2 : index
    %c0_138 = arith.constant 0 : index
    %c2_139 = arith.constant 2 : index
    %c0_140 = arith.constant 0 : index
    %99 = vector.load %arg10[%c2_137, %c0_138, %c2_139, %c0_140] : memref<4x2x18x18xf32, #tpu.memory_space<vmem>>, vector<1x2x16x18xf32>
    %100 = vector.shape_cast %99 : vector<1x2x16x18xf32> to vector<2x16x18xf32>
    %101 = vector.shape_cast %100 : vector<2x16x18xf32> to vector<32x18xf32>
    %c2_141 = arith.constant 2 : index
    %c2_142 = arith.constant 2 : index
    %c0_143 = arith.constant 0 : index
    %c0_144 = arith.constant 0 : index
    %102 = vector.load %arg1[%c2_141, %c2_142, %c0_143, %c0_144] : memref<4x3x18x128xf32, #tpu.memory_space<vmem>>, vector<1x1x18x128xf32>
    %103 = vector.shape_cast %102 : vector<1x1x18x128xf32> to vector<18x128xf32>
    %cst_145 = arith.constant dense<0.000000e+00> : vector<32x128xf32>
    %104 = tpu.matmul %101, %103, %cst_145 {dimension_numbers = #tpu.dot_dimension_numbers<[1], [0], [0], [1], [0, 0, 1, 1], [], []>} : vector<32x18xf32>, vector<18x128xf32>, vector<32x128xf32> -> vector<32x128xf32>
    %105 = arith.addf %98, %104 : vector<32x128xf32>
    %c3_146 = arith.constant 3 : index
    %c0_147 = arith.constant 0 : index
    %c2_148 = arith.constant 2 : index
    %c0_149 = arith.constant 0 : index
    %106 = vector.load %arg10[%c3_146, %c0_147, %c2_148, %c0_149] : memref<4x2x18x18xf32, #tpu.memory_space<vmem>>, vector<1x2x16x18xf32>
    %107 = vector.shape_cast %106 : vector<1x2x16x18xf32> to vector<2x16x18xf32>
    %108 = vector.shape_cast %107 : vector<2x16x18xf32> to vector<32x18xf32>
    %c3_150 = arith.constant 3 : index
    %c2_151 = arith.constant 2 : index
    %c0_152 = arith.constant 0 : index
    %c0_153 = arith.constant 0 : index
    %109 = vector.load %arg1[%c3_150, %c2_151, %c0_152, %c0_153] : memref<4x3x18x128xf32, #tpu.memory_space<vmem>>, vector<1x1x18x128xf32>
    %110 = vector.shape_cast %109 : vector<1x1x18x128xf32> to vector<18x128xf32>
    %cst_154 = arith.constant dense<0.000000e+00> : vector<32x128xf32>
    %111 = tpu.matmul %108, %110, %cst_154 {dimension_numbers = #tpu.dot_dimension_numbers<[1], [0], [0], [1], [0, 0, 1, 1], [], []>} : vector<32x18xf32>, vector<18x128xf32>, vector<32x128xf32> -> vector<32x128xf32>
    %112 = arith.addf %105, %111 : vector<32x128xf32>
    %c0_155 = arith.constant 0 : index
    %c0_156 = arith.constant 0 : index
    %113 = vector.load %arg3[%c0_155, %c0_156] : memref<1x128xf32, #tpu.memory_space<vmem>>, vector<1x128xf32>
    %114 = vector.broadcast %113 : vector<1x128xf32> to vector<32x128xf32>
    %115 = arith.addf %112, %114 : vector<32x128xf32>
    %cst_157 = arith.constant 0.000000e+00 : f32
    %116 = vector.broadcast %cst_157 : f32 to vector<32x128xf32>
    %117 = arith.maximumf %115, %116 : vector<32x128xf32>
    %c0_158 = arith.constant 0 : index
    %c0_159 = arith.constant 0 : index
    %118 = vector.load %arg4[%c0_158, %c0_159] : memref<1x128xf32, #tpu.memory_space<vmem>>, vector<1x128xf32>
    %c0_160 = arith.constant 0 : index
    %c0_161 = arith.constant 0 : index
    %119 = vector.load %arg5[%c0_160, %c0_161] : memref<1x128xf32, #tpu.memory_space<vmem>>, vector<1x128xf32>
    %cst_162 = arith.constant dense<0.000000e+00> : vector<128xf32>
    %120 = vector.multi_reduction <add>, %117, %cst_162 [0] : vector<32x128xf32> to vector<128xf32>
    %121 = vector.shape_cast %120 : vector<128xf32> to vector<1x128xf32>
    %c8_i32 = arith.constant 8 : i32
    %122 = tpu.dynamic_rotate %121 by %c8_i32 dim 1 : vector<1x128xf32>, i32 -> vector<1x128xf32>
    %123 = arith.addf %121, %122 : vector<1x128xf32>
    %c16_i32 = arith.constant 16 : i32
    %124 = tpu.dynamic_rotate %123 by %c16_i32 dim 1 : vector<1x128xf32>, i32 -> vector<1x128xf32>
    %125 = arith.addf %123, %124 : vector<1x128xf32>
    %c32_i32 = arith.constant 32 : i32
    %126 = tpu.dynamic_rotate %125 by %c32_i32 dim 1 : vector<1x128xf32>, i32 -> vector<1x128xf32>
    %127 = arith.addf %125, %126 : vector<1x128xf32>
    %c64_i32 = arith.constant 64 : i32
    %128 = tpu.dynamic_rotate %127 by %c64_i32 dim 1 : vector<1x128xf32>, i32 -> vector<1x128xf32>
    %129 = arith.addf %127, %128 : vector<1x128xf32>
    %cst_163 = arith.constant 0.001953125 : f32
    %130 = vector.broadcast %cst_163 : f32 to vector<1x128xf32>
    %131 = arith.mulf %129, %130 : vector<1x128xf32>
    %132 = vector.broadcast %131 : vector<1x128xf32> to vector<32x128xf32>
    %133 = arith.subf %117, %132 : vector<32x128xf32>
    %134 = arith.mulf %133, %133 : vector<32x128xf32>
    %cst_164 = arith.constant dense<0.000000e+00> : vector<128xf32>
    %135 = vector.multi_reduction <add>, %134, %cst_164 [0] : vector<32x128xf32> to vector<128xf32>
    %136 = vector.shape_cast %135 : vector<128xf32> to vector<1x128xf32>
    %c8_i32_165 = arith.constant 8 : i32
    %137 = tpu.dynamic_rotate %136 by %c8_i32_165 dim 1 : vector<1x128xf32>, i32 -> vector<1x128xf32>
    %138 = arith.addf %136, %137 : vector<1x128xf32>
    %c16_i32_166 = arith.constant 16 : i32
    %139 = tpu.dynamic_rotate %138 by %c16_i32_166 dim 1 : vector<1x128xf32>, i32 -> vector<1x128xf32>
    %140 = arith.addf %138, %139 : vector<1x128xf32>
    %c32_i32_167 = arith.constant 32 : i32
    %141 = tpu.dynamic_rotate %140 by %c32_i32_167 dim 1 : vector<1x128xf32>, i32 -> vector<1x128xf32>
    %142 = arith.addf %140, %141 : vector<1x128xf32>
    %c64_i32_168 = arith.constant 64 : i32
    %143 = tpu.dynamic_rotate %142 by %c64_i32_168 dim 1 : vector<1x128xf32>, i32 -> vector<1x128xf32>
    %144 = arith.addf %142, %143 : vector<1x128xf32>
    %cst_169 = arith.constant 0.001953125 : f32
    %145 = vector.broadcast %cst_169 : f32 to vector<1x128xf32>
    %146 = arith.mulf %144, %145 : vector<1x128xf32>
    %cst_170 = arith.constant 9.99999974E-6 : f32
    %147 = vector.broadcast %cst_170 : f32 to vector<1x128xf32>
    %148 = arith.addf %146, %147 : vector<1x128xf32>
    %149 = math.rsqrt %148 : vector<1x128xf32>
    %150 = arith.mulf %149, %118 : vector<1x128xf32>
    %151 = vector.broadcast %150 : vector<1x128xf32> to vector<32x128xf32>
    %152 = arith.mulf %133, %151 : vector<32x128xf32>
    %153 = vector.broadcast %119 : vector<1x128xf32> to vector<32x128xf32>
    %154 = arith.addf %152, %153 : vector<32x128xf32>
    %cst_171 = arith.constant 0.000000e+00 : f32
    %155 = vector.broadcast %cst_171 : f32 to vector<2x1x144xf32>
    %c0_172 = arith.constant 0 : index
    %c0_173 = arith.constant 0 : index
    %c0_174 = arith.constant 0 : index
    %156 = vector.load %arg11[%c0_172, %c0_173, %c0_174] : memref<2x18x144xf32, #tpu.memory_space<vmem>>, vector<2x1x144xf32>
    tpu.vector_store %arg11[%c0_172, %c0_173, %c0_174], %155 {strides = array<i32>} : memref<2x18x144xf32, #tpu.memory_space<vmem>>, vector<2x1x144xf32>,
    %cst_175 = arith.constant 0.000000e+00 : f32
    %157 = vector.broadcast %cst_175 : f32 to vector<2x1x144xf32>
    %c0_176 = arith.constant 0 : index
    %c17_177 = arith.constant 17 : index
    %c0_178 = arith.constant 0 : index
    %158 = vector.load %arg11[%c0_176, %c17_177, %c0_178] : memref<2x18x144xf32, #tpu.memory_space<vmem>>, vector<2x1x144xf32>
    tpu.vector_store %arg11[%c0_176, %c17_177, %c0_178], %157 {strides = array<i32>} : memref<2x18x144xf32, #tpu.memory_space<vmem>>, vector<2x1x144xf32>,
    %cst_179 = arith.constant 0.000000e+00 : f32
    %159 = vector.broadcast %cst_179 : f32 to vector<2x16x8xf32>
    %c0_180 = arith.constant 0 : index
    %c1_181 = arith.constant 1 : index
    %c0_182 = arith.constant 0 : index
    %160 = vector.load %arg11[%c0_180, %c1_181, %c0_182] : memref<2x18x144xf32, #tpu.memory_space<vmem>>, vector<2x16x8xf32>
    tpu.vector_store %arg11[%c0_180, %c1_181, %c0_182], %159 {strides = array<i32>} : memref<2x18x144xf32, #tpu.memory_space<vmem>>, vector<2x16x8xf32>,
    %cst_183 = arith.constant 0.000000e+00 : f32
    %161 = vector.broadcast %cst_183 : f32 to vector<2x16x8xf32>
    %c0_184 = arith.constant 0 : index
    %c1_185 = arith.constant 1 : index
    %c136 = arith.constant 136 : index
    %162 = vector.load %arg11[%c0_184, %c1_185, %c136] : memref<2x18x144xf32, #tpu.memory_space<vmem>>, vector<2x16x8xf32>
    tpu.vector_store %arg11[%c0_184, %c1_185, %c136], %161 {strides = array<i32>} : memref<2x18x144xf32, #tpu.memory_space<vmem>>, vector<2x16x8xf32>,
    %163 = vector.shape_cast %154 : vector<32x128xf32> to vector<2x16x128xf32>
    %c0_186 = arith.constant 0 : index
    %c1_187 = arith.constant 1 : index
    %c8 = arith.constant 8 : index
    %164 = vector.load %arg11[%c0_186, %c1_187, %c8] : memref<2x18x144xf32, #tpu.memory_space<vmem>>, vector<2x16x128xf32>
    tpu.vector_store %arg11[%c0_186, %c1_187, %c8], %163 {strides = array<i32>} : memref<2x18x144xf32, #tpu.memory_space<vmem>>, vector<2x16x128xf32>,
    %cst_188 = arith.constant 0.000000e+00 : f32
    %165 = vector.broadcast %cst_188 : f32 to vector<32x128xf32>
    %c0_189 = arith.constant 0 : index
    %c0_190 = arith.constant 0 : index
    %c0_191 = arith.constant 0 : index
    %166 = vector.load %arg11[%c0_189, %c0_190, %c0_191] : memref<2x18x144xf32, #tpu.memory_space<vmem>>, vector<2x16x144xf32>
    %167 = vector.shape_cast %166 : vector<2x16x144xf32> to vector<32x144xf32>
    %c0_192 = arith.constant 0 : index
    %c0_193 = arith.constant 0 : index
    %c0_194 = arith.constant 0 : index
    %168 = vector.load %arg2[%c0_192, %c0_193, %c0_194] : memref<3x144x128xf32, #tpu.memory_space<vmem>>, vector<1x144x128xf32>
    %169 = vector.shape_cast %168 : vector<1x144x128xf32> to vector<144x128xf32>
    %cst_195 = arith.constant dense<0.000000e+00> : vector<32x128xf32>
    %170 = tpu.matmul %167, %169, %cst_195 {dimension_numbers = #tpu.dot_dimension_numbers<[1], [0], [0], [1], [0, 0, 1, 1], [], []>} : vector<32x144xf32>, vector<144x128xf32>, vector<32x128xf32> -> vector<32x128xf32>
    %171 = arith.addf %165, %170 : vector<32x128xf32>
    %c0_196 = arith.constant 0 : index
    %c1_197 = arith.constant 1 : index
    %c0_198 = arith.constant 0 : index
    %172 = vector.load %arg11[%c0_196, %c1_197, %c0_198] : memref<2x18x144xf32, #tpu.memory_space<vmem>>, vector<2x16x144xf32>
    %173 = vector.shape_cast %172 : vector<2x16x144xf32> to vector<32x144xf32>
    %c1_199 = arith.constant 1 : index
    %c0_200 = arith.constant 0 : index
    %c0_201 = arith.constant 0 : index
    %174 = vector.load %arg2[%c1_199, %c0_200, %c0_201] : memref<3x144x128xf32, #tpu.memory_space<vmem>>, vector<1x144x128xf32>
    %175 = vector.shape_cast %174 : vector<1x144x128xf32> to vector<144x128xf32>
    %cst_202 = arith.constant dense<0.000000e+00> : vector<32x128xf32>
    %176 = tpu.matmul %173, %175, %cst_202 {dimension_numbers = #tpu.dot_dimension_numbers<[1], [0], [0], [1], [0, 0, 1, 1], [], []>} : vector<32x144xf32>, vector<144x128xf32>, vector<32x128xf32> -> vector<32x128xf32>
    %177 = arith.addf %171, %176 : vector<32x128xf32>
    %c0_203 = arith.constant 0 : index
    %c2_204 = arith.constant 2 : index
    %c0_205 = arith.constant 0 : index
    %178 = vector.load %arg11[%c0_203, %c2_204, %c0_205] : memref<2x18x144xf32, #tpu.memory_space<vmem>>, vector<2x16x144xf32>
    %179 = vector.shape_cast %178 : vector<2x16x144xf32> to vector<32x144xf32>
    %c2_206 = arith.constant 2 : index
    %c0_207 = arith.constant 0 : index
    %c0_208 = arith.constant 0 : index
    %180 = vector.load %arg2[%c2_206, %c0_207, %c0_208] : memref<3x144x128xf32, #tpu.memory_space<vmem>>, vector<1x144x128xf32>
    %181 = vector.shape_cast %180 : vector<1x144x128xf32> to vector<144x128xf32>
    %cst_209 = arith.constant dense<0.000000e+00> : vector<32x128xf32>
    %182 = tpu.matmul %179, %181, %cst_209 {dimension_numbers = #tpu.dot_dimension_numbers<[1], [0], [0], [1], [0, 0, 1, 1], [], []>} : vector<32x144xf32>, vector<144x128xf32>, vector<32x128xf32> -> vector<32x128xf32>
    %183 = arith.addf %177, %182 : vector<32x128xf32>
    %c0_210 = arith.constant 0 : index
    %c0_211 = arith.constant 0 : index
    %184 = vector.load %arg6[%c0_210, %c0_211] : memref<1x128xf32, #tpu.memory_space<vmem>>, vector<1x128xf32>
    %185 = vector.broadcast %184 : vector<1x128xf32> to vector<32x128xf32>
    %186 = arith.addf %183, %185 : vector<32x128xf32>
    %cst_212 = arith.constant 0.000000e+00 : f32
    %187 = vector.broadcast %cst_212 : f32 to vector<32x128xf32>
    %188 = arith.maximumf %186, %187 : vector<32x128xf32>
    %c0_213 = arith.constant 0 : index
    %c0_214 = arith.constant 0 : index
    %189 = vector.load %arg7[%c0_213, %c0_214] : memref<1x128xf32, #tpu.memory_space<vmem>>, vector<1x128xf32>
    %c0_215 = arith.constant 0 : index
    %c0_216 = arith.constant 0 : index
    %190 = vector.load %arg8[%c0_215, %c0_216] : memref<1x128xf32, #tpu.memory_space<vmem>>, vector<1x128xf32>
    %cst_217 = arith.constant dense<0.000000e+00> : vector<128xf32>
    %191 = vector.multi_reduction <add>, %188, %cst_217 [0] : vector<32x128xf32> to vector<128xf32>
    %192 = vector.shape_cast %191 : vector<128xf32> to vector<1x128xf32>
    %c8_i32_218 = arith.constant 8 : i32
    %193 = tpu.dynamic_rotate %192 by %c8_i32_218 dim 1 : vector<1x128xf32>, i32 -> vector<1x128xf32>
    %194 = arith.addf %192, %193 : vector<1x128xf32>
    %c16_i32_219 = arith.constant 16 : i32
    %195 = tpu.dynamic_rotate %194 by %c16_i32_219 dim 1 : vector<1x128xf32>, i32 -> vector<1x128xf32>
    %196 = arith.addf %194, %195 : vector<1x128xf32>
    %c32_i32_220 = arith.constant 32 : i32
    %197 = tpu.dynamic_rotate %196 by %c32_i32_220 dim 1 : vector<1x128xf32>, i32 -> vector<1x128xf32>
    %198 = arith.addf %196, %197 : vector<1x128xf32>
    %c64_i32_221 = arith.constant 64 : i32
    %199 = tpu.dynamic_rotate %198 by %c64_i32_221 dim 1 : vector<1x128xf32>, i32 -> vector<1x128xf32>
    %200 = arith.addf %198, %199 : vector<1x128xf32>
    %cst_222 = arith.constant 0.001953125 : f32
    %201 = vector.broadcast %cst_222 : f32 to vector<1x128xf32>
    %202 = arith.mulf %200, %201 : vector<1x128xf32>
    %203 = vector.broadcast %202 : vector<1x128xf32> to vector<32x128xf32>
    %204 = arith.subf %188, %203 : vector<32x128xf32>
    %205 = arith.mulf %204, %204 : vector<32x128xf32>
    %cst_223 = arith.constant dense<0.000000e+00> : vector<128xf32>
    %206 = vector.multi_reduction <add>, %205, %cst_223 [0] : vector<32x128xf32> to vector<128xf32>
    %207 = vector.shape_cast %206 : vector<128xf32> to vector<1x128xf32>
    %c8_i32_224 = arith.constant 8 : i32
    %208 = tpu.dynamic_rotate %207 by %c8_i32_224 dim 1 : vector<1x128xf32>, i32 -> vector<1x128xf32>
    %209 = arith.addf %207, %208 : vector<1x128xf32>
    %c16_i32_225 = arith.constant 16 : i32
    %210 = tpu.dynamic_rotate %209 by %c16_i32_225 dim 1 : vector<1x128xf32>, i32 -> vector<1x128xf32>
    %211 = arith.addf %209, %210 : vector<1x128xf32>
    %c32_i32_226 = arith.constant 32 : i32
    %212 = tpu.dynamic_rotate %211 by %c32_i32_226 dim 1 : vector<1x128xf32>, i32 -> vector<1x128xf32>
    %213 = arith.addf %211, %212 : vector<1x128xf32>
    %c64_i32_227 = arith.constant 64 : i32
    %214 = tpu.dynamic_rotate %213 by %c64_i32_227 dim 1 : vector<1x128xf32>, i32 -> vector<1x128xf32>
    %215 = arith.addf %213, %214 : vector<1x128xf32>
    %cst_228 = arith.constant 0.001953125 : f32
    %216 = vector.broadcast %cst_228 : f32 to vector<1x128xf32>
    %217 = arith.mulf %215, %216 : vector<1x128xf32>
    %cst_229 = arith.constant 9.99999974E-6 : f32
    %218 = vector.broadcast %cst_229 : f32 to vector<1x128xf32>
    %219 = arith.addf %217, %218 : vector<1x128xf32>
    %220 = math.rsqrt %219 : vector<1x128xf32>
    %221 = arith.mulf %220, %189 : vector<1x128xf32>
    %222 = vector.broadcast %221 : vector<1x128xf32> to vector<32x128xf32>
    %223 = arith.mulf %204, %222 : vector<32x128xf32>
    %224 = vector.broadcast %190 : vector<1x128xf32> to vector<32x128xf32>
    %225 = arith.addf %223, %224 : vector<32x128xf32>
    %226 = tpu.iota {dimensions = array<i32: 0>} : vector<128x16xi32>
    %227 = tpu.iota {dimensions = array<i32: 1>} : vector<128x16xi32>
    %c8_i32_230 = arith.constant 8 : i32
    %228 = vector.broadcast %c8_i32_230 : i32 to vector<128x16xi32>
    %229 = arith.muli %227, %228 : vector<128x16xi32>
    %c0_i32 = arith.constant 0 : i32
    %230 = vector.broadcast %c0_i32 : i32 to vector<128x16xi32>
    %231 = arith.addi %229, %230 : vector<128x16xi32>
    %232 = arith.cmpi eq, %226, %231 : vector<128x16xi32>
    %233 = arith.extui %232 : vector<128x16xi1> to vector<128x16xi32>
    %234 = arith.sitofp %233 : vector<128x16xi32> to vector<128x16xf32>
    %cst_231 = arith.constant dense<0.000000e+00> : vector<32x16xf32>
    %235 = tpu.matmul %225, %234, %cst_231 {dimension_numbers = #tpu.dot_dimension_numbers<[1], [0], [0], [1], [0, 0, 1, 1], [], []>} : vector<32x128xf32>, vector<128x16xf32>, vector<32x16xf32> -> vector<32x16xf32>
    %236 = vector.shape_cast %235 : vector<32x16xf32> to vector<2x16x16xf32>
    %c0_232 = arith.constant 0 : index
    %c0_233 = arith.constant 0 : index
    %c0_234 = arith.constant 0 : index
    %c0_235 = arith.constant 0 : index
    %237 = vector.load %arg9[%c0_232, %c0_233, %c0_234, %c0_235] : memref<2x8x16x16xf32, #tpu.memory_space<vmem>>, vector<2x1x16x16xf32>
    %238 = vector.shape_cast %237 : vector<2x1x16x16xf32> to vector<2x16x16xf32>
    %239 = vector.shape_cast %236 : vector<2x16x16xf32> to vector<2x1x16x16xf32>
    tpu.vector_store %arg9[%c0_232, %c0_233, %c0_234, %c0_235], %239 {strides = array<i32>} : memref<2x8x16x16xf32, #tpu.memory_space<vmem>>, vector<2x1x16x16xf32>,
    %c8_i32_236 = arith.constant 8 : i32
    %240 = vector.broadcast %c8_i32_236 : i32 to vector<128x16xi32>
    %241 = arith.muli %227, %240 : vector<128x16xi32>
    %c1_i32 = arith.constant 1 : i32
    %242 = vector.broadcast %c1_i32 : i32 to vector<128x16xi32>
    %243 = arith.addi %241, %242 : vector<128x16xi32>
    %244 = arith.cmpi eq, %226, %243 : vector<128x16xi32>
    %245 = arith.extui %244 : vector<128x16xi1> to vector<128x16xi32>
    %246 = arith.sitofp %245 : vector<128x16xi32> to vector<128x16xf32>
    %cst_237 = arith.constant dense<0.000000e+00> : vector<32x16xf32>
    %247 = tpu.matmul %225, %246, %cst_237 {dimension_numbers = #tpu.dot_dimension_numbers<[1], [0], [0], [1], [0, 0, 1, 1], [], []>} : vector<32x128xf32>, vector<128x16xf32>, vector<32x16xf32> -> vector<32x16xf32>
    %248 = vector.shape_cast %247 : vector<32x16xf32> to vector<2x16x16xf32>
    %c0_238 = arith.constant 0 : index
    %c1_239 = arith.constant 1 : index
    %c0_240 = arith.constant 0 : index
    %c0_241 = arith.constant 0 : index
    %249 = vector.load %arg9[%c0_238, %c1_239, %c0_240, %c0_241] : memref<2x8x16x16xf32, #tpu.memory_space<vmem>>, vector<2x1x16x16xf32>
    %250 = vector.shape_cast %249 : vector<2x1x16x16xf32> to vector<2x16x16xf32>
    %251 = vector.shape_cast %248 : vector<2x16x16xf32> to vector<2x1x16x16xf32>
    tpu.vector_store %arg9[%c0_238, %c1_239, %c0_240, %c0_241], %251 {strides = array<i32>} : memref<2x8x16x16xf32, #tpu.memory_space<vmem>>, vector<2x1x16x16xf32>,
    %c8_i32_242 = arith.constant 8 : i32
    %252 = vector.broadcast %c8_i32_242 : i32 to vector<128x16xi32>
    %253 = arith.muli %227, %252 : vector<128x16xi32>
    %c2_i32 = arith.constant 2 : i32
    %254 = vector.broadcast %c2_i32 : i32 to vector<128x16xi32>
    %255 = arith.addi %253, %254 : vector<128x16xi32>
    %256 = arith.cmpi eq, %226, %255 : vector<128x16xi32>
    %257 = arith.extui %256 : vector<128x16xi1> to vector<128x16xi32>
    %258 = arith.sitofp %257 : vector<128x16xi32> to vector<128x16xf32>
    %cst_243 = arith.constant dense<0.000000e+00> : vector<32x16xf32>
    %259 = tpu.matmul %225, %258, %cst_243 {dimension_numbers = #tpu.dot_dimension_numbers<[1], [0], [0], [1], [0, 0, 1, 1], [], []>} : vector<32x128xf32>, vector<128x16xf32>, vector<32x16xf32> -> vector<32x16xf32>
    %260 = vector.shape_cast %259 : vector<32x16xf32> to vector<2x16x16xf32>
    %c0_244 = arith.constant 0 : index
    %c2_245 = arith.constant 2 : index
    %c0_246 = arith.constant 0 : index
    %c0_247 = arith.constant 0 : index
    %261 = vector.load %arg9[%c0_244, %c2_245, %c0_246, %c0_247] : memref<2x8x16x16xf32, #tpu.memory_space<vmem>>, vector<2x1x16x16xf32>
    %262 = vector.shape_cast %261 : vector<2x1x16x16xf32> to vector<2x16x16xf32>
    %263 = vector.shape_cast %260 : vector<2x16x16xf32> to vector<2x1x16x16xf32>
    tpu.vector_store %arg9[%c0_244, %c2_245, %c0_246, %c0_247], %263 {strides = array<i32>} : memref<2x8x16x16xf32, #tpu.memory_space<vmem>>, vector<2x1x16x16xf32>,
    %c8_i32_248 = arith.constant 8 : i32
    %264 = vector.broadcast %c8_i32_248 : i32 to vector<128x16xi32>
    %265 = arith.muli %227, %264 : vector<128x16xi32>
    %c3_i32 = arith.constant 3 : i32
    %266 = vector.broadcast %c3_i32 : i32 to vector<128x16xi32>
    %267 = arith.addi %265, %266 : vector<128x16xi32>
    %268 = arith.cmpi eq, %226, %267 : vector<128x16xi32>
    %269 = arith.extui %268 : vector<128x16xi1> to vector<128x16xi32>
    %270 = arith.sitofp %269 : vector<128x16xi32> to vector<128x16xf32>
    %cst_249 = arith.constant dense<0.000000e+00> : vector<32x16xf32>
    %271 = tpu.matmul %225, %270, %cst_249 {dimension_numbers = #tpu.dot_dimension_numbers<[1], [0], [0], [1], [0, 0, 1, 1], [], []>} : vector<32x128xf32>, vector<128x16xf32>, vector<32x16xf32> -> vector<32x16xf32>
    %272 = vector.shape_cast %271 : vector<32x16xf32> to vector<2x16x16xf32>
    %c0_250 = arith.constant 0 : index
    %c3_251 = arith.constant 3 : index
    %c0_252 = arith.constant 0 : index
    %c0_253 = arith.constant 0 : index
    %273 = vector.load %arg9[%c0_250, %c3_251, %c0_252, %c0_253] : memref<2x8x16x16xf32, #tpu.memory_space<vmem>>, vector<2x1x16x16xf32>
    %274 = vector.shape_cast %273 : vector<2x1x16x16xf32> to vector<2x16x16xf32>
    %275 = vector.shape_cast %272 : vector<2x16x16xf32> to vector<2x1x16x16xf32>
    tpu.vector_store %arg9[%c0_250, %c3_251, %c0_252, %c0_253], %275 {strides = array<i32>} : memref<2x8x16x16xf32, #tpu.memory_space<vmem>>, vector<2x1x16x16xf32>,
    %c8_i32_254 = arith.constant 8 : i32
    %276 = vector.broadcast %c8_i32_254 : i32 to vector<128x16xi32>
    %277 = arith.muli %227, %276 : vector<128x16xi32>
    %c4_i32 = arith.constant 4 : i32
    %278 = vector.broadcast %c4_i32 : i32 to vector<128x16xi32>
    %279 = arith.addi %277, %278 : vector<128x16xi32>
    %280 = arith.cmpi eq, %226, %279 : vector<128x16xi32>
    %281 = arith.extui %280 : vector<128x16xi1> to vector<128x16xi32>
    %282 = arith.sitofp %281 : vector<128x16xi32> to vector<128x16xf32>
    %cst_255 = arith.constant dense<0.000000e+00> : vector<32x16xf32>
    %283 = tpu.matmul %225, %282, %cst_255 {dimension_numbers = #tpu.dot_dimension_numbers<[1], [0], [0], [1], [0, 0, 1, 1], [], []>} : vector<32x128xf32>, vector<128x16xf32>, vector<32x16xf32> -> vector<32x16xf32>
    %284 = vector.shape_cast %283 : vector<32x16xf32> to vector<2x16x16xf32>
    %c0_256 = arith.constant 0 : index
    %c4 = arith.constant 4 : index
    %c0_257 = arith.constant 0 : index
    %c0_258 = arith.constant 0 : index
    %285 = vector.load %arg9[%c0_256, %c4, %c0_257, %c0_258] : memref<2x8x16x16xf32, #tpu.memory_space<vmem>>, vector<2x1x16x16xf32>
    %286 = vector.shape_cast %285 : vector<2x1x16x16xf32> to vector<2x16x16xf32>
    %287 = vector.shape_cast %284 : vector<2x16x16xf32> to vector<2x1x16x16xf32>
    tpu.vector_store %arg9[%c0_256, %c4, %c0_257, %c0_258], %287 {strides = array<i32>} : memref<2x8x16x16xf32, #tpu.memory_space<vmem>>, vector<2x1x16x16xf32>,
    %c8_i32_259 = arith.constant 8 : i32
    %288 = vector.broadcast %c8_i32_259 : i32 to vector<128x16xi32>
    %289 = arith.muli %227, %288 : vector<128x16xi32>
    %c5_i32 = arith.constant 5 : i32
    %290 = vector.broadcast %c5_i32 : i32 to vector<128x16xi32>
    %291 = arith.addi %289, %290 : vector<128x16xi32>
    %292 = arith.cmpi eq, %226, %291 : vector<128x16xi32>
    %293 = arith.extui %292 : vector<128x16xi1> to vector<128x16xi32>
    %294 = arith.sitofp %293 : vector<128x16xi32> to vector<128x16xf32>
    %cst_260 = arith.constant dense<0.000000e+00> : vector<32x16xf32>
    %295 = tpu.matmul %225, %294, %cst_260 {dimension_numbers = #tpu.dot_dimension_numbers<[1], [0], [0], [1], [0, 0, 1, 1], [], []>} : vector<32x128xf32>, vector<128x16xf32>, vector<32x16xf32> -> vector<32x16xf32>
    %296 = vector.shape_cast %295 : vector<32x16xf32> to vector<2x16x16xf32>
    %c0_261 = arith.constant 0 : index
    %c5 = arith.constant 5 : index
    %c0_262 = arith.constant 0 : index
    %c0_263 = arith.constant 0 : index
    %297 = vector.load %arg9[%c0_261, %c5, %c0_262, %c0_263] : memref<2x8x16x16xf32, #tpu.memory_space<vmem>>, vector<2x1x16x16xf32>
    %298 = vector.shape_cast %297 : vector<2x1x16x16xf32> to vector<2x16x16xf32>
    %299 = vector.shape_cast %296 : vector<2x16x16xf32> to vector<2x1x16x16xf32>
    tpu.vector_store %arg9[%c0_261, %c5, %c0_262, %c0_263], %299 {strides = array<i32>} : memref<2x8x16x16xf32, #tpu.memory_space<vmem>>, vector<2x1x16x16xf32>,
    %c8_i32_264 = arith.constant 8 : i32
    %300 = vector.broadcast %c8_i32_264 : i32 to vector<128x16xi32>
    %301 = arith.muli %227, %300 : vector<128x16xi32>
    %c6_i32 = arith.constant 6 : i32
    %302 = vector.broadcast %c6_i32 : i32 to vector<128x16xi32>
    %303 = arith.addi %301, %302 : vector<128x16xi32>
    %304 = arith.cmpi eq, %226, %303 : vector<128x16xi32>
    %305 = arith.extui %304 : vector<128x16xi1> to vector<128x16xi32>
    %306 = arith.sitofp %305 : vector<128x16xi32> to vector<128x16xf32>
    %cst_265 = arith.constant dense<0.000000e+00> : vector<32x16xf32>
    %307 = tpu.matmul %225, %306, %cst_265 {dimension_numbers = #tpu.dot_dimension_numbers<[1], [0], [0], [1], [0, 0, 1, 1], [], []>} : vector<32x128xf32>, vector<128x16xf32>, vector<32x16xf32> -> vector<32x16xf32>
    %308 = vector.shape_cast %307 : vector<32x16xf32> to vector<2x16x16xf32>
    %c0_266 = arith.constant 0 : index
    %c6 = arith.constant 6 : index
    %c0_267 = arith.constant 0 : index
    %c0_268 = arith.constant 0 : index
    %309 = vector.load %arg9[%c0_266, %c6, %c0_267, %c0_268] : memref<2x8x16x16xf32, #tpu.memory_space<vmem>>, vector<2x1x16x16xf32>
    %310 = vector.shape_cast %309 : vector<2x1x16x16xf32> to vector<2x16x16xf32>
    %311 = vector.shape_cast %308 : vector<2x16x16xf32> to vector<2x1x16x16xf32>
    tpu.vector_store %arg9[%c0_266, %c6, %c0_267, %c0_268], %311 {strides = array<i32>} : memref<2x8x16x16xf32, #tpu.memory_space<vmem>>, vector<2x1x16x16xf32>,
    %c8_i32_269 = arith.constant 8 : i32
    %312 = vector.broadcast %c8_i32_269 : i32 to vector<128x16xi32>
    %313 = arith.muli %227, %312 : vector<128x16xi32>
    %c7_i32 = arith.constant 7 : i32
    %314 = vector.broadcast %c7_i32 : i32 to vector<128x16xi32>
    %315 = arith.addi %313, %314 : vector<128x16xi32>
    %316 = arith.cmpi eq, %226, %315 : vector<128x16xi32>
    %317 = arith.extui %316 : vector<128x16xi1> to vector<128x16xi32>
    %318 = arith.sitofp %317 : vector<128x16xi32> to vector<128x16xf32>
    %cst_270 = arith.constant dense<0.000000e+00> : vector<32x16xf32>
    %319 = tpu.matmul %225, %318, %cst_270 {dimension_numbers = #tpu.dot_dimension_numbers<[1], [0], [0], [1], [0, 0, 1, 1], [], []>} : vector<32x128xf32>, vector<128x16xf32>, vector<32x16xf32> -> vector<32x16xf32>
    %320 = vector.shape_cast %319 : vector<32x16xf32> to vector<2x16x16xf32>
    %c0_271 = arith.constant 0 : index
    %c7 = arith.constant 7 : index
    %c0_272 = arith.constant 0 : index
    %c0_273 = arith.constant 0 : index
    %321 = vector.load %arg9[%c0_271, %c7, %c0_272, %c0_273] : memref<2x8x16x16xf32, #tpu.memory_space<vmem>>, vector<2x1x16x16xf32>
    %322 = vector.shape_cast %321 : vector<2x1x16x16xf32> to vector<2x16x16xf32>
    %323 = vector.shape_cast %320 : vector<2x16x16xf32> to vector<2x1x16x16xf32>
    tpu.vector_store %arg9[%c0_271, %c7, %c0_272, %c0_273], %323 {strides = array<i32>} : memref<2x8x16x16xf32, #tpu.memory_space<vmem>>, vector<2x1x16x16xf32>,
    return
  }
}

</mosaic_0001>

<bundles_post_ra>
// kernel: tile.33
= control target key start
LH: loop header
LB: loop body
LE: loop exit
PB: predicated region body
PF: predicated region fallthrough
CT: control target
= control target key end

     0   :  { %s28_s0 = inlined_call_operand.vmem [shape: f32[8], index: 0, kind: input, shape index: {}]   ;;  %s29_s1 = inlined_call_operand.vmem [shape: f32[16,8], index: 1, kind: output, shape index: {}]  }
   0x1   :  { %v4_v0 = vld [vmem:[%s28_s0] ss:$0 sm:$0xff] }
   0x2   :  { %5 = vst [vmem:[%s29_s1] sm:$0xff] %v4_v0  ;;  %8 = vst [vmem:[%s29_s1 + $0x8] sm:$0xff] %v4_v0 }

// kernel: tile.34
= control target key start
LH: loop header
LB: loop body
LE: loop exit
PB: predicated region body
PF: predicated region fallthrough
CT: control target
= control target key end

     0   :  { %s131_s10 = smov 120   ;;  %s132_s11 = smov 104   ;;  %vm3_vm0 = vcmask 64512   ;;  %vm9_vm1 = vcmask 1048512   ;;  %vm15_vm2 = vcmask 982912   ;;  %vm21_vm3 = vcmask 917312   ;;  %s207_s0 = inlined_call_operand.vmem [shape: f32[16,8], index: 0, kind: input, shape index: {}]   ;;  %s208_s1 = inlined_call_operand.vmem [shape: f32[1,128], index: 1, kind: output, shape index: {}]  }
   0x1   :  { %v101_v0 = vld [vmem:[%s207_s0 + $0xf] sm:$0x1]   ;;  %v103_v1 = vld [vmem:[%s207_s0 + $0xd] sm:$0x1]   ;;  %v102_v2 = vld [vmem:[%s207_s0 + $0xe] sm:$0x1]  }
   0x2   :  { %7 = vrot.lane.b32.xlu0 %v101_v0, %s131_s10  ;;  %19 = vrot.lane.b32.xlu1 %v103_v1, %s132_s11  ;;  %v104_v3 = vld [vmem:[%s207_s0 + $0xc] sm:$0x1]   ;;  %s133_s16 = smov 112   ;;  %s134_s17 = smov 96   ;;  %v105_v4 = vld [vmem:[%s207_s0 + $0xb] sm:$0x1]  }
   0x3   :  { %v106_v5 = vld [vmem:[%s207_s0 + $0xa] sm:$0x1]   ;;  %v2_v6 = vld [vmem:[%s207_s0] sm:$0x1]   ;;  %s135_s24 = smov 88   ;;  %s136_s25 = smov 80  }
   0x4   :  { %4 = vst.msk [vmem:[#allocation0] sm:$0x1] %vm3_vm0, %v2_v6   ;;  %v107_v7 = vld [vmem:[%s207_s0 + $0x9] sm:$0x1]   ;;  %v108_v8 = vld [vmem:[%s207_s0 + $0x8] sm:$0x1]  }
   0x5   :  { %s137_s30 = smov 72   ;;  %s138_s2 = smov 64   ;;  %v109_v9 = vld [vmem:[%s207_s0 + $0x7] sm:$0x1]   ;;  %v110_v10 = vld [vmem:[%s207_s0 + $0x6] sm:$0x1]  }
   0x6   :  { %13 = vrot.lane.b32.xlu0 %v102_v2, %s133_s16  ;;  %25 = vrot.lane.b32.xlu1 %v104_v3, %s134_s17  ;;  %s139_s7 = smov 56   ;;  %s140_s8 = smov 48   ;;  %v111_v11 = vld [vmem:[%s207_s0 + $0x5] sm:$0x1]   ;;  %v112_v12 = vld [vmem:[%s207_s0 + $0x4] sm:$0x1]  }
   0x7   :  { %s141_s13 = smov 40   ;;  %s142_s14 = smov 32   ;;  %v113_v13 = vld [vmem:[%s207_s0 + $0x3] sm:$0x1]   ;;  %v114_v14 = vld [vmem:[%s207_s0 + $0x2] sm:$0x1]  }
   0x8   :  { %s143_s19 = smov 24   ;;  %s144_s20 = smov 16   ;;  %v115_v15 = vld [vmem:[%s207_s0 + $0x1] sm:$0x1]   ;;  %vm27_vm4 = vcmask 851712   ;;  %vm33_vm5 = vcmask 786112  }
   0x9   :  { %s145_s0 = smov 8   ;;  %vm39_vm6 = vcmask 720512   ;;  %vm45_vm7 = vcmask 654912   ;;  %vm51_vm8 = vcmask 589312   ;;  %vm57_vm9 = vcmask 523712  }
   0xa   :  { %31 = vrot.lane.b32.xlu0 %v105_v4, %s135_s24  ;;  %37 = vrot.lane.b32.xlu1 %v106_v5, %s136_s25  ;;  %vm63_vm10 = vcmask 458112   ;;  %vm69_vm11 = vcmask 392512   ;;  %vm75_vm12 = vcmask 326912   ;;  %vm81_vm13 = vcmask 261312  }
   0xb   :  { %vm87_vm14 = vcmask 195712   ;;  %vm93_vm15 = vcmask 130112  }
   0xe   :  { %43 = vrot.lane.b32.xlu0 %v107_v7, %s137_s30  ;;  %49 = vrot.lane.b32.xlu1 %v108_v8, %s138_s2 }
  0x12   :  { %55 = vrot.lane.b32.xlu0 %v109_v9, %s139_s7  ;;  %61 = vrot.lane.b32.xlu1 %v110_v10, %s140_s8 }
  0x16   :  { %67 = vrot.lane.b32.xlu0 %v111_v11, %s141_s13  ;;  %73 = vrot.lane.b32.xlu1 %v112_v12, %s142_s14 }
  0x1a   :  { %79 = vrot.lane.b32.xlu0 %v113_v13, %s143_s19  ;;  %85 = vrot.lane.b32.xlu1 %v114_v14, %s144_s20 }
  0x1e   :  { %91 = vrot.lane.b32.xlu0 %v115_v15, %s145_s0 }
  0x74   :  { %v8_v16 = vpop.permute.xlu0 %7   ;;  %v20_v17 = vpop.permute.xlu1 %19  }
  0x75   :  { %10 = vst.msk [vmem:[#allocation0] sm:$0x1] %vm9_vm1, %v8_v16  }
  0x78   :  { %v14_v18 = vpop.permute.xlu0 %13   ;;  %v26_v19 = vpop.permute.xlu1 %25  }
  0x79   :  { %16 = vst.msk [vmem:[#allocation0] sm:$0x1] %vm15_vm2, %v14_v18  }
  0x7a   :  { %22 = vst.msk [vmem:[#allocation0] sm:$0x1] %vm21_vm3, %v20_v17  }
  0x7b   :  { %28 = vst.msk [vmem:[#allocation0] sm:$0x1] %vm27_vm4, %v26_v19  }
  0x7c   :  { %v32_v20 = vpop.permute.xlu0 %31   ;;  %v38_v21 = vpop.permute.xlu1 %37  }
  0x7d   :  { %34 = vst.msk [vmem:[#allocation0] sm:$0x1] %vm33_vm5, %v32_v20  }
  0x7e   :  { %40 = vst.msk [vmem:[#allocation0] sm:$0x1] %vm39_vm6, %v38_v21  }
  0x80   :  { %v44_v22 = vpop.permute.xlu0 %43   ;;  %v50_v23 = vpop.permute.xlu1 %49  }
  0x81   :  { %46 = vst.msk [vmem:[#allocation0] sm:$0x1] %vm45_vm7, %v44_v22  }
  0x82   :  { %52 = vst.msk [vmem:[#allocation0] sm:$0x1] %vm51_vm8, %v50_v23  }
  0x84   :  { %v56_v24 = vpop.permute.xlu0 %55   ;;  %v62_v25 = vpop.permute.xlu1 %61  }
  0x85   :  { %58 = vst.msk [vmem:[#allocation0] sm:$0x1] %vm57_vm9, %v56_v24  }
  0x86   :  { %64 = vst.msk [vmem:[#allocation0] sm:$0x1] %vm63_vm10, %v62_v25  }
  0x88   :  { %v68_v26 = vpop.permute.xlu0 %67   ;;  %v74_v27 = vpop.permute.xlu1 %73  }
  0x89   :  { %70 = vst.msk [vmem:[#allocation0] sm:$0x1] %vm69_vm11, %v68_v26  }
  0x8a   :  { %76 = vst.msk [vmem:[#allocation0] sm:$0x1] %vm75_vm12, %v74_v27  }
  0x8c   :  { %v80_v28 = vpop.permute.xlu0 %79   ;;  %v86_v29 = vpop.permute.xlu1 %85  }
  0x8d   :  { %82 = vst.msk [vmem:[#allocation0] sm:$0x1] %vm81_vm13, %v80_v28  }
  0x8e   :  { %88 = vst.msk [vmem:[#allocation0] sm:$0x1] %vm87_vm14, %v86_v29  }
  0x90   :  { %v92_v30 = vpop.permute.xlu0 %91  }
  0x91   :  { %94 = vst.msk [vmem:[#allocation0] sm:$0x1] %vm93_vm15, %v92_v30  }
  0x98   :  { %v98_v31 = vld [vmem:[#allocation0] sm:$0x1] }
  0x99   :  { %100 = vst [vmem:[%s208_s1] sm:$0x1] %v98_v31 }

// kernel: unet_conv_block.1
= control target key start
LH: loop header
LB: loop body
LE: loop exit
PB: predicated region body
PF: predicated region fallthrough
CT: control target
= control target key end

     0   :  { %s4943_s13 = smov 1   ;;  %vm50_vm0 = vcmask 7168   ;;  %vm67_vm1 = vcmask 146568   ;;  %vm33_vm2 = vcmask 139264   ;;  %v4944_v4 = vmov 0.0   ;;  %s6577_s0 = inlined_call_operand.vmem [shape: f32[2,4,16,16], index: 0, kind: input, shape index: {}]   ;;  %s6578_s1 = inlined_call_operand.vmem [shape: f32[4,3,18,128], index: 1, kind: input, shape index: {}]   ;;  %s6579_s2 = inlined_call_operand.vmem [shape: f32[3,144,128], index: 2, kind: input, shape index: {}]   ;;  %s6580_s3 = inlined_call_operand.vmem [shape: f32[1,128], index: 3, kind: input, shape index: {}]   ;;  %s6581_s4 = inlined_call_operand.vmem [shape: f32[1,128], index: 4, kind: input, shape index: {}]   ;;  %s6582_s5 = inlined_call_operand.vmem [shape: f32[1,128], index: 5, kind: input, shape index: {}]   ;;  %s6583_s6 = inlined_call_operand.vmem [shape: f32[1,128], index: 6, kind: input, shape index: {}]   ;;  %s6584_s7 = inlined_call_operand.vmem [shape: f32[1,128], index: 7, kind: input, shape index: {}]   ;;  %s6585_s8 = inlined_call_operand.vmem [shape: f32[1,128], index: 8, kind: input, shape index: {}]   ;;  %s6586_s9 = inlined_call_operand.hbm [shape: f32[2,8,16,16], index: 9, kind: output, shape index: {}]  }
   0x1   :  { %v3373_v0 = vld [vmem:[%s6577_s0 + $0x50] sm:$0xff]  ;;  %v3374_v2 = vld [vmem:[%s6577_s0 + $0x58] sm:$0xff]  ;;  %57 = vst.msk [vmem:[#allocation2 + $0x49] sm:$0xff] %vm50_vm0, %v4944_v4  ;;  %51 = vst.msk [vmem:[#allocation2 + $0x1] sm:$0xff] %vm50_vm0, %v4944_v4 }
   0x2   :  { %v3371_v1 = vld [vmem:[%s6577_s0 + $0x10] sm:$0xff]  ;;  %122 = vrot.lane.b32.xlu1 %v3373_v0, %s4943_s13  ;;  %v3372_v3 = vld [vmem:[%s6577_s0 + $0x18] sm:$0xff]  ;;  %52 = vst.msk [vmem:[#allocation2 + $0x9] sm:$0xff] %vm50_vm0, %v4944_v4  ;;  %53 = vst.msk [vmem:[#allocation2 + $0x19] sm:$0xff] %vm50_vm0, %v4944_v4 }
   0x3   :  { %118 = vrot.lane.b32.xlu0 %v3371_v1, %s4943_s13  ;;  %54 = vst.msk [vmem:[#allocation2 + $0x21] sm:$0xff] %vm50_vm0, %v4944_v4  ;;  %55 = vst.msk [vmem:[#allocation2 + $0x31] sm:$0xff] %vm50_vm0, %v4944_v4  ;;  %v85_v5 = vld [vmem:[%s6577_s0 + $0x8] sm:$0xff]  ;;  %v84_v6 = vld [vmem:[%s6577_s0] sm:$0xff] }
   0x4   :  { %56 = vst.msk [vmem:[#allocation2 + $0x39] sm:$0xff] %vm50_vm0, %v4944_v4  ;;  %58 = vst.msk [vmem:[#allocation2 + $0x51] sm:$0xff] %vm50_vm0, %v4944_v4  ;;  %v3383_v7 = vld [vmem:[%s6578_s1 + $0x48] sm:$0xff]  ;;  %v3384_v8 = vld [vmem:[%s6578_s1 + $0x50] sm:$0xff] }
   0x5   :  { %59 = vst.msk [vmem:[#allocation2 + $0x61] sm:$0xff] %vm50_vm0, %v4944_v4  ;;  %60 = vst.msk [vmem:[#allocation2 + $0x69] sm:$0xff] %vm50_vm0, %v4944_v4  ;;  %v4476_v9 = vpack.c.bf16 %v3384_v8, %v3383_v7  ;;  %v3385_v10 = vld [vmem:[%s6578_s1 + $0x58] sm:$0x3] }
   0x6   :  { %61 = vst.msk [vmem:[#allocation2 + $0x79] sm:$0xff] %vm50_vm0, %v4944_v4  ;;  %62 = vst.msk [vmem:[#allocation2 + $0x81] sm:$0xff] %vm50_vm0, %v4944_v4  ;;  %124 = vrot.lane.b32.xlu1 %v3374_v2, %s4943_s13 }
   0x7   :  { %63 = vst.msk [vmem:[#allocation2 + $0x91] sm:$0xff] %vm50_vm0, %v4944_v4  ;;  %64 = vst.msk [vmem:[#allocation2 + $0x99] sm:$0xff] %vm50_vm0, %v4944_v4  ;;  %120 = vrot.lane.b32.xlu0 %v3372_v3, %s4943_s13 }
   0x8   :  { %65 = vst.msk [vmem:[#allocation2 + $0xa9] sm:$0xff] %vm50_vm0, %v4944_v4  ;;  %66 = vst.msk [vmem:[#allocation2 + $0xb1] sm:$0xff] %vm50_vm0, %v4944_v4 }
   0x9   :  { %36 = vst.msk [vmem:[#allocation2 + $0x30] sm:$0x1] %vm33_vm2, %v4944_v4  ;;  %34 = vst.msk [vmem:[#allocation2] sm:$0x1] %vm33_vm2, %v4944_v4 }
   0xa   :  { %35 = vst.msk [vmem:[#allocation2 + $0x18] sm:$0x1] %vm33_vm2, %v4944_v4  ;;  %37 = vst.msk [vmem:[#allocation2 + $0x48] sm:$0x1] %vm33_vm2, %v4944_v4 }
   0xb   :  { %38 = vst.msk [vmem:[#allocation2 + $0x60] sm:$0x1] %vm33_vm2, %v4944_v4  ;;  %39 = vst.msk [vmem:[#allocation2 + $0x78] sm:$0x1] %vm33_vm2, %v4944_v4 }
   0xc   :  { %40 = vst.msk [vmem:[#allocation2 + $0x90] sm:$0x1] %vm33_vm2, %v4944_v4  ;;  %41 = vst.msk [vmem:[#allocation2 + $0xa8] sm:$0x1] %vm33_vm2, %v4944_v4 }
   0xd   :  { %42 = vst.msk [vmem:[#allocation2 + $0x11] sm:$0x1] %vm33_vm2, %v4944_v4  ;;  %43 = vst.msk [vmem:[#allocation2 + $0x29] sm:$0x1] %vm33_vm2, %v4944_v4 }
   0xe   :  { %44 = vst.msk [vmem:[#allocation2 + $0x41] sm:$0x1] %vm33_vm2, %v4944_v4  ;;  %45 = vst.msk [vmem:[#allocation2 + $0x59] sm:$0x1] %vm33_vm2, %v4944_v4 }
   0xf   :  { %46 = vst.msk [vmem:[#allocation2 + $0x71] sm:$0x1] %vm33_vm2, %v4944_v4  ;;  %47 = vst.msk [vmem:[#allocation2 + $0x89] sm:$0x1] %vm33_vm2, %v4944_v4 }
  0x10   :  { %48 = vst.msk [vmem:[#allocation2 + $0xa1] sm:$0x1] %vm33_vm2, %v4944_v4  ;;  %49 = vst.msk [vmem:[#allocation2 + $0xb9] sm:$0x1] %vm33_vm2, %v4944_v4 }
  0x11   :  { %74 = vst.msk [vmem:[#allocation2 + $0x49] sm:$0xff] %vm67_vm1, %v4944_v4  ;;  %72 = vst.msk [vmem:[#allocation2 + $0x31] sm:$0xff] %vm67_vm1, %v4944_v4 }
  0x12   :  { %68 = vst.msk [vmem:[#allocation2 + $0x1] sm:$0xff] %vm67_vm1, %v4944_v4  ;;  %69 = vst.msk [vmem:[#allocation2 + $0x9] sm:$0xff] %vm67_vm1, %v4944_v4 }
  0x13   :  { %70 = vst.msk [vmem:[#allocation2 + $0x19] sm:$0xff] %vm67_vm1, %v4944_v4  ;;  %71 = vst.msk [vmem:[#allocation2 + $0x21] sm:$0xff] %vm67_vm1, %v4944_v4 }
  0x14   :  { %73 = vst.msk [vmem:[#allocation2 + $0x39] sm:$0xff] %vm67_vm1, %v4944_v4  ;;  %75 = vst.msk [vmem:[#allocation2 + $0x51] sm:$0xff] %vm67_vm1, %v4944_v4 }
  0x15   :  { %76 = vst.msk [vmem:[#allocation2 + $0x61] sm:$0xff] %vm67_vm1, %v4944_v4  ;;  %77 = vst.msk [vmem:[#allocation2 + $0x69] sm:$0xff] %vm67_vm1, %v4944_v4 }
  0x16   :  { %78 = vst.msk [vmem:[#allocation2 + $0x79] sm:$0xff] %vm67_vm1, %v4944_v4  ;;  %79 = vst.msk [vmem:[#allocation2 + $0x81] sm:$0xff] %vm67_vm1, %v4944_v4 }
  0x17   :  { %80 = vst.msk [vmem:[#allocation2 + $0x91] sm:$0xff] %vm67_vm1, %v4944_v4  ;;  %81 = vst.msk [vmem:[#allocation2 + $0x99] sm:$0xff] %vm67_vm1, %v4944_v4 }
  0x18   :  { %82 = vst.msk [vmem:[#allocation2 + $0xa9] sm:$0xff] %vm67_vm1, %v4944_v4  ;;  %83 = vst.msk [vmem:[#allocation2 + $0xb1] sm:$0xff] %vm67_vm1, %v4944_v4 }
  0x19   :  { %14 = vsyncpa [#allocation5], 0  ;;  %94 = vrot.lane.b32.xlu1 %v85_v5, %s4943_s13  ;;  %92 = vrot.lane.b32.xlu0 %v84_v6, %s4943_s13  ;;  %vm215_vm3 = vcmask 1041408   ;;  %v191_v11 = vld [vmem:[%s6578_s1] sm:$0xff]  ;;  %v192_v12 = vld [vmem:[%s6578_s1 + $0x8] sm:$0xff]  ;;  %vm104_vm4 = vcmask 138248  }
  0x1a   :  { %v87_v13 = vld [vmem:[%s6577_s0 + $0x48] sm:$0xff]  ;;  %v86_v14 = vld [vmem:[%s6577_s0 + $0x40] sm:$0xff]  ;;  %4477 = vmatprep.subr.bf16.mxu0 %v4476_v9  ;;  %v4480_v15 = vpack.c.bf16 %v192_v12, %v191_v11  ;;  %v3380_v20 = vld [vmem:[%s6577_s0 + $0x38] sm:$0xff]  ;;  %vm202_vm5 = vcmask 146432   ;;  %s4946_s29 = smov 16   ;;  %s4947_s30 = smov 32  }
  0x1b   :  { %4479 = vmatpush3.bf16.msra.mxu0 %v4476_v9  ;;  %v3376_v16 = vld [vmem:[%s6577_s0 + $0x28] sm:$0xff]  ;;  %v3375_v17 = vld [vmem:[%s6577_s0 + $0x20] sm:$0xff]  ;;  %v3379_v21 = vld [vmem:[%s6577_s0 + $0x30] sm:$0xff]  ;;  %s4948_s10 = smov 64   ;;  %vm1633_vm6 = vcmask 64513   ;;  %vm1642_vm7 = vcmask 130113  }
  0x1c   :  { %4032 = vmatprep.subr.msk.mxu0 %vm215_vm3, %v3385_v10  ;;  %v3378_v18 = vld [vmem:[%s6577_s0 + $0x68] sm:$0xff]  ;;  %v3377_v19 = vld [vmem:[%s6577_s0 + $0x60] sm:$0xff]  ;;  %v3382_v22 = vld [vmem:[%s6577_s0 + $0x78] sm:$0xff]  ;;  %1634 = vst.msk [vmem:[#allocation3] sm:$0xfe] %vm1633_vm6, %v4944_v4  ;;  %vm1635_vm8 = vcmask 64512  }
  0x1d   :  { %98 = vrot.lane.b32.xlu1 %v87_v13, %s4943_s13  ;;  %96 = vrot.lane.b32.xlu0 %v86_v14, %s4943_s13  ;;  %v3381_v23 = vld [vmem:[%s6577_s0 + $0x70] sm:$0xff]  ;;  %v3397_v37 = vld [vmem:[%s6578_s1 + $0x98] sm:$0xff]  ;;  %1643 = vst.msk [vmem:[#allocation3 + $0x8] sm:$0xfe] %vm1642_vm7, %v4944_v4  ;;  %1648 = vst.msk [vmem:[#allocation3 + $0x38] sm:$0xfe] %vm1642_vm7, %v4944_v4 }
  0x1e   :  { %v193_v32 = vld [vmem:[%s6578_s1 + $0x10] sm:$0x3]  ;;  %v3398_v44 = vld [vmem:[%s6578_s1 + $0xa0] sm:$0x3]  ;;  %v3404_v48 = vld [vmem:[%s6578_s1 + $0xd8] sm:$0xff]  ;;  %vm1644_vm9 = vcmask 130112  }
  0x1f   :  { %4033 = vmatpush3.msk.msra.mxu0 %vm215_vm3, %v3385_v10  ;;  %v3396_v36 = vld [vmem:[%s6578_s1 + $0x90] sm:$0xff]  ;;  %v3405_v49 = vld [vmem:[%s6578_s1 + $0xe0] sm:$0xff]  ;;  %v3406_v56 = vld [vmem:[%s6578_s1 + $0xe8] sm:$0x3]  ;;  %1639 = vst.msk [vmem:[#allocation3 + $0x30] sm:$0xfe] %vm1633_vm6, %v4944_v4 }
  0x20   :  { %4481 = vmatprep.subr.bf16.mxu0 %v4480_v15  ;;  %v4484_v38 = vpack.c.bf16 %v3397_v37, %v3396_v36  ;;  %v4488_v51 = vpack.c.bf16 %v3405_v49, %v3404_v48  ;;  %v3412_v60 = vld [vmem:[%s6578_s1 + $0x18] sm:$0xff]  ;;  %v3413_v61 = vld [vmem:[%s6578_s1 + $0x20] sm:$0xff]  ;;  %v3414_v2 = vld [vmem:[%s6578_s1 + $0x28] sm:$0x3]  ;;  %1636 = vst.msk [vmem:[#allocation3 + $0x10] sm:$0xff] %vm1635_vm8, %v4944_v4  ;;  %vm1637_vm10 = vcmask 57344  }
  0x21   :  { %146 = vrot.lane.b32.xlu1 %v3376_v16, %s4943_s13  ;;  %144 = vrot.lane.b32.xlu0 %v3375_v17, %s4943_s13  ;;  %v4492_v63 = vpack.c.bf16 %v3413_v61, %v3412_v60  ;;  %v3420_v5 = vld [vmem:[%s6578_s1 + $0x60] sm:$0xff]  ;;  %v3421_v6 = vld [vmem:[%s6578_s1 + $0x68] sm:$0xff]  ;;  %1645 = vst.msk [vmem:[#allocation3 + $0x18] sm:$0xff] %vm1644_vm9, %v4944_v4  ;;  %1649 = vst.msk [vmem:[#allocation3 + $0x48] sm:$0xff] %vm1644_vm9, %v4944_v4  ;;  %vm1646_vm11 = vcmask 122944   ;;  %vm1655_vm13 = vcmask 1040384  }
  0x22   :  { %v4496_v8 = vpack.c.bf16 %v3421_v6, %v3420_v5  ;;  %v3422_v10 = vld [vmem:[%s6578_s1 + $0x70] sm:$0x3]  ;;  %v3428_v12 = vld [vmem:[%s6578_s1 + $0xa8] sm:$0xff]  ;;  %v3452_v36 = vld [vmem:[%s6578_s1 + $0x78] sm:$0xff]  ;;  %1640 = vst.msk [vmem:[#allocation3 + $0x40] sm:$0xff] %vm1635_vm8, %v4944_v4  ;;  %vm1680_vm14 = vcmask 1047617  }
  0x23   :  { %v3429_v13 = vld [vmem:[%s6578_s1 + $0xb0] sm:$0xff]  ;;  %v3453_v37 = vld [vmem:[%s6578_s1 + $0x80] sm:$0xff]  ;;  %1638 = vst.msk [vmem:[#allocation3 + $0x20] sm:$0x1] %vm1637_vm10, %v4944_v4  ;;  %1641 = vst.msk [vmem:[#allocation3 + $0x50] sm:$0x1] %vm1637_vm10, %v4944_v4 }
  0x24   :  { %1647 = vst.msk [vmem:[#allocation3 + $0x28] sm:$0x1] %vm1646_vm11, %v4944_v4  ;;  %1650 = vst.msk [vmem:[#allocation3 + $0x58] sm:$0x1] %vm1646_vm11, %v4944_v4  ;;  %vm1683_vm15 = vcmask 1047616   ;;  %vm1686_vm0 = vcmask 1040448  }
  0x25   :  { %150 = vrot.lane.b32.xlu1 %v3378_v18, %s4943_s13  ;;  %148 = vrot.lane.b32.xlu0 %v3377_v19, %s4943_s13  ;;  %v3430_v18 = vld [vmem:[%s6578_s1 + $0xb8] sm:$0x3]  ;;  %vm1741_vm1 = vcmask 1046528   ;;  %vm1785_vm2 = vcmask 130048  }
  0x29   :  { %172 = vrot.lane.b32.xlu1 %v3380_v20, %s4943_s13  ;;  %170 = vrot.lane.b32.xlu0 %v3379_v21, %s4943_s13  ;;  %v3436_v20 = vld [vmem:[%s6578_s1 + $0xf0] sm:$0xff]  ;;  %v3437_v21 = vld [vmem:[%s6578_s1 + $0xf8] sm:$0xff] }
  0x2d   :  { %176 = vrot.lane.b32.xlu1 %v3382_v22, %s4943_s13  ;;  %174 = vrot.lane.b32.xlu0 %v3381_v23, %s4943_s13  ;;  %v4504_v23 = vpack.c.bf16 %v3437_v21, %v3436_v20 }
  0x74   :  { %v123_v24 = vpop.permute.xlu1 %122 }
  0x75   :  { %v119_v25 = vpop.permute.xlu0 %118  ;;  %133 = vst.msk [vmem:[#allocation2 + $0x49] sm:$0xff] %vm104_vm4, %v123_v24 }
  0x76   :  { %131 = vst.msk [vmem:[#allocation2 + $0x31] sm:$0xff] %vm104_vm4, %v119_v25 }
  0x78   :  { %v125_v26 = vpop.permute.xlu1 %124 }
  0x79   :  { %v121_v27 = vpop.permute.xlu0 %120  ;;  %134 = vst.msk [vmem:[#allocation2 + $0x51] sm:$0xff] %vm104_vm4, %v125_v26  ;;  %v3438_v26 = vld [vmem:[%s6578_s1 + $0x100] sm:$0x3] }
  0x7a   :  { %132 = vst.msk [vmem:[#allocation2 + $0x39] sm:$0xff] %vm104_vm4, %v121_v27 }
  0x7c   :  { %v196_v31 = vld [vmem:[#allocation2 + $0x48] sm:$0xff] }
  0x7d   :  { %v194_v28 = vld [vmem:[#allocation2 + $0x30] sm:$0xff] }
  0x7e   :  { %4034 = vmatprep.mubr.msk.f32.mxu0 %vm202_vm5, %v194_v28  ;;  %v740_v17 = vld [vmem:[#allocation2 + $0x31] sm:$0xff]  ;;  %v742_v22 = vld [vmem:[#allocation2 + $0x49] sm:$0xff] }
  0x7f   :  { %v3444_v28 = vld [vmem:[%s6578_s1 + $0x30] sm:$0xff] }
  0x80   :  { %v197_v39 = vld [vmem:[#allocation2 + $0x50] sm:$0xff] }
  0x81   :  { %v195_v33 = vld [vmem:[#allocation2 + $0x38] sm:$0xff] }
  0x82   :  { %4035 = vmatmul.mubr.msk.f32.vlgmr.msra.gmra.mrb[0].mxu0 %vm202_vm5, %v195_v33  ;;  %v741_v19 = vld [vmem:[#allocation2 + $0x39] sm:$0xff]  ;;  %v743_v24 = vld [vmem:[#allocation2 + $0x51] sm:$0xff] }
  0x83   :  { %4483 = vmatpush3.bf16.msra.mxu0 %v4480_v15  ;;  %4037 = vmatprep.mubr.msk.f32.mxu0 %vm202_vm5, %v196_v31  ;;  %v4500_v15 = vpack.c.bf16 %v3429_v13, %v3428_v12  ;;  %v1188_v49 = vld [vmem:[#allocation2 + $0x32] sm:$0xff] }
  0x84   :  { %4044 = vmatprep.subr.msk.mxu0 %vm215_vm3, %v193_v32 }
  0x86   :  { %4038 = vmatmul.mubr.msk.f32.gmra.mrb[2].mxu0 %vm202_vm5, %v197_v39  ;;  %v4512_v39 = vpack.c.bf16 %v3453_v37, %v3452_v36 }
  0x87   :  { %4045 = vmatpush3.msk.msra.mxu0 %vm215_vm3, %v193_v32 }
  0x88   :  { %4485 = vmatprep.subr.bf16.mxu0 %v4484_v38 }
  0x8b   :  { %v95_v29 = vpop.permute.xlu1 %94  ;;  %v93_v30 = vpop.permute.xlu0 %92 }
  0x8c   :  { %106 = vst.msk [vmem:[#allocation2 + $0x9] sm:$0xff] %vm104_vm4, %v95_v29  ;;  %105 = vst.msk [vmem:[#allocation2 + $0x1] sm:$0xff] %vm104_vm4, %v93_v30  ;;  %v3445_v29 = vld [vmem:[%s6578_s1 + $0x38] sm:$0xff] }
  0x8d   :  { %v4508_v31 = vpack.c.bf16 %v3445_v29, %v3444_v28 }
  0x8f   :  { %v99_v34 = vpop.permute.xlu1 %98  ;;  %v97_v35 = vpop.permute.xlu0 %96 }
  0x90   :  { %108 = vst.msk [vmem:[#allocation2 + $0x21] sm:$0xff] %vm104_vm4, %v99_v34  ;;  %107 = vst.msk [vmem:[#allocation2 + $0x19] sm:$0xff] %vm104_vm4, %v97_v35  ;;  %v3446_v34 = vld [vmem:[%s6578_s1 + $0x40] sm:$0x3] }
  0x93   :  { %v147_v40 = vpop.permute.xlu1 %146  ;;  %v145_v41 = vpop.permute.xlu0 %144  ;;  %v187_v42 = vld [vmem:[#allocation2] sm:$0xff]  ;;  %v188_v43 = vld [vmem:[#allocation2 + $0x8] sm:$0xff] }
  0x94   :  { %158 = vst.msk [vmem:[#allocation2 + $0x69] sm:$0xff] %vm104_vm4, %v147_v40  ;;  %157 = vst.msk [vmem:[#allocation2 + $0x61] sm:$0xff] %vm104_vm4, %v145_v41  ;;  %4046 = vmatprep.mubr.msk.f32.mxu0 %vm202_vm5, %v187_v42  ;;  %v628_v9 = vld [vmem:[#allocation2 + $0x1] sm:$0xff]  ;;  %v629_v11 = vld [vmem:[#allocation2 + $0x9] sm:$0xff] }
  0x95   :  { %4047 = vmatmul.mubr.msk.f32.vlgmr.msra.gmra.mrb[0].mxu0 %vm202_vm5, %v188_v43  ;;  %v1076_v41 = vld [vmem:[#allocation2 + $0x2] sm:$0xff]  ;;  %v1077_v43 = vld [vmem:[#allocation2 + $0xa] sm:$0xff] }
  0x96   :  { %4487 = vmatpush3.bf16.msra.mxu0 %v4484_v38  ;;  %v3454_v42 = vld [vmem:[%s6578_s1 + $0x88] sm:$0x3] }
  0x97   :  { %v151_v45 = vpop.permute.xlu1 %150  ;;  %v149_v46 = vpop.permute.xlu0 %148  ;;  %v189_v47 = vld [vmem:[#allocation2 + $0x18] sm:$0xff]  ;;  %v190_v50 = vld [vmem:[#allocation2 + $0x20] sm:$0xff]  ;;  %4056 = vmatprep.subr.msk.mxu0 %vm215_vm3, %v3398_v44 }
  0x98   :  { %160 = vst.msk [vmem:[#allocation2 + $0x81] sm:$0xff] %vm104_vm4, %v151_v45  ;;  %159 = vst.msk [vmem:[#allocation2 + $0x79] sm:$0xff] %vm104_vm4, %v149_v46  ;;  %4049 = vmatprep.mubr.msk.f32.mxu0 %vm202_vm5, %v189_v47  ;;  %v630_v14 = vld [vmem:[#allocation2 + $0x19] sm:$0xff]  ;;  %v631_v16 = vld [vmem:[#allocation2 + $0x21] sm:$0xff] }
  0x99   :  { %4050 = vmatmul.mubr.msk.f32.gmra.mrb[2].mxu0 %vm202_vm5, %v190_v50  ;;  %v3461_v45 = vld [vmem:[%s6578_s1 + $0xc8] sm:$0xff]  ;;  %v1078_v46 = vld [vmem:[#allocation2 + $0x1a] sm:$0xff]  ;;  %v3462_v50 = vld [vmem:[%s6578_s1 + $0xd0] sm:$0x3] }
  0x9a   :  { %4057 = vmatpush3.msk.msra.mxu0 %vm215_vm3, %v3398_v44  ;;  %v3460_v44 = vld [vmem:[%s6578_s1 + $0xc0] sm:$0xff] }
  0x9b   :  { %v173_v52 = vpop.permute.xlu1 %172  ;;  %v171_v53 = vpop.permute.xlu0 %170  ;;  %v404_v54 = vld [vmem:[#allocation2 + $0x60] sm:$0xff]  ;;  %v405_v55 = vld [vmem:[#allocation2 + $0x68] sm:$0xff]  ;;  %4489 = vmatprep.subr.bf16.mxu0 %v4488_v51  ;;  %v4516_v47 = vpack.c.bf16 %v3461_v45, %v3460_v44 }
  0x9c   :  { %184 = vst.msk [vmem:[#allocation2 + $0x99] sm:$0xff] %vm104_vm4, %v173_v52  ;;  %183 = vst.msk [vmem:[#allocation2 + $0x91] sm:$0xff] %vm104_vm4, %v171_v53  ;;  %4058 = vmatprep.mubr.msk.f32.mxu0 %vm202_vm5, %v404_v54  ;;  %v852_v25 = vld [vmem:[#allocation2 + $0x61] sm:$0xff]  ;;  %v853_v27 = vld [vmem:[#allocation2 + $0x69] sm:$0xff] }
  0x9d   :  { %4059 = vmatmul.mubr.msk.f32.vlgmr.msra.gmra.mrb[0].mxu0 %vm202_vm5, %v405_v55  ;;  %v1079_v48 = vld [vmem:[#allocation2 + $0x22] sm:$0xff]  ;;  %v3469_v53 = vld [vmem:[%s6578_s1 + $0x110] sm:$0xff] }
  0x9e   :  { %4491 = vmatpush3.bf16.msra.mxu0 %v4488_v51  ;;  %v1189_v51 = vld [vmem:[#allocation2 + $0x3a] sm:$0xff]  ;;  %v3468_v52 = vld [vmem:[%s6578_s1 + $0x108] sm:$0xff] }
  0x9f   :  { %v177_v57 = vpop.permute.xlu1 %176  ;;  %v175_v58 = vpop.permute.xlu0 %174  ;;  %v406_v59 = vld [vmem:[#allocation2 + $0x78] sm:$0xff]  ;;  %v407_v62 = vld [vmem:[#allocation2 + $0x80] sm:$0xff]  ;;  %4068 = vmatprep.subr.msk.mxu0 %vm215_vm3, %v3406_v56  ;;  %v1190_v54 = vld [vmem:[#allocation2 + $0x4a] sm:$0xff]  ;;  %v4520_v55 = vpack.c.bf16 %v3469_v53, %v3468_v52 }
  0xa0   :  { %186 = vst.msk [vmem:[#allocation2 + $0xb1] sm:$0xff] %vm104_vm4, %v177_v57  ;;  %185 = vst.msk [vmem:[#allocation2 + $0xa9] sm:$0xff] %vm104_vm4, %v175_v58  ;;  %4061 = vmatprep.mubr.msk.f32.mxu0 %vm202_vm5, %v406_v59  ;;  %v854_v30 = vld [vmem:[#allocation2 + $0x79] sm:$0xff]  ;;  %v855_v32 = vld [vmem:[#allocation2 + $0x81] sm:$0xff] }
  0xa1   :  { %4062 = vmatmul.mubr.msk.f32.gmra.mrb[2].mxu0 %vm202_vm5, %v407_v62  ;;  %v1300_v57 = vld [vmem:[#allocation2 + $0x62] sm:$0xff]  ;;  %v1301_v58 = vld [vmem:[#allocation2 + $0x6a] sm:$0xff]  ;;  %v3470_v59 = vld [vmem:[%s6578_s1 + $0x118] sm:$0x3] }
  0xa2   :  { %4069 = vmatpush3.msk.msra.mxu0 %vm215_vm3, %v3406_v56  ;;  %v1191_v56 = vld [vmem:[#allocation2 + $0x52] sm:$0xff]  ;;  %v1302_v60 = vld [vmem:[#allocation2 + $0x7a] sm:$0xff]  ;;  %v1303_v61 = vld [vmem:[#allocation2 + $0x82] sm:$0xff] }
  0xa3   :  { %v516_v0 = vld [vmem:[#allocation2 + $0x90] sm:$0xff]  ;;  %v517_v1 = vld [vmem:[#allocation2 + $0x98] sm:$0xff]  ;;  %4493 = vmatprep.subr.bf16.mxu0 %v4492_v63 }
  0xa4   :  { %4070 = vmatprep.mubr.msk.f32.mxu0 %vm202_vm5, %v516_v0  ;;  %v964_v33 = vld [vmem:[#allocation2 + $0x91] sm:$0xff]  ;;  %v965_v35 = vld [vmem:[#allocation2 + $0x99] sm:$0xff] }
  0xa5   :  { %4071 = vmatmul.mubr.msk.f32.vlgmr.msra.gmra.mrb[0].mxu0 %vm202_vm5, %v517_v1  ;;  %v1412_v62 = vld [vmem:[#allocation2 + $0x92] sm:$0xff] }
  0xa6   :  { %4495 = vmatpush3.bf16.msra.mxu0 %v4492_v63  ;;  %v1413_v63 = vld [vmem:[#allocation2 + $0x9a] sm:$0xff] }
  0xa7   :  { %v518_v3 = vld [vmem:[#allocation2 + $0xa8] sm:$0xff]  ;;  %v519_v7 = vld [vmem:[#allocation2 + $0xb0] sm:$0xff]  ;;  %4080 = vmatprep.subr.msk.mxu0 %vm215_vm3, %v3414_v2 }
  0xa8   :  { %4073 = vmatprep.mubr.msk.f32.mxu0 %vm202_vm5, %v518_v3  ;;  %v966_v38 = vld [vmem:[#allocation2 + $0xa9] sm:$0xff]  ;;  %v967_v40 = vld [vmem:[#allocation2 + $0xb1] sm:$0xff] }
  0xa9   :  { %4074 = vmatmul.mubr.msk.f32.gmra.mrb[2].mxu0 %vm202_vm5, %v519_v7  ;;  %v1414_v0 = vld [vmem:[#allocation2 + $0xaa] sm:$0xff]  ;;  %v1415_v1 = vld [vmem:[#allocation2 + $0xb2] sm:$0xff] }
  0xaa   :  { %4081 = vmatpush3.msk.msra.mxu0 %vm215_vm3, %v3414_v2  ;;  %4082 = vmatprep.mubr.msk.f32.mxu0 %vm202_vm5, %v628_v9  ;;  %v3476_v2 = vld [vmem:[%s6580_s3] ss:$0 sm:$0xff]  ;;  %s4945_s3 = smov 8  }
  0xab   :  { %4497 = vmatprep.subr.bf16.mxu0 %v4496_v8 }
  0xad   :  { %4083 = vmatmul.mubr.msk.f32.vlgmr.msra.gmra.mrb[0].mxu0 %vm202_vm5, %v629_v11 }
  0xae   :  { %4499 = vmatpush3.bf16.msra.mxu0 %v4496_v8  ;;  %4085 = vmatprep.mubr.msk.f32.mxu0 %vm202_vm5, %v630_v14 }
  0xaf   :  { %4092 = vmatprep.subr.msk.mxu0 %vm215_vm3, %v3422_v10 }
  0xb1   :  { %4086 = vmatmul.mubr.msk.f32.gmra.mrb[2].mxu0 %vm202_vm5, %v631_v16 }
  0xb2   :  { %4093 = vmatpush3.msk.msra.mxu0 %vm215_vm3, %v3422_v10  ;;  %4094 = vmatprep.mubr.msk.f32.mxu0 %vm202_vm5, %v740_v17 }
  0xb3   :  { %4501 = vmatprep.subr.bf16.mxu0 %v4500_v15 }
  0xb5   :  { %4095 = vmatmul.mubr.msk.f32.vlgmr.msra.gmra.mrb[0].mxu0 %vm202_vm5, %v741_v19 }
  0xb6   :  { %4503 = vmatpush3.bf16.msra.mxu0 %v4500_v15  ;;  %4097 = vmatprep.mubr.msk.f32.mxu0 %vm202_vm5, %v742_v22 }
  0xb7   :  { %4104 = vmatprep.subr.msk.mxu0 %vm215_vm3, %v3430_v18 }
  0xb9   :  { %4098 = vmatmul.mubr.msk.f32.gmra.mrb[2].mxu0 %vm202_vm5, %v743_v24 }
  0xba   :  { %4105 = vmatpush3.msk.msra.mxu0 %vm215_vm3, %v3430_v18  ;;  %4106 = vmatprep.mubr.msk.f32.mxu0 %vm202_vm5, %v852_v25 }
  0xbb   :  { %4505 = vmatprep.subr.bf16.mxu0 %v4504_v23 }
  0xbd   :  { %4107 = vmatmul.mubr.msk.f32.vlgmr.msra.gmra.mrb[0].mxu0 %vm202_vm5, %v853_v27 }
  0xbe   :  { %4507 = vmatpush3.bf16.msra.mxu0 %v4504_v23  ;;  %4109 = vmatprep.mubr.msk.f32.mxu0 %vm202_vm5, %v854_v30 }
  0xbf   :  { %4116 = vmatprep.subr.msk.mxu0 %vm215_vm3, %v3438_v26 }
  0xc1   :  { %4110 = vmatmul.mubr.msk.f32.gmra.mrb[2].mxu0 %vm202_vm5, %v855_v32 }
  0xc2   :  { %4117 = vmatpush3.msk.msra.mxu0 %vm215_vm3, %v3438_v26  ;;  %4118 = vmatprep.mubr.msk.f32.mxu0 %vm202_vm5, %v964_v33 }
  0xc3   :  { %4509 = vmatprep.subr.bf16.mxu0 %v4508_v31 }
  0xc5   :  { %4119 = vmatmul.mubr.msk.f32.vlgmr.msra.gmra.mrb[0].mxu0 %vm202_vm5, %v965_v35 }
  0xc6   :  { %4511 = vmatpush3.bf16.msra.mxu0 %v4508_v31  ;;  %4121 = vmatprep.mubr.msk.f32.mxu0 %vm202_vm5, %v966_v38  ;;  %v1563_v31 = vlaneseq }
  0xc7   :  { %4128 = vmatprep.subr.msk.mxu0 %vm215_vm3, %v3446_v34 }
  0xc8   :  { %v5367_v32 = vshrl.u32 %v1563_v31, 7  ;;  %vm1620_vm12 = vcmp.lt.s32.totalorder %v1563_v31, 144 }
  0xc9   :  { %4122 = vmatmul.mubr.msk.f32.gmra.mrb[2].mxu0 %vm202_vm5, %v967_v40  ;;  %1622 = vst.msk [vmem:[#allocation3] ss:$8 sm:$0x3] %vm1620_vm12, %v4944_v4  ;;  %1625 = vst.msk [vmem:[#allocation3 + $0x30] ss:$8 sm:$0x3] %vm1620_vm12, %v4944_v4 }
  0xca   :  { %4129 = vmatpush3.msk.msra.mxu0 %vm215_vm3, %v3446_v34  ;;  %4130 = vmatprep.mubr.msk.f32.mxu0 %vm202_vm5, %v1076_v41  ;;  %v5370_v34 = vsub.s32 0, %v5367_v32  ;;  %1628 = vst.msk [vmem:[#allocation3 + $0x21] ss:$8 sm:$0x3] %vm1620_vm12, %v4944_v4 }
  0xcb   :  { %4513 = vmatprep.subr.bf16.mxu0 %v4512_v39  ;;  %1631 = vst.msk [vmem:[#allocation3 + $0x51] ss:$8 sm:$0x3] %vm1620_vm12, %v4944_v4 }
  0xcd   :  { %4131 = vmatmul.mubr.msk.f32.vlgmr.msra.gmra.mrb[0].mxu0 %vm202_vm5, %v1077_v43 }
  0xce   :  { %4515 = vmatpush3.bf16.msra.mxu0 %v4512_v39  ;;  %4133 = vmatprep.mubr.msk.f32.mxu0 %vm202_vm5, %v1078_v46 }
  0xcf   :  { %4140 = vmatprep.subr.msk.mxu0 %vm215_vm3, %v3454_v42 }
  0xd1   :  { %4134 = vmatmul.mubr.msk.f32.gmra.mrb[2].mxu0 %vm202_vm5, %v1079_v48 }
  0xd2   :  { %4141 = vmatpush3.msk.msra.mxu0 %vm215_vm3, %v3454_v42  ;;  %4142 = vmatprep.mubr.msk.f32.mxu0 %vm202_vm5, %v1188_v49 }
  0xd3   :  { %4517 = vmatprep.subr.bf16.mxu0 %v4516_v47 }
  0xd5   :  { %4143 = vmatmul.mubr.msk.f32.vlgmr.msra.gmra.mrb[0].mxu0 %vm202_vm5, %v1189_v51 }
  0xd6   :  { %4519 = vmatpush3.bf16.msra.mxu0 %v4516_v47  ;;  %4145 = vmatprep.mubr.msk.f32.mxu0 %vm202_vm5, %v1190_v54 }
  0xd7   :  { %4152 = vmatprep.subr.msk.mxu0 %vm215_vm3, %v3462_v50 }
  0xd9   :  { %4146 = vmatmul.mubr.msk.f32.gmra.mrb[2].mxu0 %vm202_vm5, %v1191_v56 }
  0xda   :  { %4153 = vmatpush3.msk.msra.mxu0 %vm215_vm3, %v3462_v50  ;;  %4154 = vmatprep.mubr.msk.f32.mxu0 %vm202_vm5, %v1300_v57 }
  0xdb   :  { %4521 = vmatprep.subr.bf16.mxu0 %v4520_v55 }
  0xdd   :  { %4155 = vmatmul.mubr.msk.f32.vlgmr.msra.gmra.mrb[0].mxu0 %vm202_vm5, %v1301_v58 }
  0xde   :  { %4523 = vmatpush3.bf16.msra.mxu0 %v4520_v55  ;;  %4157 = vmatprep.mubr.msk.f32.mxu0 %vm202_vm5, %v1302_v60 }
  0xdf   :  { %4164 = vmatprep.subr.msk.mxu0 %vm215_vm3, %v3470_v59 }
  0xe1   :  { %4158 = vmatmul.mubr.msk.f32.gmra.mrb[2].mxu0 %vm202_vm5, %v1303_v61  ;;  %v3478_v61 = vld [vmem:[%s6579_s2 + $0x90] sm:$0xff] }
  0xe2   :  { %4165 = vmatpush3.msk.msra.mxu0 %vm215_vm3, %v3470_v59  ;;  %4166 = vmatprep.mubr.msk.f32.mxu0 %vm202_vm5, %v1412_v62  ;;  %v3479_v62 = vld [vmem:[%s6579_s2 + $0x98] sm:$0xff]  ;;  %vm1990_vm3 = vcmask 1045504  }
  0xe5   :  { %4167 = vmatmul.mubr.msk.f32.vlgmr.msra.gmra.mrb[0].mxu0 %vm202_vm5, %v1413_v63  ;;  %v3480_v63 = vld [vmem:[%s6579_s2 + $0xa0] sm:$0xff] }
  0xe6   :  { %4169 = vmatprep.mubr.msk.f32.mxu0 %vm202_vm5, %v1414_v0  ;;  %v4949_v0 = vmov 0.0|0.0  }
  0xe7   :  { %4524 = vmatprep.subr.bf16.mxu1 %v4949_v0 }
  0xe9   :  { %4170 = vmatmul.mubr.msk.f32.gmra.mrb[2].mxu0 %vm202_vm5, %v1415_v1  ;;  %v4525_v1 = vpack.c.bf16 %v3479_v62, %v3478_v61 }
  0xeb   :  { %4526 = vmatpush1.bf16.msra.mxu1 %v4525_v1 }
  0xec   :  { %4527 = vmatprep.subr.bf16.mxu1 %v4949_v0 }
 0x1b8   :  { %v4168_v3 = vpop.f32.mrb[0].mxu0 }
 0x1b9   :  { %v1532_v5 = vadd.f32 %v4168_v3, %v3476_v2  ;;  %v1501_v6 = vpop.f32.mrb[1].mxu0 }
 0x1ba   :  { %v1531_v7 = vadd.f32 %v3476_v2, %v1501_v6  ;;  %v3483_v6 = vld [vmem:[%s6579_s2 + $0xb8] sm:$0xff] }
 0x1bb   :  { %v1536_v8 = vmax.f32 %v1532_v5, 0.0  ;;  %v3482_v5 = vld [vmem:[%s6579_s2 + $0xb0] sm:$0xff] }
 0x1bc   :  { %v1535_v9 = vmax.f32 %v1531_v7, 0.0  ;;  %v4171_v10 = vpop.f32.mrb[2].mxu0  ;;  %v4531_v7 = vpack.c.bf16 %v3483_v6, %v3482_v5  ;;  %v1705_v6 = vld [vmem:[%s6579_s2 + $0x10] sm:$0xff] }
 0x1bd   :  { %v1511_v11 = vpop.f32.mrb[3].mxu0  ;;  %v1534_v12 = vadd.f32 %v4171_v10, %v3476_v2 }
 0x1be   :  { %v1533_v13 = vadd.f32 %v3476_v2, %v1511_v11  ;;  %v1541_v14 = vadd.f32 %v1536_v8, %v1535_v9  ;;  %v3481_v2 = vld [vmem:[%s6579_s2 + $0xa8] sm:$0xff]  ;;  %v3486_v11 = vld [vmem:[%s6579_s2 + $0xd0] sm:$0xff] }
 0x1bf   :  { %v1538_v16 = vmax.f32 %v1534_v12, 0.0  ;;  %v4528_v3 = vpack.c.bf16 %v3481_v2, %v3480_v63  ;;  %v3487_v12 = vld [vmem:[%s6579_s2 + $0xd8] sm:$0xff] }
 0x1c0   :  { %v1537_v15 = vmax.f32 %v1533_v13, 0.0  ;;  %v4537_v13 = vpack.c.bf16 %v3487_v12, %v3486_v11  ;;  %v1706_v11 = vld [vmem:[%s6579_s2 + $0x18] sm:$0xff] }
 0x1c1   :  { %4529 = vmatpush1.bf16.msra.mxu1 %v4528_v3 }
 0x1c2   :  { %v1542_v17 = vadd.f32 %v1541_v14, %v1537_v15  ;;  %4530 = vmatprep.subr.bf16.mxu1 %v4949_v0  ;;  %v3488_v14 = vld [vmem:[%s6579_s2 + $0xe0] sm:$0xff] }
 0x1c4   :  { %v1543_v18 = vadd.f32 %v1542_v17, %v1538_v16 }
 0x1c5   :  { %4532 = vmatpush1.bf16.msra.mxu1 %v4531_v7 }
 0x1c6   :  { %v1544_v19 = vrot.slane %v1543_v18, 4  ;;  %4533 = vmatprep.subr.bf16.mxu1 %v4949_v0 }
 0x1c8   :  { %v1545_v20 = vadd.f32 %v1544_v19, %v1543_v18 }
 0x1ca   :  { %v1546_v21 = vrot.slane %v1545_v20, 2 }
 0x1cc   :  { %v1547_v22 = vadd.f32 %v1546_v21, %v1545_v20  ;;  %v1539_v21 = vld [vmem:[%s6581_s4] sm:$0x1] }
 0x1ce   :  { %v1548_v23 = vrot.slane %v1547_v22, 1 }
 0x1d0   :  { %v1549_v24 = vadd.f32 %v1548_v23, %v1547_v22  ;;  %v3490_v22 = vld [vmem:[%s6579_s2 + $0xf0] sm:$0xff]  ;;  %v3491_v23 = vld [vmem:[%s6579_s2 + $0xf8] sm:$0xff] }
 0x1d2   :  { %1550 = vrot.lane.b32.xlu0 %v1549_v24, %s4945_s3 }
 0x244   :  { %v1551_v25 = vpop.permute.xlu0 %1550 }
 0x245   :  { %v1552_v26 = vadd.f32 %v1551_v25, %v1549_v24  ;;  %v4543_v24 = vpack.c.bf16 %v3491_v23, %v3490_v22 }
 0x247   :  { %1553 = vrot.lane.b32.xlu1 %v1552_v26, %s4946_s29 }
 0x2b9   :  { %v1554_v27 = vpop.permute.xlu1 %1553 }
 0x2ba   :  { %v1555_v28 = vadd.f32 %v1554_v27, %v1552_v26  ;;  %v3492_v27 = vld [vmem:[%s6579_s2 + $0x100] sm:$0xff] }
 0x2bc   :  { %1556 = vrot.lane.b32.xlu0 %v1555_v28, %s4947_s30 }
 0x32e   :  { %v1557_v29 = vpop.permute.xlu0 %1556 }
 0x32f   :  { %v1558_v30 = vadd.f32 %v1557_v29, %v1555_v28  ;;  %v3493_v28 = vld [vmem:[%s6579_s2 + $0x108] sm:$0xff] }
 0x331   :  { %1559 = vrot.lane.b32.xlu1 %v1558_v30, %s4948_s10 }
 0x3a3   :  { %v1560_v33 = vpop.permute.xlu1 %1559 }
 0x3a4   :  { %v1561_v35 = vadd.f32 %v1560_v33, %v1558_v30  ;;  %v4546_v30 = vpack.c.bf16 %v3493_v28, %v3492_v27  ;;  %v3477_v33 = vld [vmem:[%s6582_s5] ss:$0 sm:$0xff] }
 0x3a6   :  { %v1562_v36 = vmul.f32 0.001953125, %v1561_v35 }
 0x3a8   :  { %v1566_v37 = vrot.slane %v1562_v36, %v5370_v34 }
 0x3aa   :  { %v5373_v38 = vsub.f32 %v1535_v9, %v1566_v37  ;;  %v5375_v39 = vsub.f32 %v1536_v8, %v1566_v37  ;;  %v5377_v40 = vsub.f32 %v1537_v15, %v1566_v37  ;;  %v5379_v41 = vsub.f32 %v1538_v16, %v1566_v37  ;;  %v3484_v8 = vld [vmem:[%s6579_s2 + $0xc0] sm:$0xff]  ;;  %v3485_v9 = vld [vmem:[%s6579_s2 + $0xc8] sm:$0xff] }
 0x3ab   :  { %v4534_v10 = vpack.c.bf16 %v3485_v9, %v3484_v8  ;;  %v3489_v15 = vld [vmem:[%s6579_s2 + $0xe8] sm:$0xff] }
 0x3ac   :  { %v1571_v42 = vmul.f32 %v5373_v38, %v5373_v38  ;;  %v1572_v43 = vmul.f32 %v5375_v39, %v5375_v39  ;;  %v1573_v44 = vmul.f32 %v5377_v40, %v5377_v40  ;;  %v1574_v46 = vmul.f32 %v5379_v41, %v5379_v41 }
 0x3ad   :  { %4535 = vmatpush1.bf16.msra.mxu1 %v4534_v10  ;;  %v4540_v16 = vpack.c.bf16 %v3489_v15, %v3488_v14 }
 0x3ae   :  { %v1575_v45 = vadd.f32 %v1572_v43, %v1571_v42  ;;  %4536 = vmatprep.subr.bf16.mxu1 %v4949_v0  ;;  %v3494_v42 = vld [vmem:[%s6579_s2 + $0x110] sm:$0xff]  ;;  %v3495_v43 = vld [vmem:[%s6579_s2 + $0x118] sm:$0xff] }
 0x3b0   :  { %v1576_v47 = vadd.f32 %v1575_v45, %v1573_v44 }
 0x3b1   :  { %4538 = vmatpush1.bf16.msra.mxu1 %v4537_v13 }
 0x3b2   :  { %v1577_v48 = vadd.f32 %v1576_v47, %v1574_v46  ;;  %4539 = vmatprep.subr.bf16.mxu1 %v4949_v0 }
 0x3b4   :  { %v1578_v49 = vrot.slane %v1577_v48, 4 }
 0x3b5   :  { %4541 = vmatpush1.bf16.msra.mxu1 %v4540_v16  ;;  %v4555_v16 = vpack.c.bf16 %v1706_v11, %v1705_v6 }
 0x3b6   :  { %v1579_v50 = vadd.f32 %v1578_v49, %v1577_v48  ;;  %4542 = vmatprep.subr.bf16.mxu1 %v4949_v0 }
 0x3b8   :  { %v1580_v51 = vrot.slane %v1579_v50, 2 }
 0x3b9   :  { %4544 = vmatpush1.bf16.msra.mxu1 %v4543_v24 }
 0x3ba   :  { %v1581_v52 = vadd.f32 %v1580_v51, %v1579_v50  ;;  %4545 = vmatprep.subr.bf16.mxu1 %v4949_v0 }
 0x3bc   :  { %v1582_v53 = vrot.slane %v1581_v52, 1 }
 0x3bd   :  { %4547 = vmatpush1.bf16.msra.mxu1 %v4546_v30 }
 0x3be   :  { %v1583_v54 = vadd.f32 %v1582_v53, %v1581_v52  ;;  %4548 = vmatprep.subr.bf16.mxu1 %v4949_v0 }
 0x3c0   :  { %1584 = vrot.lane.b32.xlu0 %v1583_v54, %s4945_s3 }
 0x432   :  { %v1585_v55 = vpop.permute.xlu0 %1584 }
 0x433   :  { %v1586_v56 = vadd.f32 %v1585_v55, %v1583_v54  ;;  %v1703_v55 = vld [vmem:[%s6579_s2] sm:$0xff] }
 0x435   :  { %1587 = vrot.lane.b32.xlu1 %v1586_v56, %s4946_s29 }
 0x4a7   :  { %v1588_v57 = vpop.permute.xlu1 %1587 }
 0x4a8   :  { %v1589_v58 = vadd.f32 %v1588_v57, %v1586_v56 }
 0x4aa   :  { %1590 = vrot.lane.b32.xlu0 %v1589_v58, %s4947_s30 }
 0x51c   :  { %v1591_v59 = vpop.permute.xlu0 %1590 }
 0x51d   :  { %v1592_v60 = vadd.f32 %v1591_v59, %v1589_v58  ;;  %v1704_v59 = vld [vmem:[%s6579_s2 + $0x8] sm:$0xff] }
 0x51e   :  { %v4552_v5 = vpack.c.bf16 %v1704_v59, %v1703_v55  ;;  %v1720_v55 = vld [vmem:[%s6579_s2 + $0x88] sm:$0xff] }
 0x51f   :  { %1593 = vrot.lane.b32.xlu1 %v1592_v60, %s4948_s10 }
 0x591   :  { %v1594_v17 = vpop.permute.xlu1 %1593 }
 0x592   :  { %v1595_v18 = vadd.f32 %v1594_v17, %v1592_v60  ;;  %v1707_v17 = vld [vmem:[%s6579_s2 + $0x20] sm:$0xff] }
 0x594   :  { %v1596_v19 = vmul.f32 0.001953125, %v1595_v18  ;;  %v1708_v18 = vld [vmem:[%s6579_s2 + $0x28] sm:$0xff] }
 0x596   :  { %v1597_v20 = vadd.f32 1e-05, %v1596_v19 }
 0x598   :  { %4915 = vrsqrt.f32 %v1597_v20 }
 0x5a2   :  { %v4916_v25 = vpop.eup %4915 }
 0x5a3   :  { %v1599_v26 = vmul.f32 %v4916_v25, %v1539_v21 }
 0x5a5   :  { %v1603_v29 = vrot.slane %v1599_v26, %v5370_v34 }
 0x5a7   :  { %v1604_v35 = vmul.f32 %v1603_v29, %v5373_v38  ;;  %v1605_v4 = vmul.f32 %v1603_v29, %v5375_v39  ;;  %v1606_v36 = vmul.f32 %v1603_v29, %v5377_v40  ;;  %v1607_v37 = vmul.f32 %v1603_v29, %v5379_v41 }
 0x5a8   :  { %v4549_v38 = vpack.c.bf16 %v3495_v43, %v3494_v42 }
 0x5a9   :  { %v1614_v44 = vadd.f32 %v3477_v33, %v1604_v35  ;;  %v1615_v45 = vadd.f32 %v3477_v33, %v1605_v4  ;;  %v1616_v47 = vadd.f32 %v3477_v33, %v1606_v36  ;;  %v1617_v40 = vadd.f32 %v3477_v33, %v1607_v37  ;;  %v1709_v35 = vld [vmem:[%s6579_s2 + $0x30] sm:$0xff]  ;;  %v1710_v4 = vld [vmem:[%s6579_s2 + $0x38] sm:$0xff] }
 0x5aa   :  { %4550 = vmatpush1.bf16.msra.mxu1 %v4549_v38  ;;  %v4558_v33 = vpack.c.bf16 %v1708_v18, %v1707_v17  ;;  %v4561_v43 = vpack.c.bf16 %v1710_v4, %v1709_v35  ;;  %v3514_v18 = vld [vmem:[%s6579_s2 + $0x170] sm:$0xff] }
 0x5ab   :  { %v1656_v39 = vrot.slane %v1614_v44, 7  ;;  %v1657_v46 = vrot.slane %v1615_v45, 7  ;;  %4551 = vmatprep.subr.bf16.mxu1 %v4949_v0  ;;  %v1659_v48 = vrot.slane %v1616_v47, 7  ;;  %v1660_v49 = vrot.slane %v1617_v40, 7  ;;  %v1711_v44 = vld [vmem:[%s6579_s2 + $0x40] sm:$0xff]  ;;  %v1712_v45 = vld [vmem:[%s6579_s2 + $0x48] sm:$0xff] }
 0x5ac   :  { %v1713_v47 = vld [vmem:[%s6579_s2 + $0x50] sm:$0xff]  ;;  %v1714_v40 = vld [vmem:[%s6579_s2 + $0x58] sm:$0xff] }
 0x5ad   :  { %1662 = vrot.lane.b32.xlu0 %v1656_v39, %s4945_s3  ;;  %v1658_v41 = vsel %vm1655_vm13, %v1656_v39, %v1657_v46  ;;  %v1661_v50 = vsel %vm1655_vm13, %v1659_v48, %v1660_v49 }
 0x5ae   :  { %1664 = vrot.lane.b32.xlu1 %v1658_v41, %s4945_s3  ;;  %v4567_v41 = vpack.c.bf16 %v1714_v40, %v1713_v47 }
 0x5b1   :  { %1666 = vrot.lane.b32.xlu0 %v1657_v46, %s4945_s3  ;;  %v4564_v46 = vpack.c.bf16 %v1712_v45, %v1711_v44 }
 0x5b2   :  { %1668 = vrot.lane.b32.xlu1 %v1659_v48, %s4945_s3  ;;  %v1715_v48 = vld [vmem:[%s6579_s2 + $0x60] sm:$0xff] }
 0x5b5   :  { %1670 = vrot.lane.b32.xlu0 %v1661_v50, %s4945_s3 }
 0x5b6   :  { %1672 = vrot.lane.b32.xlu1 %v1660_v49, %s4945_s3  ;;  %v1716_v49 = vld [vmem:[%s6579_s2 + $0x68] sm:$0xff] }
 0x5b7   :  { %v4570_v50 = vpack.c.bf16 %v1716_v49, %v1715_v48 }
 0x61f   :  { %v1663_v51 = vpop.permute.xlu0 %1662 }
 0x620   :  { %1681 = vst.msk [vmem:[#allocation3] sm:$0xfe] %vm1680_vm14, %v1663_v51  ;;  %v1665_v52 = vpop.permute.xlu1 %1664 }
 0x621   :  { %1682 = vst.msk [vmem:[#allocation3 + $0x8] sm:$0xfe] %vm1633_vm6, %v1663_v51  ;;  %v1717_v51 = vld [vmem:[%s6579_s2 + $0x70] sm:$0xff] }
 0x622   :  { %1684 = vst.msk [vmem:[#allocation3 + $0x10] sm:$0xff] %vm1683_vm15, %v1665_v52 }
 0x623   :  { %1685 = vst.msk [vmem:[#allocation3 + $0x18] sm:$0xff] %vm1635_vm8, %v1665_v52  ;;  %v1667_v53 = vpop.permute.xlu0 %1666  ;;  %v1718_v52 = vld [vmem:[%s6579_s2 + $0x78] sm:$0xff] }
 0x624   :  { %1687 = vst.msk [vmem:[#allocation3 + $0x20] sm:$0x1] %vm1686_vm0, %v1667_v53  ;;  %v1669_v54 = vpop.permute.xlu1 %1668 }
 0x625   :  { %1688 = vst.msk [vmem:[#allocation3 + $0x28] sm:$0x1] %vm1637_vm10, %v1667_v53  ;;  %v4573_v53 = vpack.c.bf16 %v1718_v52, %v1717_v51 }
 0x626   :  { %1689 = vst.msk [vmem:[#allocation3 + $0x30] sm:$0xfe] %vm1680_vm14, %v1669_v54 }
 0x627   :  { %1690 = vst.msk [vmem:[#allocation3 + $0x38] sm:$0xfe] %vm1633_vm6, %v1669_v54  ;;  %v1671_v56 = vpop.permute.xlu0 %1670  ;;  %v1721_v58 = vld [vmem:[#allocation3] sm:$0xfe] }
 0x628   :  { %v1722_v57 = vld [vmem:[#allocation3 + $0x8] sm:$0xfe]  ;;  %1691 = vst.msk [vmem:[#allocation3 + $0x40] sm:$0xff] %vm1683_vm15, %v1671_v56  ;;  %v1673_v60 = vpop.permute.xlu1 %1672  ;;  %v1742_v1 = vrot.slane %v1721_v58, 1  ;;  %v1719_v54 = vld [vmem:[%s6579_s2 + $0x80] sm:$0xff] }
 0x629   :  { %1692 = vst.msk [vmem:[#allocation3 + $0x48] sm:$0xff] %vm1635_vm8, %v1671_v56  ;;  %v1745_v62 = vrot.slane %v1722_v57, 1  ;;  %v5513_v63 = vld [vmem:[#allocation3 + $0x10] sm:$0xff]  ;;  %v1696_v39 = vld [vmem:[#allocation3 + $0x8] sm:$0xff]  ;;  %v4576_v56 = vpack.c.bf16 %v1720_v55, %v1719_v54  ;;  %v3504_v57 = vld [vmem:[%s6579_s2 + $0x120] sm:$0xff] }
 0x62a   :  { %v5511_v61 = vld [vmem:[#allocation3 + $0x18] sm:$0xff]  ;;  %1693 = vst.msk [vmem:[#allocation3 + $0x50] sm:$0x1] %vm1686_vm0, %v1673_v60  ;;  %v1743_v3 = vrot.slane %v5513_v63, 1  ;;  %v3505_v58 = vld [vmem:[%s6579_s2 + $0x128] sm:$0xff] }
 0x62b   :  { %1694 = vst.msk [vmem:[#allocation3 + $0x58] sm:$0x1] %vm1637_vm10, %v1673_v60  ;;  %v1746_v2 = vrot.slane %v5511_v61, 1  ;;  %v1723_v10 = vld [vmem:[#allocation3 + $0x20] sm:$0x1]  ;;  %v4579_v59 = vpack.c.bf16 %v3505_v58, %v3504_v57  ;;  %v3506_v60 = vld [vmem:[%s6579_s2 + $0x130] sm:$0xff] }
 0x62c   :  { %v1744_v8 = vsel %vm1741_vm1, %v1742_v1, %v1743_v3  ;;  %v1724_v9 = vld [vmem:[#allocation3 + $0x28] sm:$0x1]  ;;  %v1748_v13 = vrot.slane %v1723_v10, 1  ;;  %v1695_v1 = vld [vmem:[#allocation3] sm:$0xff]  ;;  %v3511_v10 = vld [vmem:[%s6579_s2 + $0x158] sm:$0xff] }
 0x62d   :  { %v1747_v7 = vsel %vm1741_vm1, %v1745_v62, %v1746_v2  ;;  %v1750_v12 = vrot.slane %v1724_v9, 1  ;;  %v1725_v21 = vld [vmem:[#allocation3 + $0x30] sm:$0xfe]  ;;  %v3507_v62 = vld [vmem:[%s6579_s2 + $0x138] sm:$0xff]  ;;  %v1977_v4 = vld [vmem:[#allocation3 + $0x28] sm:$0x3] }
 0x62e   :  { %3496 = vmatprep.mubr.msk.f32.mxu1 %vm1785_vm2, %v1747_v7  ;;  %v1726_v14 = vld [vmem:[#allocation3 + $0x38] sm:$0xfe]  ;;  %v1749_v22 = vsel %vm1741_vm1, %v1743_v3, %v1748_v13  ;;  %v1752_v30 = vrot.slane %v1725_v21, 1  ;;  %v3508_v3 = vld [vmem:[%s6579_s2 + $0x140] sm:$0xff]  ;;  %v3510_v9 = vld [vmem:[%s6579_s2 + $0x150] sm:$0xff]  ;;  %v1995_v13 = vrot.slane %v5511_v61, 2 }
 0x62f   :  { %1859 = vmatmul.mubr.f32.vlgmr.msra.gmra.mrb[0].mxu1 %v1744_v8  ;;  %v1751_v15 = vsel %vm1741_vm1, %v1746_v2, %v1750_v12  ;;  %v5539_v20 = vld [vmem:[#allocation3 + $0x40] sm:$0xff]  ;;  %v1755_v23 = vrot.slane %v1726_v14, 1  ;;  %v4582_v2 = vpack.c.bf16 %v3507_v62, %v3506_v60  ;;  %v1700_v6 = vld [vmem:[#allocation3 + $0x38] sm:$0xff]  ;;  %v1975_v8 = vld [vmem:[#allocation3 + $0x8] sm:$0xfc]  ;;  %v4588_v14 = vpack.c.bf16 %v3511_v10, %v3510_v9 }
 0x630   :  { %4553 = vmatpush1.bf16.msra.mxu1 %v4552_v5  ;;  %3497 = vmatprep.mubr.msk.f32.mxu1 %vm1785_vm2, %v1751_v15  ;;  %v5537_v19 = vld [vmem:[#allocation3 + $0x48] sm:$0xff]  ;;  %v1753_v25 = vrot.slane %v5539_v20, 1  ;;  %v1699_v11 = vld [vmem:[#allocation3 + $0x30] sm:$0xff]  ;;  %v1994_v12 = vrot.slane %v1975_v8, 2  ;;  %v3512_v15 = vld [vmem:[%s6579_s2 + $0x160] sm:$0xff] }
 0x631   :  { %4554 = vmatprep.subr.bf16.mxu1 %v4949_v0  ;;  %v1756_v24 = vrot.slane %v5537_v19, 1  ;;  %v1727_v28 = vld [vmem:[#allocation3 + $0x50] sm:$0x1]  ;;  %v3509_v5 = vld [vmem:[%s6579_s2 + $0x148] sm:$0xff]  ;;  %v3515_v21 = vld [vmem:[%s6579_s2 + $0x178] sm:$0xff] }
 0x632   :  { %v1728_v26 = vld [vmem:[#allocation3 + $0x58] sm:$0x1]  ;;  %v1754_v36 = vsel %vm1741_vm1, %v1752_v30, %v1753_v25  ;;  %v1758_v37 = vrot.slane %v1727_v28, 1  ;;  %v4585_v7 = vpack.c.bf16 %v3509_v5, %v3508_v3  ;;  %v3521_v30 = vld [vmem:[%s6579_s2 + $0x1a8] sm:$0xff] }
 0x633   :  { %1864 = vmatmul.mubr.f32.gmra.mrb[2].mxu1 %v1749_v22  ;;  %v1760_v27 = vrot.slane %v1728_v26, 1  ;;  %v1757_v29 = vsel %vm1741_vm1, %v1755_v23, %v1756_v24  ;;  %v4594_v22 = vpack.c.bf16 %v3515_v21, %v3514_v18  ;;  %v3516_v23 = vld [vmem:[%s6579_s2 + $0x180] sm:$0xff]  ;;  %v3518_v26 = vld [vmem:[%s6579_s2 + $0x190] sm:$0xff]  ;;  %v1981_v47 = vld [vmem:[#allocation3 + $0x58] sm:$0x3] }
 0x634   :  { %4556 = vmatpush1.bf16.msra.mxu1 %v4555_v16  ;;  %3498 = vmatprep.mubr.msk.f32.mxu1 %vm1785_vm2, %v1757_v29  ;;  %v1759_v38 = vsel %vm1741_vm1, %v1753_v25, %v1758_v37  ;;  %v3513_v16 = vld [vmem:[%s6579_s2 + $0x168] sm:$0xff]  ;;  %v3520_v29 = vld [vmem:[%s6579_s2 + $0x1a0] sm:$0xff]  ;;  %v1992_v37 = vrot.slane %v5513_v63, 2  ;;  %v2009_v49 = vrot.slane %v1981_v47, 2 }
 0x635   :  { %4557 = vmatprep.subr.bf16.mxu1 %v4949_v0  ;;  %v1761_v42 = vsel %vm1741_vm1, %v1756_v24, %v1760_v27  ;;  %v4591_v17 = vpack.c.bf16 %v3513_v16, %v3512_v15  ;;  %v3517_v24 = vld [vmem:[%s6579_s2 + $0x188] sm:$0xff]  ;;  %v3519_v27 = vld [vmem:[%s6579_s2 + $0x198] sm:$0xff]  ;;  %v4603_v35 = vpack.c.bf16 %v3521_v30, %v3520_v29  ;;  %v3526_v21 = vld [vmem:[%s6583_s6] ss:$0 sm:$0xff] }
 0x636   :  { %v4597_v25 = vpack.c.bf16 %v3517_v24, %v3516_v23  ;;  %v4600_v28 = vpack.c.bf16 %v3519_v27, %v3518_v26 }
 0x637   :  { %1869 = vmatmul.mubr.f32.gmra.mrb[4].mxu1 %v1754_v36 }
 0x638   :  { %4559 = vmatpush1.bf16.msra.mxu1 %v4558_v33  ;;  %3499 = vmatprep.mubr.msk.f32.mxu1 %vm1785_vm2, %v1761_v42  ;;  %v1974_v33 = vld [vmem:[#allocation3] sm:$0xfc]  ;;  %v1999_v42 = vrot.slane %v1977_v4, 2 }
 0x639   :  { %4560 = vmatprep.subr.bf16.mxu1 %v4949_v0  ;;  %v1991_v36 = vrot.slane %v1974_v33, 2 }
 0x63b   :  { %1874 = vmatmul.mubr.f32.gmra.mrb[6].mxu1 %v1759_v38  ;;  %v1993_v44 = vsel %vm1990_vm3, %v1991_v36, %v1992_v37  ;;  %v1979_v38 = vld [vmem:[#allocation3 + $0x38] sm:$0xfc] }
 0x63c   :  { %4562 = vmatpush1.bf16.msra.mxu1 %v4561_v43  ;;  %3500 = vmatprep.mubr.msk.f32.mxu1 %vm1785_vm2, %v1696_v39  ;;  %v1976_v43 = vld [vmem:[#allocation3 + $0x20] sm:$0x3]  ;;  %v2000_v39 = vsel %vm1990_vm3, %v1995_v13, %v1999_v42  ;;  %v2004_v40 = vrot.slane %v1979_v38, 2 }
 0x63d   :  { %4563 = vmatprep.subr.bf16.mxu1 %v4949_v0  ;;  %v1997_v45 = vrot.slane %v1976_v43, 2 }
 0x640   :  { %4565 = vmatpush1.bf16.msra.mxu1 %v4564_v46  ;;  %v2005_v46 = vrot.slane %v5537_v19, 2 }
 0x641   :  { %4566 = vmatprep.subr.bf16.mxu1 %v4949_v0 }
 0x642   :  { %v2006_v48 = vsel %vm1990_vm3, %v2004_v40, %v2005_v46 }
 0x644   :  { %4568 = vmatpush1.bf16.msra.mxu1 %v4567_v41  ;;  %v1998_v41 = vsel %vm1990_vm3, %v1992_v37, %v1997_v45 }
 0x645   :  { %4569 = vmatprep.subr.bf16.mxu1 %v4949_v0 }
 0x648   :  { %4571 = vmatpush1.bf16.msra.mxu1 %v4570_v50  ;;  %v1980_v50 = vld [vmem:[#allocation3 + $0x50] sm:$0x3] }
 0x649   :  { %4572 = vmatprep.subr.bf16.mxu1 %v4949_v0 }
 0x64c   :  { %4574 = vmatpush1.bf16.msra.mxu1 %v4573_v53  ;;  %v2010_v53 = vsel %vm1990_vm3, %v2005_v46, %v2009_v49 }
 0x64d   :  { %4575 = vmatprep.subr.bf16.mxu1 %v4949_v0 }
 0x650   :  { %4577 = vmatpush1.bf16.msra.mxu1 %v4576_v56 }
 0x651   :  { %4578 = vmatprep.subr.bf16.mxu1 %v4949_v0 }
 0x653   :  { %1954 = vmatmul.mubr.f32.vlgmr.msra.gmra.mrb[8].mxu1 %v1695_v1 }
 0x654   :  { %3501 = vmatprep.mubr.msk.f32.mxu1 %vm1785_vm2, %v5511_v61  ;;  %4580 = vmatpush1.bf16.msra.mxu1 %v4579_v59  ;;  %v1996_v61 = vsel %vm1990_vm3, %v1994_v12, %v1995_v13 }
 0x655   :  { %4581 = vmatprep.subr.bf16.mxu1 %v4949_v0 }
 0x657   :  { %1959 = vmatmul.mubr.f32.gmra.mrb[10].mxu1 %v5513_v63  ;;  %v2002_v63 = vrot.slane %v5539_v20, 2 }
 0x658   :  { %3502 = vmatprep.mubr.msk.f32.mxu1 %vm1785_vm2, %v1700_v6  ;;  %4583 = vmatpush1.bf16.msra.mxu1 %v4582_v2 }
 0x659   :  { %4584 = vmatprep.subr.bf16.mxu1 %v4949_v0 }
 0x65b   :  { %1964 = vmatmul.mubr.f32.gmra.mrb[12].mxu1 %v1699_v11 }
 0x65c   :  { %3503 = vmatprep.mubr.msk.f32.mxu1 %vm1785_vm2, %v5537_v19  ;;  %4586 = vmatpush1.bf16.msra.mxu1 %v4585_v7  ;;  %v2007_v19 = vrot.slane %v1980_v50, 2 }
 0x65d   :  { %4587 = vmatprep.subr.bf16.mxu1 %v4949_v0 }
 0x65e   :  { %v2008_v54 = vsel %vm1990_vm3, %v2002_v63, %v2007_v19 }
 0x65f   :  { %1969 = vmatmul.mubr.f32.gmra.mrb[14].mxu1 %v5539_v20 }
 0x660   :  { %4589 = vmatpush1.bf16.msra.mxu1 %v4588_v14  ;;  %3522 = vmatprep.mubr.msk.f32.mxu1 %vm1785_vm2, %v1996_v61 }
 0x661   :  { %4590 = vmatprep.subr.bf16.mxu1 %v4949_v0 }
 0x664   :  { %4592 = vmatpush1.bf16.msra.mxu1 %v4591_v17 }
 0x665   :  { %4593 = vmatprep.subr.bf16.mxu1 %v4949_v0 }
 0x668   :  { %4595 = vmatpush1.bf16.msra.mxu1 %v4594_v22 }
 0x669   :  { %4596 = vmatprep.subr.bf16.mxu1 %v4949_v0 }
 0x66c   :  { %4598 = vmatpush1.bf16.msra.mxu1 %v4597_v25 }
 0x66d   :  { %4599 = vmatprep.subr.bf16.mxu1 %v4949_v0 }
 0x670   :  { %4601 = vmatpush1.bf16.msra.mxu1 %v4600_v28 }
 0x671   :  { %4602 = vmatprep.subr.bf16.mxu1 %v4949_v0  ;;  %v1978_v0 = vld [vmem:[#allocation3 + $0x30] sm:$0xfc] }
 0x672   :  { %v2001_v51 = vrot.slane %v1978_v0, 2 }
 0x674   :  { %4604 = vmatpush1.bf16.msra.mxu1 %v4603_v35  ;;  %v2003_v52 = vsel %vm1990_vm3, %v2001_v51, %v2002_v63 }
 0x677   :  { %2107 = vmatmul.mubr.f32.vlgmr.msra.gmra.mrb[16].mxu1 %v1993_v44 }
 0x678   :  { %3523 = vmatprep.mubr.msk.f32.mxu1 %vm1785_vm2, %v2000_v39 }
 0x67b   :  { %2112 = vmatmul.mubr.f32.gmra.mrb[18].mxu1 %v1998_v41 }
 0x67c   :  { %3524 = vmatprep.mubr.msk.f32.mxu1 %vm1785_vm2, %v2006_v48 }
 0x67f   :  { %2117 = vmatmul.mubr.f32.gmra.mrb[20].mxu1 %v2003_v52 }
 0x680   :  { %3525 = vmatprep.mubr.msk.f32.mxu1 %vm1785_vm2, %v2010_v53 }
 0x683   :  { %2122 = vmatmul.mubr.f32.gmra.mrb[22].mxu1 %v2008_v54 }
 0x702   :  { %v1860_v20 = vpop.f32.mrb[0].mxu1 }
 0x703   :  { %v1862_v55 = vpop.f32.mrb[1].mxu1 }
 0x706   :  { %v1865_v56 = vpop.f32.mrb[2].mxu1 }
 0x707   :  { %v1867_v57 = vpop.f32.mrb[3].mxu1 }
 0x70a   :  { %v1870_v58 = vpop.f32.mrb[4].mxu1 }
 0x70b   :  { %v1872_v59 = vpop.f32.mrb[5].mxu1 }
 0x70e   :  { %v1875_v60 = vpop.f32.mrb[6].mxu1 }
 0x70f   :  { %v1877_v62 = vpop.f32.mrb[7].mxu1 }
 0x726   :  { %v1955_v1 = vpop.f32.mrb[8].mxu1 }
 0x727   :  { %v1956_v2 = vadd.f32 %v1955_v1, %v1860_v20  ;;  %v1957_v3 = vpop.f32.mrb[9].mxu1 }
 0x72a   :  { %v1960_v5 = vpop.f32.mrb[10].mxu1 }
 0x72b   :  { %v1961_v6 = vadd.f32 %v1960_v5, %v1865_v56  ;;  %v1962_v7 = vpop.f32.mrb[11].mxu1 }
 0x72e   :  { %v1965_v8 = vpop.f32.mrb[12].mxu1 }
 0x72f   :  { %v1966_v9 = vadd.f32 %v1965_v8, %v1870_v58  ;;  %v1967_v10 = vpop.f32.mrb[13].mxu1 }
 0x732   :  { %v1970_v11 = vpop.f32.mrb[14].mxu1 }
 0x733   :  { %v1971_v12 = vadd.f32 %v1970_v11, %v1875_v60  ;;  %v1972_v13 = vpop.f32.mrb[15].mxu1 }
 0x734   :  { %v2243_v13 = vand.u32 127, %v1563_v31  ;;  %v4950_v31 = vmov 1.0|1.0  }
 0x74a   :  { %v2108_v14 = vpop.f32.mrb[16].mxu1 }
 0x74b   :  { %v2127_v15 = vadd.f32 %v2108_v14, %v1956_v2  ;;  %v2110_v16 = vpop.f32.mrb[17].mxu1  ;;  %v5711_v14 = vadd.s32 16, %v5367_v32 }
 0x74c   :  { %v5716_v16 = vmul.u32 8, %v2243_v13 }
 0x74d   :  { %v2138_v24 = vadd.f32 %v3526_v21, %v2127_v15  ;;  %v5714_v15 = vadd.s32 24, %v5367_v32 }
 0x74e   :  { %v2113_v61 = vpop.f32.mrb[18].mxu1  ;;  %vm2245_vm4 = vcmp.eq.s32.totalorder %v5367_v32, %v5716_v16  ;;  %vm2247_vm6 = vcmp.eq.s32.totalorder %v5711_v14, %v5716_v16 }
 0x74f   :  { %v2128_v17 = vadd.f32 %v2113_v61, %v1961_v6  ;;  %v2115_v18 = vpop.f32.mrb[19].mxu1  ;;  %v2142_v30 = vmax.f32 %v2138_v24, 0.0  ;;  %v5723_v61 = vadd.s32 1, %v5716_v16  ;;  %vm2248_vm8 = vcmp.eq.s32.totalorder %v5714_v15, %v5716_v16 }
 0x750   :  { %vm4609_vm11 = vmpackc.low %vm2248_vm8, %vm2247_vm6  ;;  %v5765_v24 = vadd.s32 56, %v5367_v32 }
 0x751   :  { %v2139_v22 = vadd.f32 %v3526_v21, %v2128_v17  ;;  %vm2383_vm9 = vcmp.eq.s32.totalorder %v5367_v32, %v5723_v61  ;;  %vm2385_vm12 = vcmp.eq.s32.totalorder %v5711_v14, %v5723_v61  ;;  %vm2386_vm13 = vcmp.eq.s32.totalorder %v5714_v15, %v5723_v61 }
 0x752   :  { %v2118_v23 = vpop.f32.mrb[20].mxu1  ;;  %vm4641_vm15 = vmpackc.low %vm2386_vm13, %vm2385_vm12  ;;  %vm2252_vm8 = vcmp.eq.s32.totalorder %v5765_v24, %v5716_v16 }
 0x753   :  { %v2129_v25 = vadd.f32 %v2118_v23, %v1966_v9  ;;  %v2120_v26 = vpop.f32.mrb[21].mxu1  ;;  %v2143_v27 = vmax.f32 %v2139_v22, 0.0  ;;  %v5750_v22 = vadd.s32 40, %v5367_v32  ;;  %v5762_v23 = vadd.s32 48, %v5367_v32 }
 0x754   :  { %v5783_v26 = vadd.s32 72, %v5367_v32 }
 0x755   :  { %v2140_v28 = vadd.f32 %v3526_v21, %v2129_v25  ;;  %v2148_v36 = vadd.f32 %v2143_v27, %v2142_v30  ;;  %vm2250_vm1 = vcmp.eq.s32.totalorder %v5750_v22, %v5716_v16  ;;  %v5780_v25 = vadd.s32 64, %v5367_v32 }
 0x756   :  { %v2123_v29 = vpop.f32.mrb[22].mxu1 }
 0x757   :  { %v2144_v33 = vmax.f32 %v2140_v28, 0.0  ;;  %v2130_v35 = vadd.f32 %v2123_v29, %v1971_v12  ;;  %v2125_v4 = vpop.f32.mrb[23].mxu1  ;;  %v5707_v12 = vadd.s32 8, %v5367_v32  ;;  %vm2253_vm13 = vcmp.eq.s32.totalorder %v5780_v25, %v5716_v16 }
 0x758   :  { %v5799_v29 = vadd.s32 80, %v5367_v32  ;;  %v5835_v4 = vadd.s32 112, %v5367_v32 }
 0x759   :  { %v2141_v37 = vadd.f32 %v3526_v21, %v2130_v35  ;;  %v2149_v42 = vadd.f32 %v2148_v36, %v2144_v33  ;;  %vm2246_vm5 = vcmp.eq.s32.totalorder %v5707_v12, %v5716_v16  ;;  %vm2384_vm10 = vcmp.eq.s32.totalorder %v5707_v12, %v5723_v61 }
 0x75a   :  { %vm4605_vm7 = vmpackc.low %vm2246_vm5, %vm2245_vm4  ;;  %v5747_v21 = vadd.s32 32, %v5367_v32  ;;  %vm2388_vm4 = vcmp.eq.s32.totalorder %v5750_v22, %v5723_v61  ;;  %v5820_v35 = vadd.s32 104, %v5367_v32  ;;  %v5838_v36 = vadd.s32 120, %v5367_v32 }
 0x75b   :  { %v2145_v43 = vmax.f32 %v2141_v37, 0.0  ;;  %4606 = vmatprep.subr.msk.bf16.mxu0 %vm4605_vm7, %v4950_v31  ;;  %vm4637_vm14 = vmpackc.low %vm2384_vm10, %vm2383_vm9  ;;  %vm2389_vm9 = vcmp.eq.s32.totalorder %v5762_v23, %v5723_v61  ;;  %vm2390_vm10 = vcmp.eq.s32.totalorder %v5765_v24, %v5723_v61  ;;  %v5853_v37 = vadd.s32 2, %v5716_v16 }
 0x75c   :  { %4608 = vmatpush3.bf16.msk.msra.mxu0 %vm4605_vm7, %v4950_v31  ;;  %4638 = vmatprep.subr.msk.bf16.mxu1 %vm4637_vm14, %v4950_v31  ;;  %vm2249_vm0 = vcmp.eq.s32.totalorder %v5747_v21, %v5716_v16  ;;  %vm2387_vm3 = vcmp.eq.s32.totalorder %v5747_v21, %v5723_v61  ;;  %vm2251_vm7 = vcmp.eq.s32.totalorder %v5762_v23, %v5716_v16  ;;  %vm4649_vm12 = vmpackc.low %vm2390_vm10, %vm2389_vm9 }
 0x75d   :  { %v2150_v44 = vadd.f32 %v2149_v42, %v2145_v43  ;;  %4610 = vmatprep.subr.msk.bf16.mxu0 %vm4609_vm11, %v4950_v31  ;;  %4640 = vmatpush3.bf16.msk.msra.mxu1 %vm4637_vm14, %v4950_v31  ;;  %vm4613_vm5 = vmpackc.low %vm2250_vm1, %vm2249_vm0  ;;  %vm2254_vm14 = vcmp.eq.s32.totalorder %v5783_v26, %v5716_v16  ;;  %vm2392_vm1 = vcmp.eq.s32.totalorder %v5783_v26, %v5723_v61  ;;  %v5856_v42 = vadd.s32 3, %v5716_v16 }
 0x75e   :  { %4642 = vmatprep.subr.msk.bf16.mxu1 %vm4641_vm15, %v4950_v31  ;;  %vm4645_vm6 = vmpackc.low %vm2388_vm4, %vm2387_vm3  ;;  %vm2255_vm4 = vcmp.eq.s32.totalorder %v5799_v29, %v5716_v16 }
 0x75f   :  { %v2151_v45 = vrot.slane %v2150_v44, 4  ;;  %vm4621_vm0 = vmpackc.low %vm2254_vm14, %vm2253_vm13  ;;  %vm2396_vm13 = vcmp.eq.s32.totalorder %v5820_v35, %v5723_v61 }
 0x760   :  { %4612 = vmatpush3.bf16.msk.msra.mxu0 %vm4609_vm11, %v4950_v31  ;;  %vm4617_vm11 = vmpackc.low %vm2252_vm8, %vm2251_vm7 }
 0x761   :  { %v2152_v38 = vadd.f32 %v2151_v45, %v2150_v44  ;;  %4644 = vmatpush3.bf16.msk.msra.mxu1 %vm4641_vm15, %v4950_v31  ;;  %4614 = vmatprep.subr.msk.bf16.mxu0 %vm4613_vm5, %v4950_v31  ;;  %vm2391_vm15 = vcmp.eq.s32.totalorder %v5780_v25, %v5723_v61  ;;  %v6295_v44 = vadd.s32 6, %v5716_v16 }
 0x762   :  { %4646 = vmatprep.subr.msk.bf16.mxu1 %vm4645_vm6, %v4950_v31  ;;  %vm4653_vm3 = vmpackc.low %vm2392_vm1, %vm2391_vm15  ;;  %vm2260_vm1 = vcmp.eq.s32.totalorder %v5838_v36, %v5716_v16 }
 0x763   :  { %v2153_v39 = vrot.slane %v2152_v38, 2 }
 0x764   :  { %4616 = vmatpush3.bf16.msk.msra.mxu0 %vm4613_vm5, %v4950_v31 }
 0x765   :  { %v2154_v46 = vadd.f32 %v2153_v39, %v2152_v38  ;;  %4648 = vmatpush3.bf16.msk.msra.mxu1 %vm4645_vm6, %v4950_v31  ;;  %4618 = vmatprep.subr.msk.bf16.mxu0 %vm4617_vm11, %v4950_v31  ;;  %vm2393_vm6 = vcmp.eq.s32.totalorder %v5799_v29, %v5723_v61 }
 0x766   :  { %4650 = vmatprep.subr.msk.bf16.mxu1 %vm4649_vm12, %v4950_v31 }
 0x767   :  { %v2155_v47 = vrot.slane %v2154_v46, 1 }
 0x768   :  { %4620 = vmatpush3.bf16.msk.msra.mxu0 %vm4617_vm11, %v4950_v31  ;;  %vm2258_vm11 = vcmp.eq.s32.totalorder %v5820_v35, %v5716_v16 }
 0x769   :  { %v2156_v40 = vadd.f32 %v2155_v47, %v2154_v46  ;;  %4652 = vmatpush3.bf16.msk.msra.mxu1 %vm4649_vm12, %v4950_v31  ;;  %4622 = vmatprep.subr.msk.bf16.mxu0 %vm4621_vm0, %v4950_v31  ;;  %v2146_v47 = vld [vmem:[%s6584_s7] sm:$0x1]  ;;  %s4951_s7 = smov [#allocation4]  }
 0x76a   :  { %4654 = vmatprep.subr.msk.bf16.mxu1 %vm4653_vm3, %v4950_v31 }
 0x76b   :  { %2157 = vrot.lane.b32.xlu0 %v2156_v40, %s4945_s3 }
 0x76c   :  { %4624 = vmatpush3.bf16.msk.msra.mxu0 %vm4621_vm0, %v4950_v31  ;;  %vm2259_vm0 = vcmp.eq.s32.totalorder %v5835_v4, %v5716_v16 }
 0x76d   :  { %4656 = vmatpush3.bf16.msk.msra.mxu1 %vm4653_vm3, %v4950_v31  ;;  %vm2397_vm3 = vcmp.eq.s32.totalorder %v5835_v4, %v5723_v61 }
 0x7dd   :  { %v2158_v0 = vpop.permute.xlu0 %2157 }
 0x7de   :  { %v2159_v41 = vadd.f32 %v2158_v0, %v2156_v40 }
 0x7e0   :  { %2160 = vrot.lane.b32.xlu1 %v2159_v41, %s4946_s29 }
 0x852   :  { %v2161_v63 = vpop.permute.xlu1 %2160 }
 0x853   :  { %v2162_v48 = vadd.f32 %v2161_v63, %v2159_v41  ;;  %v3527_v63 = vld [vmem:[%s6585_s8] ss:$0 sm:$0xff]  ;;  %s3360_s8 = sshll.u32 %s4951_s7, 4  ;;  %s3361_s8 = int_to_ptr.vmem [resolvable:$true] %s3360_s8 }
 0x854   :  { %s4919_s15 = scalar_lea.vmem %s3361_s8, 4096  ;;  %p4924_p1 = scmp.lt.s32.totalorder %s3361_s8, %s3361_s8 }
 0x855   :  { %2163 = vrot.lane.b32.xlu0 %v2162_v48, %s4947_s30  ;;  %p4920_p0 = scmp.ne.s32.totalorder %s3361_s8, %s4919_s15  ;;  %p4925_p2 = scmp.lt.s32.totalorder %s4919_s15, %s4919_s15 }
 0x857   :  { %p4926_p3 = por %p4925_p2, %p4924_p1 }
 0x859   :  { %p4927_p4 = pnand %p4926_p3, %p4920_p0 }
 0x8c7   :  { %v2164_v49 = vpop.permute.xlu0 %2163 }
 0x8c8   :  { %v2165_v50 = vadd.f32 %v2164_v49, %v2162_v48 }
 0x8ca   :  { %2166 = vrot.lane.b32.xlu1 %v2165_v50, %s4948_s10 }
 0x93c   :  { %v2167_v51 = vpop.permute.xlu1 %2166 }
 0x93d   :  { %v2168_v52 = vadd.f32 %v2167_v51, %v2165_v50 }
 0x93f   :  { %v2169_v19 = vmul.f32 0.001953125, %v2168_v52 }
 0x941   :  { %v2173_v53 = vrot.slane %v2169_v19, %v5370_v34 }
 0x943   :  { %v5688_v54 = vsub.f32 %v2142_v30, %v2173_v53  ;;  %v5690_v20 = vsub.f32 %v2143_v27, %v2173_v53  ;;  %v5692_v55 = vsub.f32 %v2144_v33, %v2173_v53  ;;  %v5694_v56 = vsub.f32 %v2145_v43, %v2173_v53 }
 0x944   :  { %v5802_v30 = vadd.s32 88, %v5367_v32  ;;  %v5817_v33 = vadd.s32 96, %v5367_v32 }
 0x945   :  { %v2178_v57 = vmul.f32 %v5688_v54, %v5688_v54  ;;  %v2179_v58 = vmul.f32 %v5690_v20, %v5690_v20  ;;  %v2180_v59 = vmul.f32 %v5692_v55, %v5692_v55  ;;  %v2181_v62 = vmul.f32 %v5694_v56, %v5694_v56 }
 0x946   :  { %vm2256_vm5 = vcmp.eq.s32.totalorder %v5802_v30, %v5716_v16  ;;  %vm2394_vm7 = vcmp.eq.s32.totalorder %v5802_v30, %v5723_v61  ;;  %vm2257_vm10 = vcmp.eq.s32.totalorder %v5817_v33, %v5716_v16  ;;  %vm2395_vm12 = vcmp.eq.s32.totalorder %v5817_v33, %v5723_v61 }
 0x947   :  { %v2182_v60 = vadd.f32 %v2179_v58, %v2178_v57  ;;  %vm4625_vm8 = vmpackc.low %vm2256_vm5, %vm2255_vm4  ;;  %vm2398_vm4 = vcmp.eq.s32.totalorder %v5838_v36, %v5723_v61 }
 0x948   :  { %4626 = vmatprep.subr.msk.bf16.mxu0 %vm4625_vm8, %v4950_v31  ;;  %vm4657_vm9 = vmpackc.low %vm2394_vm7, %vm2393_vm6  ;;  %vm2522_vm7 = vcmp.eq.s32.totalorder %v5367_v32, %v5853_v37 }
 0x949   :  { %v2183_v1 = vadd.f32 %v2182_v60, %v2180_v59  ;;  %4658 = vmatprep.subr.msk.bf16.mxu1 %vm4657_vm9, %v4950_v31  ;;  %4628 = vmatpush3.bf16.msk.msra.mxu0 %vm4625_vm8, %v4950_v31  ;;  %vm4629_vm14 = vmpackc.low %vm2258_vm11, %vm2257_vm10  ;;  %vm2523_vm8 = vcmp.eq.s32.totalorder %v5707_v12, %v5853_v37  ;;  %vm2662_vm10 = vcmp.eq.s32.totalorder %v5707_v12, %v5856_v42 }
 0x94a   :  { %4660 = vmatpush3.bf16.msk.msra.mxu1 %vm4657_vm9, %v4950_v31  ;;  %4630 = vmatprep.subr.msk.bf16.mxu0 %vm4629_vm14, %v4950_v31  ;;  %vm4661_vm15 = vmpackc.low %vm2396_vm13, %vm2395_vm12  ;;  %vm2661_vm9 = vcmp.eq.s32.totalorder %v5367_v32, %v5856_v42  ;;  %vm2524_vm13 = vcmp.eq.s32.totalorder %v5711_v14, %v5853_v37 }
 0x94b   :  { %v2184_v2 = vadd.f32 %v2183_v1, %v2181_v62  ;;  %4662 = vmatprep.subr.msk.bf16.mxu1 %vm4661_vm15, %v4950_v31  ;;  %vm4633_vm5 = vmpackc.low %vm2260_vm1, %vm2259_vm0  ;;  %vm2664_vm0 = vcmp.eq.s32.totalorder %v5714_v15, %v5856_v42 }
 0x94c   :  { %vm4665_vm6 = vmpackc.low %vm2398_vm4, %vm2397_vm3  ;;  %vm2526_vm4 = vcmp.eq.s32.totalorder %v5747_v21, %v5853_v37 }
 0x94d   :  { %v2185_v3 = vrot.slane %v2184_v2, 4  ;;  %4632 = vmatpush3.bf16.msk.msra.mxu0 %vm4629_vm14, %v4950_v31  ;;  %vm5869_vm11 = vmpackc.low %vm2523_vm8, %vm2522_vm7  ;;  %vm2525_vm14 = vcmp.eq.s32.totalorder %v5714_v15, %v5853_v37  ;;  %vm2666_vm7 = vcmp.eq.s32.totalorder %v5750_v22, %v5856_v42 }
 0x94e   :  { %4664 = vmatpush3.bf16.msk.msra.mxu1 %vm4661_vm15, %v4950_v31  ;;  %4634 = vmatprep.subr.msk.bf16.mxu0 %vm4633_vm5, %v4950_v31  ;;  %vm5876_vm12 = vmpackc.low %vm2662_vm10, %vm2661_vm9  ;;  %vm2663_vm15 = vcmp.eq.s32.totalorder %v5711_v14, %v5856_v42  ;;  %vm2528_vm9 = vcmp.eq.s32.totalorder %v5762_v23, %v5853_v37  ;;  %vm2529_vm10 = vcmp.eq.s32.totalorder %v5765_v24, %v5853_v37 }
 0x94f   :  { %v2186_v5 = vadd.f32 %v2185_v3, %v2184_v2  ;;  %4666 = vmatprep.subr.msk.bf16.mxu1 %vm4665_vm6, %v4950_v31  ;;  %vm5908_vm1 = vmpackc.low %vm2525_vm14, %vm2524_vm13  ;;  %vm2668_vm13 = vcmp.eq.s32.totalorder %v5765_v24, %v5856_v42 }
 0x950   :  { %vm5916_vm3 = vmpackc.low %vm2664_vm0, %vm2663_vm15  ;;  %vm2530_vm0 = vcmp.eq.s32.totalorder %v5780_v25, %v5853_v37 }
 0x951   :  { %v2187_v6 = vrot.slane %v2186_v5, 2  ;;  %4636 = vmatpush3.bf16.msk.msra.mxu0 %vm4633_vm5, %v4950_v31  ;;  %vm2527_vm5 = vcmp.eq.s32.totalorder %v5750_v22, %v5853_v37  ;;  %vm5970_vm14 = vmpackc.low %vm2529_vm10, %vm2528_vm9  ;;  %vm2671_vm9 = vcmp.eq.s32.totalorder %v5799_v29, %v5856_v42  ;;  %vm2672_vm10 = vcmp.eq.s32.totalorder %v5802_v30, %v5856_v42 }
 0x952   :  { %4668 = vmatpush3.bf16.msk.msra.mxu1 %vm4665_vm6, %v4950_v31  ;;  %4670 = vmatprep.subr.msk.bf16.mxu0 %vm5869_vm11, %v4950_v31  ;;  %vm2665_vm6 = vcmp.eq.s32.totalorder %v5747_v21, %v5856_v42  ;;  %vm5944_vm8 = vmpackc.low %vm2527_vm5, %vm2526_vm4  ;;  %vm2670_vm4 = vcmp.eq.s32.totalorder %v5783_v26, %v5856_v42 }
 0x953   :  { %v2188_v7 = vadd.f32 %v2187_v6, %v2186_v5  ;;  %4702 = vmatprep.subr.msk.bf16.mxu1 %vm5876_vm12, %v4950_v31  ;;  %v6073_v5 = vadd.s32 4, %v5716_v16  ;;  %v6080_v6 = vadd.s32 5, %v5716_v16 }
 0x955   :  { %v2189_v8 = vrot.slane %v2188_v7, 1 }
 0x957   :  { %v2190_v9 = vadd.f32 %v2189_v8, %v2188_v7 }
 0x959   :  { %2191 = vrot.lane.b32.xlu0 %v2190_v9, %s4945_s3 }
 0x9cb   :  { %v2192_v10 = vpop.permute.xlu0 %2191 }
 0x9cc   :  { %v2193_v11 = vadd.f32 %v2192_v10, %v2190_v9 }
 0x9ce   :  { %2194 = vrot.lane.b32.xlu1 %v2193_v11, %s4946_s29 }
 0xa40   :  { %v2195_v17 = vpop.permute.xlu1 %2194 }
 0xa41   :  { %v2196_v18 = vadd.f32 %v2195_v17, %v2193_v11 }
 0xa43   :  { %2197 = vrot.lane.b32.xlu0 %v2196_v18, %s4947_s30 }
 0xab5   :  { %v2198_v27 = vpop.permute.xlu0 %2197 }
 0xab6   :  { %v2199_v28 = vadd.f32 %v2198_v27, %v2196_v18 }
 0xab8   :  { %2200 = vrot.lane.b32.xlu1 %v2199_v28, %s4948_s10 }
 0xb2a   :  { %v2201_v45 = vpop.permute.xlu1 %2200 }
 0xb2b   :  { %v2202_v38 = vadd.f32 %v2201_v45, %v2199_v28  ;;  %v6302_v45 = vadd.s32 7, %v5716_v16 }
 0xb2d   :  { %v2203_v39 = vmul.f32 0.001953125, %v2202_v38 }
 0xb2f   :  { %v2204_v46 = vadd.f32 1e-05, %v2203_v39 }
 0xb31   :  { %4917 = vrsqrt.f32 %v2204_v46 }
 0xb3b   :  { %v4918_v40 = vpop.eup %4917 }
 0xb3c   :  { %v2206_v0 = vmul.f32 %v4918_v40, %v2146_v47 }
 0xb3e   :  { %v2210_v41 = vrot.slane %v2206_v0, %v5370_v34 }
 0xb40   :  { %v2211_v48 = vmul.f32 %v2210_v41, %v5688_v54  ;;  %v2212_v49 = vmul.f32 %v2210_v41, %v5690_v20  ;;  %v2213_v50 = vmul.f32 %v2210_v41, %v5692_v55  ;;  %v2214_v34 = vmul.f32 %v2210_v41, %v5694_v56 }
 0xb42   :  { %v5897_v51 = vadd.f32 %v3527_v63, %v2211_v48  ;;  %v5899_v52 = vadd.f32 %v3527_v63, %v2212_v49  ;;  %v5912_v53 = vadd.f32 %v3527_v63, %v2213_v50  ;;  %v5934_v20 = vadd.f32 %v3527_v63, %v2214_v34 }
 0xb44   :  { %4204 = vmatprep.mubr.f32.mxu0 %v5897_v51  ;;  %4242 = vmatprep.mubr.f32.mxu1 %v5897_v51 }
 0xb45   :  { %4205 = vmatmul.mubr.f32.vlgmr.msra.gmra.mrb[4].mxu0 %v5899_v52  ;;  %4243 = vmatmul.mubr.f32.vlgmr.msra.gmra.mrb[24].mxu1 %v5899_v52 }
 0xb46   :  { %4672 = vmatpush3.bf16.msk.msra.mxu0 %vm5869_vm11, %v4950_v31  ;;  %4704 = vmatpush3.bf16.msk.msra.mxu1 %vm5876_vm12, %v4950_v31  ;;  %vm5954_vm11 = vmpackc.low %vm2666_vm7, %vm2665_vm6  ;;  %vm2667_vm12 = vcmp.eq.s32.totalorder %v5762_v23, %v5856_v42  ;;  %vm2532_vm7 = vcmp.eq.s32.totalorder %v5799_v29, %v5853_v37 }
 0xb47   :  { %4207 = vmatprep.mubr.f32.mxu0 %v5912_v53  ;;  %4245 = vmatprep.mubr.f32.mxu1 %v5912_v53  ;;  %vm5980_vm15 = vmpackc.low %vm2668_vm13, %vm2667_vm12  ;;  %vm2534_vm13 = vcmp.eq.s32.totalorder %v5817_v33, %v5853_v37 }
 0xb48   :  { %4674 = vmatprep.subr.msk.bf16.mxu0 %vm5908_vm1, %v4950_v31  ;;  %4706 = vmatprep.subr.msk.bf16.mxu1 %vm5916_vm3, %v4950_v31  ;;  %vm6036_vm12 = vmpackc.low %vm2672_vm10, %vm2671_vm9  ;;  %vm2800_vm10 = vcmp.eq.s32.totalorder %v5367_v32, %v6073_v5 }
 0xb49   :  { %4208 = vmatmul.mubr.f32.gmra.mrb[6].mxu0 %v5934_v20  ;;  %4246 = vmatmul.mubr.f32.gmra.mrb[26].mxu1 %v5934_v20 }
 0xb4a   :  { %4676 = vmatpush3.bf16.msk.msra.mxu0 %vm5908_vm1, %v4950_v31  ;;  %4708 = vmatpush3.bf16.msk.msra.mxu1 %vm5916_vm3, %v4950_v31  ;;  %vm2531_vm1 = vcmp.eq.s32.totalorder %v5783_v26, %v5853_v37  ;;  %vm2669_vm3 = vcmp.eq.s32.totalorder %v5780_v25, %v5856_v42 }
 0xb4b   :  { %4280 = vmatprep.mubr.f32.mxu0 %v5897_v51  ;;  %4318 = vmatprep.mubr.f32.mxu1 %v5897_v51  ;;  %vm6004_vm5 = vmpackc.low %vm2531_vm1, %vm2530_vm0  ;;  %vm2674_vm0 = vcmp.eq.s32.totalorder %v5820_v35, %v5856_v42 }
 0xb4c   :  { %4678 = vmatprep.subr.msk.bf16.mxu0 %vm5944_vm8, %v4950_v31  ;;  %4710 = vmatprep.subr.msk.bf16.mxu1 %vm5954_vm11, %v4950_v31  ;;  %vm6008_vm6 = vmpackc.low %vm2670_vm4, %vm2669_vm3  ;;  %vm2536_vm4 = vcmp.eq.s32.totalorder %v5835_v4, %v5853_v37 }
 0xb4e   :  { %4680 = vmatpush3.bf16.msk.msra.mxu0 %vm5944_vm8, %v4950_v31  ;;  %4712 = vmatpush3.bf16.msk.msra.mxu1 %vm5954_vm11, %v4950_v31  ;;  %vm2533_vm8 = vcmp.eq.s32.totalorder %v5802_v30, %v5853_v37 }
 0xb4f   :  { %4682 = vmatprep.subr.msk.bf16.mxu0 %vm5970_vm14, %v4950_v31  ;;  %4714 = vmatprep.subr.msk.bf16.mxu1 %vm5980_vm15, %v4950_v31  ;;  %vm6032_vm11 = vmpackc.low %vm2533_vm8, %vm2532_vm7  ;;  %vm2676_vm7 = vcmp.eq.s32.totalorder %v5838_v36, %v5856_v42 }
 0xb52   :  { %4684 = vmatpush3.bf16.msk.msra.mxu0 %vm5970_vm14, %v4950_v31  ;;  %4716 = vmatpush3.bf16.msk.msra.mxu1 %vm5980_vm15, %v4950_v31  ;;  %vm2535_vm14 = vcmp.eq.s32.totalorder %v5820_v35, %v5853_v37  ;;  %vm2673_vm15 = vcmp.eq.s32.totalorder %v5817_v33, %v5856_v42 }
 0xb53   :  { %4686 = vmatprep.subr.msk.bf16.mxu0 %vm6004_vm5, %v4950_v31  ;;  %4718 = vmatprep.subr.msk.bf16.mxu1 %vm6008_vm6, %v4950_v31  ;;  %vm6060_vm1 = vmpackc.low %vm2535_vm14, %vm2534_vm13  ;;  %vm2939_vm13 = vcmp.eq.s32.totalorder %v5367_v32, %v6080_v6 }
 0xb54   :  { %vm6064_vm3 = vmpackc.low %vm2674_vm0, %vm2673_vm15  ;;  %vm2802_vm0 = vcmp.eq.s32.totalorder %v5711_v14, %v6073_v5 }
 0xb56   :  { %4688 = vmatpush3.bf16.msk.msra.mxu0 %vm6004_vm5, %v4950_v31  ;;  %4720 = vmatpush3.bf16.msk.msra.mxu1 %vm6008_vm6, %v4950_v31  ;;  %vm2537_vm5 = vcmp.eq.s32.totalorder %v5838_v36, %v5853_v37  ;;  %vm2675_vm6 = vcmp.eq.s32.totalorder %v5835_v4, %v5856_v42 }
 0xb57   :  { %4690 = vmatprep.subr.msk.bf16.mxu0 %vm6032_vm11, %v4950_v31  ;;  %4722 = vmatprep.subr.msk.bf16.mxu1 %vm6036_vm12, %v4950_v31  ;;  %vm4697_vm8 = vmpackc.low %vm2537_vm5, %vm2536_vm4  ;;  %vm2942_vm4 = vcmp.eq.s32.totalorder %v5714_v15, %v6080_v6 }
 0xb58   :  { %vm4729_vm9 = vmpackc.low %vm2676_vm7, %vm2675_vm6  ;;  %vm2804_vm7 = vcmp.eq.s32.totalorder %v5747_v21, %v6073_v5 }
 0xb5a   :  { %4692 = vmatpush3.bf16.msk.msra.mxu0 %vm6032_vm11, %v4950_v31  ;;  %4724 = vmatpush3.bf16.msk.msra.mxu1 %vm6036_vm12, %v4950_v31  ;;  %vm2801_vm11 = vcmp.eq.s32.totalorder %v5707_v12, %v6073_v5  ;;  %vm2940_vm12 = vcmp.eq.s32.totalorder %v5707_v12, %v6080_v6 }
 0xb5b   :  { %4694 = vmatprep.subr.msk.bf16.mxu0 %vm6060_vm1, %v4950_v31  ;;  %4726 = vmatprep.subr.msk.bf16.mxu1 %vm6064_vm3, %v4950_v31  ;;  %vm6110_vm14 = vmpackc.low %vm2801_vm11, %vm2800_vm10  ;;  %vm2944_vm10 = vcmp.eq.s32.totalorder %v5750_v22, %v6080_v6 }
 0xb5c   :  { %vm6114_vm15 = vmpackc.low %vm2940_vm12, %vm2939_vm13  ;;  %vm2806_vm12 = vcmp.eq.s32.totalorder %v5762_v23, %v6073_v5 }
 0xb5e   :  { %4696 = vmatpush3.bf16.msk.msra.mxu0 %vm6060_vm1, %v4950_v31  ;;  %4728 = vmatpush3.bf16.msk.msra.mxu1 %vm6064_vm3, %v4950_v31  ;;  %vm2803_vm1 = vcmp.eq.s32.totalorder %v5714_v15, %v6073_v5  ;;  %vm2941_vm3 = vcmp.eq.s32.totalorder %v5711_v14, %v6080_v6 }
 0xb5f   :  { %4698 = vmatprep.subr.msk.bf16.mxu0 %vm4697_vm8, %v4950_v31  ;;  %4730 = vmatprep.subr.msk.bf16.mxu1 %vm4729_vm9, %v4950_v31  ;;  %vm6134_vm5 = vmpackc.low %vm2803_vm1, %vm2802_vm0  ;;  %vm2946_vm0 = vcmp.eq.s32.totalorder %v5765_v24, %v6080_v6 }
 0xb60   :  { %vm6140_vm6 = vmpackc.low %vm2942_vm4, %vm2941_vm3  ;;  %vm2808_vm4 = vcmp.eq.s32.totalorder %v5780_v25, %v6073_v5 }
 0xb62   :  { %4700 = vmatpush3.bf16.msk.msra.mxu0 %vm4697_vm8, %v4950_v31  ;;  %4732 = vmatpush3.bf16.msk.msra.mxu1 %vm4729_vm9, %v4950_v31  ;;  %vm2805_vm8 = vcmp.eq.s32.totalorder %v5750_v22, %v6073_v5  ;;  %vm2943_vm9 = vcmp.eq.s32.totalorder %v5747_v21, %v6080_v6 }
 0xb63   :  { %4734 = vmatprep.subr.msk.bf16.mxu0 %vm6110_vm14, %v4950_v31  ;;  %4766 = vmatprep.subr.msk.bf16.mxu1 %vm6114_vm15, %v4950_v31  ;;  %vm6166_vm11 = vmpackc.low %vm2805_vm8, %vm2804_vm7  ;;  %vm2948_vm7 = vcmp.eq.s32.totalorder %v5783_v26, %v6080_v6 }
 0xb64   :  { %vm6172_vm13 = vmpackc.low %vm2944_vm10, %vm2943_vm9  ;;  %vm2810_vm10 = vcmp.eq.s32.totalorder %v5799_v29, %v6073_v5 }
 0xb65   :  { %4281 = vmatmul.mubr.f32.vlgmr.msra.gmra.mrb[8].mxu0 %v5899_v52  ;;  %4319 = vmatmul.mubr.f32.vlgmr.msra.gmra.mrb[28].mxu1 %v5899_v52 }
 0xb66   :  { %4283 = vmatprep.mubr.f32.mxu0 %v5912_v53  ;;  %4321 = vmatprep.mubr.f32.mxu1 %v5912_v53 }
 0xb67   :  { %4736 = vmatpush3.bf16.msk.msra.mxu0 %vm6110_vm14, %v4950_v31  ;;  %4768 = vmatpush3.bf16.msk.msra.mxu1 %vm6114_vm15, %v4950_v31  ;;  %vm2807_vm14 = vcmp.eq.s32.totalorder %v5765_v24, %v6073_v5  ;;  %vm2945_vm15 = vcmp.eq.s32.totalorder %v5762_v23, %v6080_v6 }
 0xb68   :  { %4738 = vmatprep.subr.msk.bf16.mxu0 %vm6134_vm5, %v4950_v31  ;;  %4770 = vmatprep.subr.msk.bf16.mxu1 %vm6140_vm6, %v4950_v31  ;;  %vm6198_vm1 = vmpackc.low %vm2807_vm14, %vm2806_vm12  ;;  %vm2950_vm12 = vcmp.eq.s32.totalorder %v5802_v30, %v6080_v6 }
 0xb69   :  { %4284 = vmatmul.mubr.f32.gmra.mrb[10].mxu0 %v5934_v20  ;;  %4322 = vmatmul.mubr.f32.gmra.mrb[30].mxu1 %v5934_v20  ;;  %vm6202_vm3 = vmpackc.low %vm2946_vm0, %vm2945_vm15  ;;  %vm2812_vm0 = vcmp.eq.s32.totalorder %v5817_v33, %v6073_v5 }
 0xb6a   :  { %4356 = vmatprep.mubr.f32.mxu0 %v5897_v51  ;;  %4394 = vmatprep.mubr.f32.mxu1 %v5897_v51 }
 0xb6b   :  { %4740 = vmatpush3.bf16.msk.msra.mxu0 %vm6134_vm5, %v4950_v31  ;;  %4772 = vmatpush3.bf16.msk.msra.mxu1 %vm6140_vm6, %v4950_v31  ;;  %vm2809_vm5 = vcmp.eq.s32.totalorder %v5783_v26, %v6073_v5  ;;  %vm2947_vm6 = vcmp.eq.s32.totalorder %v5780_v25, %v6080_v6 }
 0xb6c   :  { %4742 = vmatprep.subr.msk.bf16.mxu0 %vm6166_vm11, %v4950_v31  ;;  %4774 = vmatprep.subr.msk.bf16.mxu1 %vm6172_vm13, %v4950_v31  ;;  %vm6226_vm8 = vmpackc.low %vm2809_vm5, %vm2808_vm4  ;;  %vm2952_vm4 = vcmp.eq.s32.totalorder %v5820_v35, %v6080_v6 }
 0xb6d   :  { %vm6230_vm9 = vmpackc.low %vm2948_vm7, %vm2947_vm6  ;;  %vm2814_vm7 = vcmp.eq.s32.totalorder %v5835_v4, %v6073_v5 }
 0xb6f   :  { %4744 = vmatpush3.bf16.msk.msra.mxu0 %vm6166_vm11, %v4950_v31  ;;  %4776 = vmatpush3.bf16.msk.msra.mxu1 %vm6172_vm13, %v4950_v31  ;;  %vm2811_vm11 = vcmp.eq.s32.totalorder %v5802_v30, %v6073_v5  ;;  %vm2949_vm13 = vcmp.eq.s32.totalorder %v5799_v29, %v6080_v6 }
 0xb70   :  { %4746 = vmatprep.subr.msk.bf16.mxu0 %vm6198_vm1, %v4950_v31  ;;  %4778 = vmatprep.subr.msk.bf16.mxu1 %vm6202_vm3, %v4950_v31  ;;  %vm6254_vm14 = vmpackc.low %vm2811_vm11, %vm2810_vm10  ;;  %vm2954_vm10 = vcmp.eq.s32.totalorder %v5838_v36, %v6080_v6 }
 0xb71   :  { %vm6258_vm15 = vmpackc.low %vm2950_vm12, %vm2949_vm13  ;;  %vm3078_vm12 = vcmp.eq.s32.totalorder %v5367_v32, %v6295_v44 }
 0xb73   :  { %4748 = vmatpush3.bf16.msk.msra.mxu0 %vm6198_vm1, %v4950_v31  ;;  %4780 = vmatpush3.bf16.msk.msra.mxu1 %vm6202_vm3, %v4950_v31  ;;  %vm2813_vm1 = vcmp.eq.s32.totalorder %v5820_v35, %v6073_v5  ;;  %vm2951_vm3 = vcmp.eq.s32.totalorder %v5817_v33, %v6080_v6 }
 0xb74   :  { %4750 = vmatprep.subr.msk.bf16.mxu0 %vm6226_vm8, %v4950_v31  ;;  %4782 = vmatprep.subr.msk.bf16.mxu1 %vm6230_vm9, %v4950_v31  ;;  %vm6282_vm5 = vmpackc.low %vm2813_vm1, %vm2812_vm0  ;;  %vm3217_vm0 = vcmp.eq.s32.totalorder %v5367_v32, %v6302_v45 }
 0xb75   :  { %vm6286_vm6 = vmpackc.low %vm2952_vm4, %vm2951_vm3  ;;  %vm3080_vm4 = vcmp.eq.s32.totalorder %v5711_v14, %v6295_v44 }
 0xb77   :  { %4752 = vmatpush3.bf16.msk.msra.mxu0 %vm6226_vm8, %v4950_v31  ;;  %4784 = vmatpush3.bf16.msk.msra.mxu1 %vm6230_vm9, %v4950_v31  ;;  %vm2815_vm8 = vcmp.eq.s32.totalorder %v5838_v36, %v6073_v5  ;;  %vm2953_vm9 = vcmp.eq.s32.totalorder %v5835_v4, %v6080_v6 }
 0xb78   :  { %4754 = vmatprep.subr.msk.bf16.mxu0 %vm6254_vm14, %v4950_v31  ;;  %4786 = vmatprep.subr.msk.bf16.mxu1 %vm6258_vm15, %v4950_v31  ;;  %vm4761_vm11 = vmpackc.low %vm2815_vm8, %vm2814_vm7  ;;  %vm3220_vm7 = vcmp.eq.s32.totalorder %v5714_v15, %v6302_v45 }
 0xb79   :  { %vm4793_vm13 = vmpackc.low %vm2954_vm10, %vm2953_vm9  ;;  %vm3082_vm10 = vcmp.eq.s32.totalorder %v5747_v21, %v6295_v44 }
 0xb7b   :  { %4756 = vmatpush3.bf16.msk.msra.mxu0 %vm6254_vm14, %v4950_v31  ;;  %4788 = vmatpush3.bf16.msk.msra.mxu1 %vm6258_vm15, %v4950_v31  ;;  %vm3079_vm14 = vcmp.eq.s32.totalorder %v5707_v12, %v6295_v44  ;;  %vm3218_vm15 = vcmp.eq.s32.totalorder %v5707_v12, %v6302_v45 }
 0xb7c   :  { %4758 = vmatprep.subr.msk.bf16.mxu0 %vm6282_vm5, %v4950_v31  ;;  %4790 = vmatprep.subr.msk.bf16.mxu1 %vm6286_vm6, %v4950_v31  ;;  %vm6332_vm1 = vmpackc.low %vm3079_vm14, %vm3078_vm12  ;;  %vm3222_vm12 = vcmp.eq.s32.totalorder %v5750_v22, %v6302_v45 }
 0xb7d   :  { %vm6336_vm3 = vmpackc.low %vm3218_vm15, %vm3217_vm0  ;;  %vm3084_vm15 = vcmp.eq.s32.totalorder %v5762_v23, %v6295_v44 }
 0xb7f   :  { %4760 = vmatpush3.bf16.msk.msra.mxu0 %vm6282_vm5, %v4950_v31  ;;  %4792 = vmatpush3.bf16.msk.msra.mxu1 %vm6286_vm6, %v4950_v31  ;;  %vm3081_vm5 = vcmp.eq.s32.totalorder %v5714_v15, %v6295_v44  ;;  %vm3219_vm6 = vcmp.eq.s32.totalorder %v5711_v14, %v6302_v45 }
 0xb80   :  { %4762 = vmatprep.subr.msk.bf16.mxu0 %vm4761_vm11, %v4950_v31  ;;  %4794 = vmatprep.subr.msk.bf16.mxu1 %vm4793_vm13, %v4950_v31  ;;  %vm6356_vm8 = vmpackc.low %vm3081_vm5, %vm3080_vm4  ;;  %vm3224_vm4 = vcmp.eq.s32.totalorder %v5765_v24, %v6302_v45 }
 0xb81   :  { %vm6362_vm9 = vmpackc.low %vm3220_vm7, %vm3219_vm6  ;;  %vm3086_vm7 = vcmp.eq.s32.totalorder %v5780_v25, %v6295_v44 }
 0xb83   :  { %4764 = vmatpush3.bf16.msk.msra.mxu0 %vm4761_vm11, %v4950_v31  ;;  %4796 = vmatpush3.bf16.msk.msra.mxu1 %vm4793_vm13, %v4950_v31  ;;  %vm3083_vm11 = vcmp.eq.s32.totalorder %v5750_v22, %v6295_v44  ;;  %vm3221_vm13 = vcmp.eq.s32.totalorder %v5747_v21, %v6302_v45 }
 0xb84   :  { %4798 = vmatprep.subr.msk.bf16.mxu0 %vm6332_vm1, %v4950_v31  ;;  %4830 = vmatprep.subr.msk.bf16.mxu1 %vm6336_vm3, %v4950_v31  ;;  %vm6388_vm14 = vmpackc.low %vm3083_vm11, %vm3082_vm10  ;;  %vm3226_vm10 = vcmp.eq.s32.totalorder %v5783_v26, %v6302_v45 }
 0xb85   :  { %vm6394_vm0 = vmpackc.low %vm3222_vm12, %vm3221_vm13  ;;  %vm3088_vm12 = vcmp.eq.s32.totalorder %v5799_v29, %v6295_v44 }
 0xb86   :  { %4357 = vmatmul.mubr.f32.vlgmr.msra.gmra.mrb[12].mxu0 %v5899_v52  ;;  %4395 = vmatmul.mubr.f32.vlgmr.msra.gmra.mrb[32].mxu1 %v5899_v52 }
 0xb87   :  { %4359 = vmatprep.mubr.f32.mxu0 %v5912_v53  ;;  %4397 = vmatprep.mubr.f32.mxu1 %v5912_v53 }
 0xb88   :  { %4800 = vmatpush3.bf16.msk.msra.mxu0 %vm6332_vm1, %v4950_v31  ;;  %4832 = vmatpush3.bf16.msk.msra.mxu1 %vm6336_vm3, %v4950_v31  ;;  %vm3085_vm1 = vcmp.eq.s32.totalorder %v5765_v24, %v6295_v44  ;;  %vm3223_vm3 = vcmp.eq.s32.totalorder %v5762_v23, %v6302_v45 }
 0xb89   :  { %4802 = vmatprep.subr.msk.bf16.mxu0 %vm6356_vm8, %v4950_v31  ;;  %4834 = vmatprep.subr.msk.bf16.mxu1 %vm6362_vm9, %v4950_v31  ;;  %vm6420_vm5 = vmpackc.low %vm3085_vm1, %vm3084_vm15  ;;  %vm3228_vm15 = vcmp.eq.s32.totalorder %v5802_v30, %v6302_v45 }
 0xb8a   :  { %4360 = vmatmul.mubr.f32.gmra.mrb[14].mxu0 %v5934_v20  ;;  %4398 = vmatmul.mubr.f32.gmra.mrb[34].mxu1 %v5934_v20  ;;  %vm6424_vm6 = vmpackc.low %vm3224_vm4, %vm3223_vm3  ;;  %vm3090_vm4 = vcmp.eq.s32.totalorder %v5817_v33, %v6295_v44 }
 0xb8b   :  { %4432 = vmatprep.mubr.f32.mxu0 %v5897_v51  ;;  %4470 = vmatprep.mubr.f32.mxu1 %v5897_v51 }
 0xb8c   :  { %4804 = vmatpush3.bf16.msk.msra.mxu0 %vm6356_vm8, %v4950_v31  ;;  %4836 = vmatpush3.bf16.msk.msra.mxu1 %vm6362_vm9, %v4950_v31  ;;  %vm3087_vm8 = vcmp.eq.s32.totalorder %v5783_v26, %v6295_v44  ;;  %vm3225_vm9 = vcmp.eq.s32.totalorder %v5780_v25, %v6302_v45 }
 0xb8d   :  { %4806 = vmatprep.subr.msk.bf16.mxu0 %vm6388_vm14, %v4950_v31  ;;  %4838 = vmatprep.subr.msk.bf16.mxu1 %vm6394_vm0, %v4950_v31  ;;  %vm6448_vm11 = vmpackc.low %vm3087_vm8, %vm3086_vm7  ;;  %vm3230_vm7 = vcmp.eq.s32.totalorder %v5820_v35, %v6302_v45 }
 0xb8e   :  { %vm6452_vm13 = vmpackc.low %vm3226_vm10, %vm3225_vm9  ;;  %vm3092_vm10 = vcmp.eq.s32.totalorder %v5835_v4, %v6295_v44 }
 0xb90   :  { %4808 = vmatpush3.bf16.msk.msra.mxu0 %vm6388_vm14, %v4950_v31  ;;  %4840 = vmatpush3.bf16.msk.msra.mxu1 %vm6394_vm0, %v4950_v31  ;;  %vm3089_vm14 = vcmp.eq.s32.totalorder %v5802_v30, %v6295_v44  ;;  %vm3227_vm0 = vcmp.eq.s32.totalorder %v5799_v29, %v6302_v45 }
 0xb91   :  { %4810 = vmatprep.subr.msk.bf16.mxu0 %vm6420_vm5, %v4950_v31  ;;  %4842 = vmatprep.subr.msk.bf16.mxu1 %vm6424_vm6, %v4950_v31  ;;  %vm6476_vm1 = vmpackc.low %vm3089_vm14, %vm3088_vm12  ;;  %vm3231_vm12 = vcmp.eq.s32.totalorder %v5835_v4, %v6302_v45 }
 0xb92   :  { %vm6480_vm3 = vmpackc.low %vm3228_vm15, %vm3227_vm0 }
 0xb94   :  { %4812 = vmatpush3.bf16.msk.msra.mxu0 %vm6420_vm5, %v4950_v31  ;;  %4844 = vmatpush3.bf16.msk.msra.mxu1 %vm6424_vm6, %v4950_v31  ;;  %vm3091_vm5 = vcmp.eq.s32.totalorder %v5820_v35, %v6295_v44  ;;  %vm3229_vm6 = vcmp.eq.s32.totalorder %v5817_v33, %v6302_v45 }
 0xb95   :  { %4814 = vmatprep.subr.msk.bf16.mxu0 %vm6448_vm11, %v4950_v31  ;;  %4846 = vmatprep.subr.msk.bf16.mxu1 %vm6452_vm13, %v4950_v31  ;;  %vm4821_vm8 = vmpackc.low %vm3091_vm5, %vm3090_vm4 }
 0xb96   :  { %vm4853_vm9 = vmpackc.low %vm3230_vm7, %vm3229_vm6 }
 0xb98   :  { %4816 = vmatpush3.bf16.msk.msra.mxu0 %vm6448_vm11, %v4950_v31  ;;  %4848 = vmatpush3.bf16.msk.msra.mxu1 %vm6452_vm13, %v4950_v31  ;;  %vm3093_vm11 = vcmp.eq.s32.totalorder %v5838_v36, %v6295_v44  ;;  %vm3232_vm13 = vcmp.eq.s32.totalorder %v5838_v36, %v6302_v45 }
 0xb99   :  { %4818 = vmatprep.subr.msk.bf16.mxu0 %vm6476_vm1, %v4950_v31  ;;  %4850 = vmatprep.subr.msk.bf16.mxu1 %vm6480_vm3, %v4950_v31  ;;  %vm4825_vm14 = vmpackc.low %vm3093_vm11, %vm3092_vm10 }
 0xb9a   :  { %vm4857_vm0 = vmpackc.low %vm3232_vm13, %vm3231_vm12 }
 0xb9c   :  { %4820 = vmatpush3.bf16.msk.msra.mxu0 %vm6476_vm1, %v4950_v31  ;;  %4852 = vmatpush3.bf16.msk.msra.mxu1 %vm6480_vm3, %v4950_v31 }
 0xb9d   :  { %4822 = vmatprep.subr.msk.bf16.mxu0 %vm4821_vm8, %v4950_v31  ;;  %4854 = vmatprep.subr.msk.bf16.mxu1 %vm4853_vm9, %v4950_v31 }
 0xba0   :  { %4824 = vmatpush3.bf16.msk.msra.mxu0 %vm4821_vm8, %v4950_v31  ;;  %4856 = vmatpush3.bf16.msk.msra.mxu1 %vm4853_vm9, %v4950_v31 }
 0xba1   :  { %4826 = vmatprep.subr.msk.bf16.mxu0 %vm4825_vm14, %v4950_v31  ;;  %4858 = vmatprep.subr.msk.bf16.mxu1 %vm4857_vm0, %v4950_v31 }
 0xba4   :  { %4828 = vmatpush3.bf16.msk.msra.mxu0 %vm4825_vm14, %v4950_v31  ;;  %4860 = vmatpush3.bf16.msk.msra.mxu1 %vm4857_vm0, %v4950_v31 }
 0xba7   :  { %4433 = vmatmul.mubr.f32.vlgmr.msra.gmra.mrb[16].mxu0 %v5899_v52  ;;  %4471 = vmatmul.mubr.f32.vlgmr.msra.gmra.mrb[36].mxu1 %v5899_v52 }
 0xba8   :  { %4435 = vmatprep.mubr.f32.mxu0 %v5912_v53  ;;  %4473 = vmatprep.mubr.f32.mxu1 %v5912_v53 }
 0xbab   :  { %4436 = vmatmul.mubr.f32.gmra.mrb[18].mxu0 %v5934_v20  ;;  %4474 = vmatmul.mubr.f32.gmra.mrb[38].mxu1 %v5934_v20 }
 0xc18   :  { %v4206_v30 = vpop.f32.mrb[4].mxu0  ;;  %v4244_v33 = vpop.f32.mrb[24].mxu1 }
 0xc19   :  { %2379 = vst.msk [vmem:[#allocation4 + $0x8] sm:$0xff] %vm1785_vm2, %v4206_v30  ;;  %2518 = vst.msk [vmem:[#allocation4 + $0x18] sm:$0xff] %vm1785_vm2, %v4244_v33  ;;  %v2359_v35 = vpop.f32.mrb[5].mxu0  ;;  %v2497_v31 = vpop.f32.mrb[25].mxu1 }
 0xc1a   :  { %2378 = vst.msk [vmem:[#allocation4] sm:$0xff] %vm1785_vm2, %v2359_v35  ;;  %2517 = vst.msk [vmem:[#allocation4 + $0x10] sm:$0xff] %vm1785_vm2, %v2497_v31 }
 0xc1c   :  { %v4209_v4 = vpop.f32.mrb[6].mxu0  ;;  %v4247_v36 = vpop.f32.mrb[26].mxu1 }
 0xc1d   :  { %2381 = vst.msk [vmem:[#allocation4 + $0x88] sm:$0xff] %vm1785_vm2, %v4209_v4  ;;  %2520 = vst.msk [vmem:[#allocation4 + $0x98] sm:$0xff] %vm1785_vm2, %v4247_v36  ;;  %v2369_v38 = vpop.f32.mrb[7].mxu0  ;;  %v2507_v39 = vpop.f32.mrb[27].mxu1 }
 0xc1e   :  { %2380 = vst.msk [vmem:[#allocation4 + $0x80] sm:$0xff] %vm1785_vm2, %v2369_v38  ;;  %2519 = vst.msk [vmem:[#allocation4 + $0x90] sm:$0xff] %vm1785_vm2, %v2507_v39 }
 0xc38   :  { %v4282_v46 = vpop.f32.mrb[8].mxu0  ;;  %v4320_v47 = vpop.f32.mrb[28].mxu1 }
 0xc39   :  { %2657 = vst.msk [vmem:[#allocation4 + $0x28] sm:$0xff] %vm1785_vm2, %v4282_v46  ;;  %2796 = vst.msk [vmem:[#allocation4 + $0x38] sm:$0xff] %vm1785_vm2, %v4320_v47  ;;  %v2636_v40 = vpop.f32.mrb[9].mxu0  ;;  %v2775_v0 = vpop.f32.mrb[29].mxu1 }
 0xc3a   :  { %2656 = vst.msk [vmem:[#allocation4 + $0x20] sm:$0xff] %vm1785_vm2, %v2636_v40  ;;  %2795 = vst.msk [vmem:[#allocation4 + $0x30] sm:$0xff] %vm1785_vm2, %v2775_v0 }
 0xc3c   :  { %v4285_v41 = vpop.f32.mrb[10].mxu0  ;;  %v4323_v63 = vpop.f32.mrb[30].mxu1 }
 0xc3d   :  { %2659 = vst.msk [vmem:[#allocation4 + $0xa8] sm:$0xff] %vm1785_vm2, %v4285_v41  ;;  %2798 = vst.msk [vmem:[#allocation4 + $0xb8] sm:$0xff] %vm1785_vm2, %v4323_v63  ;;  %v2646_v48 = vpop.f32.mrb[11].mxu0  ;;  %v2785_v49 = vpop.f32.mrb[31].mxu1 }
 0xc3e   :  { %2658 = vst.msk [vmem:[#allocation4 + $0xa0] sm:$0xff] %vm1785_vm2, %v2646_v48  ;;  %2797 = vst.msk [vmem:[#allocation4 + $0xb0] sm:$0xff] %vm1785_vm2, %v2785_v49 }
 0xc59   :  { %v4358_v50 = vpop.f32.mrb[12].mxu0  ;;  %v4396_v51 = vpop.f32.mrb[32].mxu1 }
 0xc5a   :  { %2935 = vst.msk [vmem:[#allocation4 + $0x48] sm:$0xff] %vm1785_vm2, %v4358_v50  ;;  %3074 = vst.msk [vmem:[#allocation4 + $0x58] sm:$0xff] %vm1785_vm2, %v4396_v51  ;;  %v2914_v52 = vpop.f32.mrb[13].mxu0  ;;  %v3053_v34 = vpop.f32.mrb[33].mxu1 }
 0xc5b   :  { %2934 = vst.msk [vmem:[#allocation4 + $0x40] sm:$0xff] %vm1785_vm2, %v2914_v52  ;;  %3073 = vst.msk [vmem:[#allocation4 + $0x50] sm:$0xff] %vm1785_vm2, %v3053_v34 }
 0xc5d   :  { %v4361_v19 = vpop.f32.mrb[14].mxu0  ;;  %v4399_v53 = vpop.f32.mrb[34].mxu1 }
 0xc5e   :  { %2937 = vst.msk [vmem:[#allocation4 + $0xc8] sm:$0xff] %vm1785_vm2, %v4361_v19  ;;  %3076 = vst.msk [vmem:[#allocation4 + $0xd8] sm:$0xff] %vm1785_vm2, %v4399_v53  ;;  %v2924_v54 = vpop.f32.mrb[15].mxu0  ;;  %v3063_v20 = vpop.f32.mrb[35].mxu1 }
 0xc5f   :  { %2936 = vst.msk [vmem:[#allocation4 + $0xc0] sm:$0xff] %vm1785_vm2, %v2924_v54  ;;  %3075 = vst.msk [vmem:[#allocation4 + $0xd0] sm:$0xff] %vm1785_vm2, %v3063_v20 }
 0xc7a   :  { %v4434_v55 = vpop.f32.mrb[16].mxu0  ;;  %v4472_v56 = vpop.f32.mrb[36].mxu1 }
 0xc7b   :  { %3213 = vst.msk [vmem:[#allocation4 + $0x68] sm:$0xff] %vm1785_vm2, %v4434_v55  ;;  %3352 = vst.msk [vmem:[#allocation4 + $0x78] sm:$0xff] %vm1785_vm2, %v4472_v56  ;;  %v3192_v57 = vpop.f32.mrb[17].mxu0  ;;  %v3331_v58 = vpop.f32.mrb[37].mxu1 }
 0xc7c   :  { %3212 = vst.msk [vmem:[#allocation4 + $0x60] sm:$0xff] %vm1785_vm2, %v3192_v57  ;;  %3351 = vst.msk [vmem:[#allocation4 + $0x70] sm:$0xff] %vm1785_vm2, %v3331_v58 }
 0xc7e   :  { %v4437_v59 = vpop.f32.mrb[18].mxu0  ;;  %v4475_v60 = vpop.f32.mrb[38].mxu1 }
 0xc7f   :  { %3215 = vst.msk [vmem:[#allocation4 + $0xe8] sm:$0xff] %vm1785_vm2, %v4437_v59  ;;  %3354 = vst.msk [vmem:[#allocation4 + $0xf8] sm:$0xff] %vm1785_vm2, %v4475_v60  ;;  %v3202_v62 = vpop.f32.mrb[19].mxu0  ;;  %v3341_v1 = vpop.f32.mrb[39].mxu1 }
 0xc80   :  { %3214 = vst.msk [vmem:[#allocation4 + $0xe0] sm:$0xff] %vm1785_vm2, %v3202_v62  ;;  %3353 = vst.msk [vmem:[#allocation4 + $0xf0] sm:$0xff] %vm1785_vm2, %v3341_v1 }
 0xc81   :  { %4930 = shalt.err (!%p4927_p4)
}
 0xc82   :  { %s4931_s18 = scalar_lea.hbm %s6586_s9, 4096 }
 0xc83   :  { %p4932_p5 = scmp.ne.s32.totalorder %s6586_s9, %s4931_s18  ;;  %p4935_p6 = scmp.lt.u32.totalorder %s4931_s18, %s6586_s9 }
 0xc85   :  { %p4937_p7 = pnand %p4935_p6, %p4932_p5 }
 0xc87   :  { %4940 = shalt.err (!%p4937_p7)
}
 0xc88   :  { %s4952_s22 = smov 128  }
 0xc89   :  { %3366 = dma.vmem_to_hbm [thread:$0]  %s3361_s8, 4096, %s6586_s9, [#allocation5], %s4952_s22, %s4952_s22, %s4945_s3  }
 0xc8a   :  { %4941 = dma.done.wait [#allocation5], 4096  }
 0xc8b   :  { %4942 = vsyncadd [#allocation5], 4294963200 }
 0xc8c   :  { %3370 = vsyncpa [#allocation5], 1 }

</bundles_post_ra>
